<compile_context>
chip_gen: v7x
topology: tpu7x:2x2x1
jax: 0.10.0
libtpu: 0.0.40
codegen_flags: <defaults>
</compile_context>

<pallas_src>
import math
import functools

import jax
import jax.numpy as jnp
from jax import lax
from jax.experimental import pallas as pl
from jax.experimental.pallas import tpu as pltpu

F32 = jnp.float32
BF16 = jnp.bfloat16


# ------------------------------------------------------------------
# helpers
# ------------------------------------------------------------------

def _compiler_params():
    return pltpu.CompilerParams(
        dimension_semantics=("parallel",),
        vmem_limit_bytes=32 * 1024 * 1024,
    )


def _row_tile(m, preferred=128):
    """Multiple-of-8 divisor of m, <= preferred, and giving >=2 grid steps when possible."""
    if m % 8 != 0:
        return m
    cap = min(preferred, m // 2) if m >= 16 else m
    cap -= cap % 8
    t = cap
    while t >= 8:
        if m % t == 0:
            return t
        t -= 8
    return m


def _layernorm(h, g, b, eps=1e-5):
    mu = jnp.mean(h, axis=-1, keepdims=True)
    var = jnp.mean(jnp.square(h - mu), axis=-1, keepdims=True)
    return (h - mu) * lax.rsqrt(var + eps) * g + b


def _mha(q, k, v, mask, w_out_ref, H, Dh, scale):
    """Multi-head attention + out-projection (bias excluded). Everything stays in VMEM values.

    q:[T,E] k,v:[S,E] f32 values, mask:[T,S] additive f32, w_out_ref: [E,E] bf16 ref.
    Head split = static lane slices; out-projection accumulated per head so the concatenated
    head output is never materialized (no in-kernel concat / transpose).
    """
    T, E = q.shape
    out = jnp.zeros((T, E), F32)
    for h in range(H):
        sl = slice(h * Dh, (h + 1) * Dh)
        qh = q[:, sl].astype(BF16)
        kh = k[:, sl].astype(BF16)
        vh = v[:, sl].astype(BF16)
        # q @ k^T via dot_general contracting the last dim of both (no explicit transpose)
        s = lax.dot_general(qh, kh, (((1,), (1,)), ((), ())),
                            preferred_element_type=F32)
        s = s * scale + mask
        s = s - jnp.max(s, axis=-1, keepdims=True)
        p = jnp.exp(s)
        p = p / jnp.sum(p, axis=-1, keepdims=True)          # exact divide (torch parity)
        oh = jnp.dot(p.astype(BF16), vh, preferred_element_type=F32)        # [T, Dh]
        out = out + jnp.dot(oh.astype(BF16), w_out_ref[sl, :],
                            preferred_element_type=F32)
    return out


# ------------------------------------------------------------------
# fused per-layer Pallas kernels (grid over batch)
# ------------------------------------------------------------------

def _make_encoder_layer(B, S, E, H, FF):
    Dh = E // H
    scale = 1.0 / math.sqrt(Dh)

    def kernel(x_ref, mask_ref,
               wqkv_ref, bqkv_ref, wo_ref, bo_ref, g1_ref, gb1_ref,
               w1_ref, b1_ref, w2_ref, b2_ref, g2_ref, gb2_ref,
               o_ref):
        x = x_ref[0]                                                     # [S, E] f32
        # packed QKV projection: one MXU matmul
        qkv = jnp.dot(x.astype(BF16), wqkv_ref[...],
                      preferred_element_type=F32) + bqkv_ref[...]        # [S, 3E]
        attn = _mha(qkv[:, :E], qkv[:, E:2 * E], qkv[:, 2 * E:],
                    mask_ref[0], wo_ref, H, Dh, scale) + bo_ref[...]
        h1 = _layernorm(x + attn, g1_ref[...], gb1_ref[...])
        # FFN (intermediate never leaves VMEM) + residual + LN
        ff = jnp.maximum(
            jnp.dot(h1.astype(BF16), w1_ref[...], preferred_element_type=F32)
            + b1_ref[...], 0.0)
        y = jnp.dot(ff.astype(BF16), w2_ref[...], preferred_element_type=F32) + b2_ref[...]
        o_ref[0] = _layernorm(h1 + y, g2_ref[...], gb2_ref[...])

    full2 = lambda shape: pl.BlockSpec(shape, lambda b: (0, 0))
    in_specs = [
        pl.BlockSpec((1, S, E), lambda b: (b, 0, 0)),     # x (per batch)
        pl.BlockSpec((1, S, S), lambda b: (b, 0, 0)),     # additive mask (per batch)
        full2((E, 3 * E)), full2((1, 3 * E)),             # packed qkv proj
        full2((E, E)), full2((1, E)),                     # out proj
        full2((1, E)), full2((1, E)),                     # ln1
        full2((E, FF)), full2((1, FF)),                   # ffn w1
        full2((FF, E)), full2((1, E)),                    # ffn w2
        full2((1, E)), full2((1, E)),                     # ln2
    ]
    call = pl.pallas_call(
        kernel,
        out_shape=jax.ShapeDtypeStruct((B, S, E), F32),
        grid=(B,),
        in_specs=in_specs,
        out_specs=pl.BlockSpec((1, S, E), lambda b: (b, 0, 0)),
        compiler_params=_compiler_params(),
    )

    def apply(x, mask, p):
        return call(x, mask,
                    p["w_qkv"], p["b_qkv"], p["w_out"], p["b_out"],
                    p["ln1_g"], p["ln1_b"],
                    p["w1"], p["b1"], p["w2"], p["b2"],
                    p["ln2_g"], p["ln2_b"])
    return apply


def _make_decoder_layer(B, T, S, E, H, FF):
    Dh = E // H
    scale = 1.0 / math.sqrt(Dh)

    def kernel(x_ref, mem_ref, smask_ref, cmask_ref,
               wqkv_ref, bqkv_ref, wo1_ref, bo1_ref, g1_ref, gb1_ref,
               wq_ref, bq_ref, wkv_ref, bkv_ref, wo2_ref, bo2_ref, g2_ref, gb2_ref,
               w1_ref, b1_ref, w2_ref, b2_ref, g3_ref, gb3_ref,
               o_ref):
        x = x_ref[0]                                                     # [T, E]
        mem = mem_ref[0]                                                 # [S, E]
        # --- self attention (packed QKV) ---
        qkv = jnp.dot(x.astype(BF16), wqkv_ref[...],
                      preferred_element_type=F32) + bqkv_ref[...]
        attn = _mha(qkv[:, :E], qkv[:, E:2 * E], qkv[:, 2 * E:],
                    smask_ref[0], wo1_ref, H, Dh, scale) + bo1_ref[...]
        h1 = _layernorm(x + attn, g1_ref[...], gb1_ref[...])
        # --- cross attention (separate q and packed kv weights) ---
        q = jnp.dot(h1.astype(BF16), wq_ref[...], preferred_element_type=F32) + bq_ref[...]
        kv = jnp.dot(mem.astype(BF16), wkv_ref[...], preferred_element_type=F32) + bkv_ref[...]
        attn2 = _mha(q, kv[:, :E], kv[:, E:],
                     cmask_ref[0], wo2_ref, H, Dh, scale) + bo2_ref[...]
        h2 = _layernorm(h1 + attn2, g2_ref[...], gb2_ref[...])
        # --- FFN + residual + LN ---
        ff = jnp.maximum(
            jnp.dot(h2.astype(BF16), w1_ref[...], preferred_element_type=F32)
            + b1_ref[...], 0.0)
        y = jnp.dot(ff.astype(BF16), w2_ref[...], preferred_element_type=F32) + b2_ref[...]
        o_ref[0] = _layernorm(h2 + y, g3_ref[...], gb3_ref[...])

    full2 = lambda shape: pl.BlockSpec(shape, lambda b: (0, 0))
    in_specs = [
        pl.BlockSpec((1, T, E), lambda b: (b, 0, 0)),     # x
        pl.BlockSpec((1, S, E), lambda b: (b, 0, 0)),     # memory
        pl.BlockSpec((1, T, T), lambda b: (b, 0, 0)),     # self-attn mask
        pl.BlockSpec((1, T, S), lambda b: (b, 0, 0)),     # cross-attn mask
        full2((E, 3 * E)), full2((1, 3 * E)),             # self qkv
        full2((E, E)), full2((1, E)),                     # self out proj
        full2((1, E)), full2((1, E)),                     # ln1
        full2((E, E)), full2((1, E)),                     # cross q
        full2((E, 2 * E)), full2((1, 2 * E)),             # cross kv
        full2((E, E)), full2((1, E)),                     # cross out proj
        full2((1, E)), full2((1, E)),                     # ln2
        full2((E, FF)), full2((1, FF)),                   # ffn w1
        full2((FF, E)), full2((1, E)),                    # ffn w2
        full2((1, E)), full2((1, E)),                     # ln3
    ]
    call = pl.pallas_call(
        kernel,
        out_shape=jax.ShapeDtypeStruct((B, T, E), F32),
        grid=(B,),
        in_specs=in_specs,
        out_specs=pl.BlockSpec((1, T, E), lambda b: (b, 0, 0)),
        compiler_params=_compiler_params(),
    )

    def apply(x, memory, self_mask, cross_mask, p):
        return call(x, memory, self_mask, cross_mask,
                    p["w_qkv"], p["b_qkv"], p["w_out"], p["b_out"],
                    p["ln1_g"], p["ln1_b"],
                    p["x_w_q"], p["x_b_q"], p["x_w_kv"], p["x_b_kv"],
                    p["x_w_out"], p["x_b_out"],
                    p["ln2_g"], p["ln2_b"],
                    p["w1"], p["b1"], p["w2"], p["b2"],
                    p["ln3_g"], p["ln3_b"])
    return apply


# ------------------------------------------------------------------
# small standalone kernels (final norms, generator)
# ------------------------------------------------------------------

def pallas_layernorm(x, g, b, eps=1e-5):
    """LayerNorm over last dim.  x:[M,E] f32, g/b:[1,E]."""
    M, E = x.shape
    tm = _row_tile(M)

    def kernel(x_ref, g_ref, b_ref, o_ref):
        o_ref[...] = _layernorm(x_ref[...], g_ref[...], b_ref[...], eps)

    return pl.pallas_call(
        kernel,
        out_shape=jax.ShapeDtypeStruct((M, E), F32),
        grid=(M // tm,),
        in_specs=[pl.BlockSpec((tm, E), lambda i: (i, 0)),
                  pl.BlockSpec((1, E), lambda i: (0, 0)),
                  pl.BlockSpec((1, E), lambda i: (0, 0))],
        out_specs=pl.BlockSpec((tm, E), lambda i: (i, 0)),
        compiler_params=_compiler_params(),
    )(x, g, b)


def pallas_linear(x, w, b):
    """y = x @ w + b.  x:[M,K] f32, w:[K,N] bf16 (N lane-dense), b:[1,N] f32."""
    M, K = x.shape
    N = w.shape[1]
    tm = _row_tile(M)

    def kernel(x_ref, w_ref, b_ref, o_ref):
        o_ref[...] = jnp.dot(x_ref[...].astype(BF16), w_ref[...],
                             preferred_element_type=F32) + b_ref[...]

    return pl.pallas_call(
        kernel,
        out_shape=jax.ShapeDtypeStruct((M, N), F32),
        grid=(M // tm,),
        in_specs=[pl.BlockSpec((tm, K), lambda i: (i, 0)),
                  pl.BlockSpec((K, N), lambda i: (0, 0)),
                  pl.BlockSpec((1, N), lambda i: (0, 0))],
        out_specs=pl.BlockSpec((tm, N), lambda i: (i, 0)),
        compiler_params=_compiler_params(),
    )(x, w, b)


# ------------------------------------------------------------------
# forward pass
# ------------------------------------------------------------------

def positional_encoding_table(emb_size, maxlen=64):
    den = jnp.exp(-jnp.arange(0, emb_size, 2, dtype=F32) * math.log(10000.0) / emb_size)
    pos = jnp.arange(0, maxlen, dtype=F32).reshape(maxlen, 1)
    pe = jnp.zeros((maxlen, emb_size), F32)
    pe = pe.at[:, 0::2].set(jnp.sin(pos * den))
    pe = pe.at[:, 1::2].set(jnp.cos(pos * den))
    return pe  # [maxlen, E]


def seq2seq_transformer_forward(params, src, trg, src_mask, tgt_mask,
                                src_padding_mask, tgt_padding_mask, memory_key_padding_mask):
    E = params["emb_size"]
    H = params["nhead"]
    S, B = src.shape
    T = trg.shape[0]
    FF = params["encoder_layers"][0]["w1"].shape[1]

    # Embedding gather + sqrt(E) scale + positional add: plain XLA (fuses with the gather).
    sqrt_e = math.sqrt(E)
    pos = params["pos"]
    src_x = jnp.take(params["src_emb"], src.T, axis=0) * sqrt_e + pos[None, :S, :]   # [B,S,E]
    tgt_x = jnp.take(params["tgt_emb"], trg.T, axis=0) * sqrt_e + pos[None, :T, :]   # [B,T,E]

    # additive masks built ONCE per stack at [B, T, S] (not replicated per head)
    neg = jnp.float32(-1e9)
    enc_mask = (jnp.broadcast_to(src_mask[None], (B, S, S))
                + jnp.where(src_padding_mask, neg, 0.0).astype(F32)[:, None, :])
    dec_self_mask = (jnp.broadcast_to(tgt_mask[None], (B, T, T))
                     + jnp.where(tgt_padding_mask, neg, 0.0).astype(F32)[:, None, :])
    cross_mask = jnp.broadcast_to(
        jnp.where(memory_key_padding_mask, neg, 0.0).astype(F32)[:, None, :], (B, T, S))

    enc_apply = _make_encoder_layer(B, S, E, H, FF)
    dec_apply = _make_decoder_layer(B, T, S, E, H, FF)

    # encoder (one fused pallas_call per layer)
    memory = src_x
    for lp in params["encoder_layers"]:
        memory = enc_apply(memory, enc_mask, lp)
    memory = pallas_layernorm(memory.reshape(B * S, E),
                              params["enc_norm_g"], params["enc_norm_b"]).reshape(B, S, E)

    # decoder (one fused pallas_call per layer)
    out = tgt_x
    for lp in params["decoder_layers"]:
        out = dec_apply(out, memory, dec_self_mask, cross_mask, lp)
    out = pallas_layernorm(out.reshape(B * T, E),
                           params["dec_norm_g"], params["dec_norm_b"]).reshape(B, T, E)

    # generator with lane-dense (128-padded) vocab; slice + transpose to [T, B, V] outside
    V = params["tgt_vocab_size"]
    Vp = params["gen_w"].shape[1]
    logits = pallas_linear(out.reshape(B * T, E), params["gen_w"], params["gen_b"])
    logits = logits.reshape(B, T, Vp).transpose(1, 0, 2)[:, :, :V]
    return logits


# ------------------------------------------------------------------
# deterministic parameter init (matmul weights bf16; biases / LN / embeddings f32)
# ------------------------------------------------------------------

def init_params(key, num_encoder_layers, num_decoder_layers, emb_size, nhead,
                src_vocab_size, tgt_vocab_size, dim_feedforward):
    keys = iter(jax.random.split(key, 1024))
    E, FF = emb_size, dim_feedforward

    def w_init(shape):
        return (jax.random.normal(next(keys), shape, F32) * 0.02).astype(BF16)

    def b_init(n):
        return jax.random.normal(next(keys), (1, n), F32) * 0.02

    def ones(n):
        return jnp.ones((1, n), F32)

    def zeros(n):
        return jnp.zeros((1, n), F32)

    def enc_layer():
        return {
            "w_qkv": w_init((E, 3 * E)), "b_qkv": b_init(3 * E),
            "w_out": w_init((E, E)), "b_out": b_init(E),
            "ln1_g": ones(E), "ln1_b": zeros(E),
            "w1": w_init((E, FF)), "b1": b_init(FF),
            "w2": w_init((FF, E)), "b2": b_init(E),
            "ln2_g": ones(E), "ln2_b": zeros(E),
        }

    def dec_layer():
        return {
            "w_qkv": w_init((E, 3 * E)), "b_qkv": b_init(3 * E),
            "w_out": w_init((E, E)), "b_out": b_init(E),
            "ln1_g": ones(E), "ln1_b": zeros(E),
            # cross-attention q / kv stored separately (no wrapper-side weight slicing)
            "x_w_q": w_init((E, E)), "x_b_q": b_init(E),
            "x_w_kv": w_init((E, 2 * E)), "x_b_kv": b_init(2 * E),
            "x_w_out": w_init((E, E)), "x_b_out": b_init(E),
            "ln2_g": ones(E), "ln2_b": zeros(E),
            "w1": w_init((E, FF)), "b1": b_init(FF),
            "w2": w_init((FF, E)), "b2": b_init(E),
            "ln3_g": ones(E), "ln3_b": zeros(E),
        }

    # lane-dense generator: pad the vocab dim up to a multiple of 128
    v_pad = ((tgt_vocab_size + 127) // 128) * 128
    gen_w = jnp.zeros((E, v_pad), BF16).at[:, :tgt_vocab_size].set(
        w_init((E, tgt_vocab_size)))
    gen_b = jnp.zeros((1, v_pad), F32).at[:, :tgt_vocab_size].set(
        b_init(tgt_vocab_size))

    return {
        "emb_size": emb_size,
        "nhead": nhead,
        "tgt_vocab_size": tgt_vocab_size,
        "src_emb": jax.random.normal(next(keys), (src_vocab_size, E), F32) * 0.02,
        "tgt_emb": jax.random.normal(next(keys), (tgt_vocab_size, E), F32) * 0.02,
        "pos": positional_encoding_table(E),
        "encoder_layers": [enc_layer() for _ in range(num_encoder_layers)],
        "decoder_layers": [dec_layer() for _ in range(num_decoder_layers)],
        "enc_norm_g": ones(E), "enc_norm_b": zeros(E),
        "dec_norm_g": ones(E), "dec_norm_b": zeros(E),
        "gen_w": gen_w, "gen_b": gen_b,
    }


# ------------------------------------------------------------------
# main
# ------------------------------------------------------------------

if __name__ == "__main__":
    NUM_ENC, NUM_DEC = 2, 2
    EMB, NHEAD, FF = 32, 4, 64
    SRC_VOCAB, TGT_VOCAB = 50, 48
    S_LEN, T_LEN, BATCH = 8, 8, 2

    key = jax.random.PRNGKey(0)
    pkey, skey, tkey = jax.random.split(key, 3)

    params = init_params(pkey, NUM_ENC, NUM_DEC, EMB, NHEAD, SRC_VOCAB, TGT_VOCAB, FF)

    src = jax.random.randint(skey, (S_LEN, BATCH), 1, SRC_VOCAB, dtype=jnp.int32)   # [S, B]
    trg = jax.random.randint(tkey, (T_LEN, BATCH), 1, TGT_VOCAB, dtype=jnp.int32)   # [T, B]

    src_mask = jnp.zeros((S_LEN, S_LEN), jnp.float32)
    # causal mask (generate_square_subsequent_mask semantics), large-negative instead of -inf
    tgt_mask = jnp.where(jnp.triu(jnp.ones((T_LEN, T_LEN), bool), k=1),
                         -1e9, 0.0).astype(jnp.float32)

    # pad the last two positions of batch 1
    src_padding_mask = jnp.zeros((BATCH, S_LEN), bool).at[1, -2:].set(True)
    tgt_padding_mask = jnp.zeros((BATCH, T_LEN), bool).at[1, -2:].set(True)
    memory_key_padding_mask = src_padding_mask

    fwd = jax.jit(functools.partial(seq2seq_transformer_forward, params))
    logits = fwd(src, trg, src_mask, tgt_mask, src_padding_mask, tgt_padding_mask,
                 memory_key_padding_mask)
    jax.block_until_ready(logits)

    assert logits.shape == (T_LEN, BATCH, TGT_VOCAB)
    assert bool(jnp.all(jnp.isfinite(logits)))
    print("KERNEL_OK")
</pallas_src>

<mosaic_0001>
module attributes {stable_mosaic.version = 11 : i64} {
  func.func @kernel(%arg0: i32, %arg1: memref<8x32xf32, #tpu.memory_space<vmem>>, %arg2: memref<32x128xbf16, #tpu.memory_space<vmem>>, %arg3: memref<1x128xf32, #tpu.memory_space<vmem>>, %arg4: memref<8x128xf32, #tpu.memory_space<vmem>>) attributes {dimension_semantics = [#tpu.dimension_semantics<parallel>], iteration_bounds = array<i64: 2>, scalar_prefetch = 0 : i64, scratch_operands = 0 : i64, tpu.core_type = #tpu.core_type<tc>, window_params = [{transform_indices = @transform_0, window_bounds = array<i64: 8, 32>}, {pipeline_mode = #tpu.pipeline_mode<synchronous>, transform_indices = @transform_1, window_bounds = array<i64: 32, 128>}, {pipeline_mode = #tpu.pipeline_mode<synchronous>, transform_indices = @transform_2, window_bounds = array<i64: 1, 128>}, {transform_indices = @transform_3, window_bounds = array<i64: 8, 128>}]} {
    %c0 = arith.constant 0 : index
    %c0_0 = arith.constant 0 : index
    %0 = vector.load %arg1[%c0, %c0_0] : memref<8x32xf32, #tpu.memory_space<vmem>>, vector<8x32xf32>
    %1 = arith.truncf %0 : vector<8x32xf32> to vector<8x32xbf16>
    %c0_1 = arith.constant 0 : index
    %c0_2 = arith.constant 0 : index
    %2 = vector.load %arg2[%c0_1, %c0_2] : memref<32x128xbf16, #tpu.memory_space<vmem>>, vector<32x128xbf16>
    %cst = arith.constant dense<0.000000e+00> : vector<8x128xf32>
    %3 = tpu.matmul %1, %2, %cst {dimension_numbers = #tpu.dot_dimension_numbers<[1], [0], [0], [1], [0, 0, 1, 1], [], []>} : vector<8x32xbf16>, vector<32x128xbf16>, vector<8x128xf32> -> vector<8x128xf32>
    %c0_3 = arith.constant 0 : index
    %c0_4 = arith.constant 0 : index
    %4 = vector.load %arg3[%c0_3, %c0_4] : memref<1x128xf32, #tpu.memory_space<vmem>>, vector<1x128xf32>
    %5 = vector.broadcast %4 : vector<1x128xf32> to vector<8x128xf32>
    %6 = arith.addf %3, %5 : vector<8x128xf32>
    %c0_5 = arith.constant 0 : index
    %c0_6 = arith.constant 0 : index
    %7 = vector.load %arg4[%c0_5, %c0_6] : memref<8x128xf32, #tpu.memory_space<vmem>>, vector<8x128xf32>
    tpu.vector_store %arg4[%c0_5, %c0_6], %6 {strides = array<i32>} : memref<8x128xf32, #tpu.memory_space<vmem>>, vector<8x128xf32>,
    return
  }
  func.func @transform_0(%arg0: i32) -> (i32, i32) {
    %c0_i32 = arith.constant 0 : i32
    %c0_i32_0 = arith.constant 0 : i32
    return %arg0, %c0_i32 : i32, i32
  }
  func.func @transform_1(%arg0: i32) -> (i32, i32) {
    %c0_i32 = arith.constant 0 : i32
    %c0_i32_0 = arith.constant 0 : i32
    %c0_i32_1 = arith.constant 0 : i32
    return %c0_i32, %c0_i32_0 : i32, i32
  }
  func.func @transform_2(%arg0: i32) -> (i32, i32) {
    %c0_i32 = arith.constant 0 : i32
    %c0_i32_0 = arith.constant 0 : i32
    %c0_i32_1 = arith.constant 0 : i32
    return %c0_i32, %c0_i32_0 : i32, i32
  }
  func.func @transform_3(%arg0: i32) -> (i32, i32) {
    %c0_i32 = arith.constant 0 : i32
    %c0_i32_0 = arith.constant 0 : i32
    return %arg0, %c0_i32 : i32, i32
  }
}

module attributes {stable_mosaic.version = 11 : i64} {
  func.func @kernel(%arg0: i32, %arg1: memref<1x8x32xf32, #tpu.memory_space<vmem>>, %arg2: memref<1x8x8xf32, #tpu.memory_space<vmem>>, %arg3: memref<32x96xbf16, #tpu.memory_space<vmem>>, %arg4: memref<1x96xf32, #tpu.memory_space<vmem>>, %arg5: memref<32x32xbf16, #tpu.memory_space<vmem>>, %arg6: memref<1x32xf32, #tpu.memory_space<vmem>>, %arg7: memref<1x32xf32, #tpu.memory_space<vmem>>, %arg8: memref<1x32xf32, #tpu.memory_space<vmem>>, %arg9: memref<32x64xbf16, #tpu.memory_space<vmem>>, %arg10: memref<1x64xf32, #tpu.memory_space<vmem>>, %arg11: memref<64x32xbf16, #tpu.memory_space<vmem>>, %arg12: memref<1x32xf32, #tpu.memory_space<vmem>>, %arg13: memref<1x32xf32, #tpu.memory_space<vmem>>, %arg14: memref<1x32xf32, #tpu.memory_space<vmem>>, %arg15: memref<1x8x32xf32, #tpu.memory_space<vmem>>) attributes {dimension_semantics = [#tpu.dimension_semantics<parallel>], iteration_bounds = array<i64: 2>, scalar_prefetch = 0 : i64, scratch_operands = 0 : i64, tpu.core_type = #tpu.core_type<tc>, window_params = [{transform_indices = @transform_0, window_bounds = array<i64: 1, 8, 32>}, {transform_indices = @transform_1, window_bounds = array<i64: 1, 8, 8>}, {pipeline_mode = #tpu.pipeline_mode<synchronous>, transform_indices = @transform_2, window_bounds = array<i64: 32, 96>}, {pipeline_mode = #tpu.pipeline_mode<synchronous>, transform_indices = @transform_3, window_bounds = array<i64: 1, 96>}, {pipeline_mode = #tpu.pipeline_mode<synchronous>, transform_indices = @transform_4, window_bounds = array<i64: 32, 32>}, {pipeline_mode = #tpu.pipeline_mode<synchronous>, transform_indices = @transform_5, window_bounds = array<i64: 1, 32>}, {pipeline_mode = #tpu.pipeline_mode<synchronous>, transform_indices = @transform_6, window_bounds = array<i64: 1, 32>}, {pipeline_mode = #tpu.pipeline_mode<synchronous>, transform_indices = @transform_7, window_bounds = array<i64: 1, 32>}, {pipeline_mode = #tpu.pipeline_mode<synchronous>, transform_indices = @transform_8, window_bounds = array<i64: 32, 64>}, {pipeline_mode = #tpu.pipeline_mode<synchronous>, transform_indices = @transform_9, window_bounds = array<i64: 1, 64>}, {pipeline_mode = #tpu.pipeline_mode<synchronous>, transform_indices = @transform_10, window_bounds = array<i64: 64, 32>}, {pipeline_mode = #tpu.pipeline_mode<synchronous>, transform_indices = @transform_11, window_bounds = array<i64: 1, 32>}, {pipeline_mode = #tpu.pipeline_mode<synchronous>, transform_indices = @transform_12, window_bounds = array<i64: 1, 32>}, {pipeline_mode = #tpu.pipeline_mode<synchronous>, transform_indices = @transform_13, window_bounds = array<i64: 1, 32>}, {transform_indices = @transform_14, window_bounds = array<i64: 1, 8, 32>}]} {
    %c0 = arith.constant 0 : index
    %c0_0 = arith.constant 0 : index
    %c0_1 = arith.constant 0 : index
    %0 = vector.load %arg1[%c0, %c0_0, %c0_1] : memref<1x8x32xf32, #tpu.memory_space<vmem>>, vector<1x8x32xf32>
    %1 = vector.shape_cast %0 : vector<1x8x32xf32> to vector<8x32xf32>
    %2 = arith.truncf %1 : vector<8x32xf32> to vector<8x32xbf16>
    %c0_2 = arith.constant 0 : index
    %c0_3 = arith.constant 0 : index
    %3 = vector.load %arg3[%c0_2, %c0_3] : memref<32x96xbf16, #tpu.memory_space<vmem>>, vector<32x96xbf16>
    %cst = arith.constant dense<0.000000e+00> : vector<8x96xf32>
    %4 = tpu.matmul %2, %3, %cst {dimension_numbers = #tpu.dot_dimension_numbers<[1], [0], [0], [1], [0, 0, 1, 1], [], []>} : vector<8x32xbf16>, vector<32x96xbf16>, vector<8x96xf32> -> vector<8x96xf32>
    %c0_4 = arith.constant 0 : index
    %c0_5 = arith.constant 0 : index
    %5 = vector.load %arg4[%c0_4, %c0_5] : memref<1x96xf32, #tpu.memory_space<vmem>>, vector<1x96xf32>
    %6 = vector.broadcast %5 : vector<1x96xf32> to vector<8x96xf32>
    %7 = arith.addf %4, %6 : vector<8x96xf32>
    %8 = vector.extract_strided_slice %7 {offsets = [0, 0], sizes = [8, 32], strides = [1, 1]} : vector<8x96xf32> to vector<8x32xf32>
    %9 = vector.extract_strided_slice %7 {offsets = [0, 32], sizes = [8, 32], strides = [1, 1]} : vector<8x96xf32> to vector<8x32xf32>
    %10 = vector.extract_strided_slice %7 {offsets = [0, 64], sizes = [8, 32], strides = [1, 1]} : vector<8x96xf32> to vector<8x32xf32>
    %c0_6 = arith.constant 0 : index
    %c0_7 = arith.constant 0 : index
    %c0_8 = arith.constant 0 : index
    %11 = vector.load %arg2[%c0_6, %c0_7, %c0_8] : memref<1x8x8xf32, #tpu.memory_space<vmem>>, vector<1x8x8xf32>
    %12 = vector.shape_cast %11 : vector<1x8x8xf32> to vector<8x8xf32>
    %cst_9 = arith.constant 0.000000e+00 : f32
    %13 = vector.broadcast %cst_9 : f32 to vector<8x32xf32>
    %14 = vector.extract_strided_slice %8 {offsets = [0, 0], sizes = [8, 8], strides = [1, 1]} : vector<8x32xf32> to vector<8x8xf32>
    %15 = arith.truncf %14 : vector<8x8xf32> to vector<8x8xbf16>
    %16 = vector.extract_strided_slice %9 {offsets = [0, 0], sizes = [8, 8], strides = [1, 1]} : vector<8x32xf32> to vector<8x8xf32>
    %17 = arith.truncf %16 : vector<8x8xf32> to vector<8x8xbf16>
    %18 = vector.extract_strided_slice %10 {offsets = [0, 0], sizes = [8, 8], strides = [1, 1]} : vector<8x32xf32> to vector<8x8xf32>
    %19 = arith.truncf %18 : vector<8x8xf32> to vector<8x8xbf16>
    %cst_10 = arith.constant dense<0.000000e+00> : vector<8x8xf32>
    %20 = tpu.matmul %15, %17, %cst_10 {dimension_numbers = #tpu.dot_dimension_numbers<[1], [1], [0], [0], [0, 0, 1, 0], [], []>} : vector<8x8xbf16>, vector<8x8xbf16>, vector<8x8xf32> -> vector<8x8xf32>
    %cst_11 = arith.constant 0.353553385 : f32
    %21 = vector.broadcast %cst_11 : f32 to vector<8x8xf32>
    %22 = arith.mulf %20, %21 : vector<8x8xf32>
    %23 = arith.addf %22, %12 : vector<8x8xf32>
    %cst_12 = arith.constant dense<0xFF800000> : vector<8xf32>
    %24 = vector.multi_reduction <maximumf>, %23, %cst_12 [1] : vector<8x8xf32> to vector<8xf32>
    %25 = vector.shape_cast %24 : vector<8xf32> to vector<8x1xf32>
    %26 = vector.broadcast %25 : vector<8x1xf32> to vector<8x8xf32>
    %27 = arith.subf %23, %26 : vector<8x8xf32>
    %28 = math.exp %27 : vector<8x8xf32>
    %cst_13 = arith.constant dense<0.000000e+00> : vector<8xf32>
    %29 = vector.multi_reduction <add>, %28, %cst_13 [1] : vector<8x8xf32> to vector<8xf32>
    %30 = vector.shape_cast %29 : vector<8xf32> to vector<8x1xf32>
    %31 = vector.broadcast %30 : vector<8x1xf32> to vector<8x8xf32>
    %32 = arith.divf %28, %31 : vector<8x8xf32>
    %33 = arith.truncf %32 : vector<8x8xf32> to vector<8x8xbf16>
    %cst_14 = arith.constant dense<0.000000e+00> : vector<8x8xf32>
    %34 = tpu.matmul %33, %19, %cst_14 {dimension_numbers = #tpu.dot_dimension_numbers<[1], [0], [0], [1], [0, 0, 1, 1], [], []>} : vector<8x8xbf16>, vector<8x8xbf16>, vector<8x8xf32> -> vector<8x8xf32>
    %35 = arith.truncf %34 : vector<8x8xf32> to vector<8x8xbf16>
    %c0_15 = arith.constant 0 : index
    %c0_16 = arith.constant 0 : index
    %36 = vector.load %arg5[%c0_15, %c0_16] : memref<32x32xbf16, #tpu.memory_space<vmem>>, vector<8x32xbf16>
    %cst_17 = arith.constant dense<0.000000e+00> : vector<8x32xf32>
    %37 = tpu.matmul %35, %36, %cst_17 {dimension_numbers = #tpu.dot_dimension_numbers<[1], [0], [0], [1], [0, 0, 1, 1], [], []>} : vector<8x8xbf16>, vector<8x32xbf16>, vector<8x32xf32> -> vector<8x32xf32>
    %38 = arith.addf %13, %37 : vector<8x32xf32>
    %39 = vector.extract_strided_slice %8 {offsets = [0, 8], sizes = [8, 8], strides = [1, 1]} : vector<8x32xf32> to vector<8x8xf32>
    %40 = arith.truncf %39 : vector<8x8xf32> to vector<8x8xbf16>
    %41 = vector.extract_strided_slice %9 {offsets = [0, 8], sizes = [8, 8], strides = [1, 1]} : vector<8x32xf32> to vector<8x8xf32>
    %42 = arith.truncf %41 : vector<8x8xf32> to vector<8x8xbf16>
    %43 = vector.extract_strided_slice %10 {offsets = [0, 8], sizes = [8, 8], strides = [1, 1]} : vector<8x32xf32> to vector<8x8xf32>
    %44 = arith.truncf %43 : vector<8x8xf32> to vector<8x8xbf16>
    %cst_18 = arith.constant dense<0.000000e+00> : vector<8x8xf32>
    %45 = tpu.matmul %40, %42, %cst_18 {dimension_numbers = #tpu.dot_dimension_numbers<[1], [1], [0], [0], [0, 0, 1, 0], [], []>} : vector<8x8xbf16>, vector<8x8xbf16>, vector<8x8xf32> -> vector<8x8xf32>
    %cst_19 = arith.constant 0.353553385 : f32
    %46 = vector.broadcast %cst_19 : f32 to vector<8x8xf32>
    %47 = arith.mulf %45, %46 : vector<8x8xf32>
    %48 = arith.addf %47, %12 : vector<8x8xf32>
    %cst_20 = arith.constant dense<0xFF800000> : vector<8xf32>
    %49 = vector.multi_reduction <maximumf>, %48, %cst_20 [1] : vector<8x8xf32> to vector<8xf32>
    %50 = vector.shape_cast %49 : vector<8xf32> to vector<8x1xf32>
    %51 = vector.broadcast %50 : vector<8x1xf32> to vector<8x8xf32>
    %52 = arith.subf %48, %51 : vector<8x8xf32>
    %53 = math.exp %52 : vector<8x8xf32>
    %cst_21 = arith.constant dense<0.000000e+00> : vector<8xf32>
    %54 = vector.multi_reduction <add>, %53, %cst_21 [1] : vector<8x8xf32> to vector<8xf32>
    %55 = vector.shape_cast %54 : vector<8xf32> to vector<8x1xf32>
    %56 = vector.broadcast %55 : vector<8x1xf32> to vector<8x8xf32>
    %57 = arith.divf %53, %56 : vector<8x8xf32>
    %58 = arith.truncf %57 : vector<8x8xf32> to vector<8x8xbf16>
    %cst_22 = arith.constant dense<0.000000e+00> : vector<8x8xf32>
    %59 = tpu.matmul %58, %44, %cst_22 {dimension_numbers = #tpu.dot_dimension_numbers<[1], [0], [0], [1], [0, 0, 1, 1], [], []>} : vector<8x8xbf16>, vector<8x8xbf16>, vector<8x8xf32> -> vector<8x8xf32>
    %60 = arith.truncf %59 : vector<8x8xf32> to vector<8x8xbf16>
    %c8 = arith.constant 8 : index
    %c0_23 = arith.constant 0 : index
    %61 = vector.load %arg5[%c8, %c0_23] : memref<32x32xbf16, #tpu.memory_space<vmem>>, vector<8x32xbf16>
    %cst_24 = arith.constant dense<0.000000e+00> : vector<8x32xf32>
    %62 = tpu.matmul %60, %61, %cst_24 {dimension_numbers = #tpu.dot_dimension_numbers<[1], [0], [0], [1], [0, 0, 1, 1], [], []>} : vector<8x8xbf16>, vector<8x32xbf16>, vector<8x32xf32> -> vector<8x32xf32>
    %63 = arith.addf %38, %62 : vector<8x32xf32>
    %64 = vector.extract_strided_slice %8 {offsets = [0, 16], sizes = [8, 8], strides = [1, 1]} : vector<8x32xf32> to vector<8x8xf32>
    %65 = arith.truncf %64 : vector<8x8xf32> to vector<8x8xbf16>
    %66 = vector.extract_strided_slice %9 {offsets = [0, 16], sizes = [8, 8], strides = [1, 1]} : vector<8x32xf32> to vector<8x8xf32>
    %67 = arith.truncf %66 : vector<8x8xf32> to vector<8x8xbf16>
    %68 = vector.extract_strided_slice %10 {offsets = [0, 16], sizes = [8, 8], strides = [1, 1]} : vector<8x32xf32> to vector<8x8xf32>
    %69 = arith.truncf %68 : vector<8x8xf32> to vector<8x8xbf16>
    %cst_25 = arith.constant dense<0.000000e+00> : vector<8x8xf32>
    %70 = tpu.matmul %65, %67, %cst_25 {dimension_numbers = #tpu.dot_dimension_numbers<[1], [1], [0], [0], [0, 0, 1, 0], [], []>} : vector<8x8xbf16>, vector<8x8xbf16>, vector<8x8xf32> -> vector<8x8xf32>
    %cst_26 = arith.constant 0.353553385 : f32
    %71 = vector.broadcast %cst_26 : f32 to vector<8x8xf32>
    %72 = arith.mulf %70, %71 : vector<8x8xf32>
    %73 = arith.addf %72, %12 : vector<8x8xf32>
    %cst_27 = arith.constant dense<0xFF800000> : vector<8xf32>
    %74 = vector.multi_reduction <maximumf>, %73, %cst_27 [1] : vector<8x8xf32> to vector<8xf32>
    %75 = vector.shape_cast %74 : vector<8xf32> to vector<8x1xf32>
    %76 = vector.broadcast %75 : vector<8x1xf32> to vector<8x8xf32>
    %77 = arith.subf %73, %76 : vector<8x8xf32>
    %78 = math.exp %77 : vector<8x8xf32>
    %cst_28 = arith.constant dense<0.000000e+00> : vector<8xf32>
    %79 = vector.multi_reduction <add>, %78, %cst_28 [1] : vector<8x8xf32> to vector<8xf32>
    %80 = vector.shape_cast %79 : vector<8xf32> to vector<8x1xf32>
    %81 = vector.broadcast %80 : vector<8x1xf32> to vector<8x8xf32>
    %82 = arith.divf %78, %81 : vector<8x8xf32>
    %83 = arith.truncf %82 : vector<8x8xf32> to vector<8x8xbf16>
    %cst_29 = arith.constant dense<0.000000e+00> : vector<8x8xf32>
    %84 = tpu.matmul %83, %69, %cst_29 {dimension_numbers = #tpu.dot_dimension_numbers<[1], [0], [0], [1], [0, 0, 1, 1], [], []>} : vector<8x8xbf16>, vector<8x8xbf16>, vector<8x8xf32> -> vector<8x8xf32>
    %85 = arith.truncf %84 : vector<8x8xf32> to vector<8x8xbf16>
    %c16 = arith.constant 16 : index
    %c0_30 = arith.constant 0 : index
    %86 = vector.load %arg5[%c16, %c0_30] : memref<32x32xbf16, #tpu.memory_space<vmem>>, vector<8x32xbf16>
    %cst_31 = arith.constant dense<0.000000e+00> : vector<8x32xf32>
    %87 = tpu.matmul %85, %86, %cst_31 {dimension_numbers = #tpu.dot_dimension_numbers<[1], [0], [0], [1], [0, 0, 1, 1], [], []>} : vector<8x8xbf16>, vector<8x32xbf16>, vector<8x32xf32> -> vector<8x32xf32>
    %88 = arith.addf %63, %87 : vector<8x32xf32>
    %89 = vector.extract_strided_slice %8 {offsets = [0, 24], sizes = [8, 8], strides = [1, 1]} : vector<8x32xf32> to vector<8x8xf32>
    %90 = arith.truncf %89 : vector<8x8xf32> to vector<8x8xbf16>
    %91 = vector.extract_strided_slice %9 {offsets = [0, 24], sizes = [8, 8], strides = [1, 1]} : vector<8x32xf32> to vector<8x8xf32>
    %92 = arith.truncf %91 : vector<8x8xf32> to vector<8x8xbf16>
    %93 = vector.extract_strided_slice %10 {offsets = [0, 24], sizes = [8, 8], strides = [1, 1]} : vector<8x32xf32> to vector<8x8xf32>
    %94 = arith.truncf %93 : vector<8x8xf32> to vector<8x8xbf16>
    %cst_32 = arith.constant dense<0.000000e+00> : vector<8x8xf32>
    %95 = tpu.matmul %90, %92, %cst_32 {dimension_numbers = #tpu.dot_dimension_numbers<[1], [1], [0], [0], [0, 0, 1, 0], [], []>} : vector<8x8xbf16>, vector<8x8xbf16>, vector<8x8xf32> -> vector<8x8xf32>
    %cst_33 = arith.constant 0.353553385 : f32
    %96 = vector.broadcast %cst_33 : f32 to vector<8x8xf32>
    %97 = arith.mulf %95, %96 : vector<8x8xf32>
    %98 = arith.addf %97, %12 : vector<8x8xf32>
    %cst_34 = arith.constant dense<0xFF800000> : vector<8xf32>
    %99 = vector.multi_reduction <maximumf>, %98, %cst_34 [1] : vector<8x8xf32> to vector<8xf32>
    %100 = vector.shape_cast %99 : vector<8xf32> to vector<8x1xf32>
    %101 = vector.broadcast %100 : vector<8x1xf32> to vector<8x8xf32>
    %102 = arith.subf %98, %101 : vector<8x8xf32>
    %103 = math.exp %102 : vector<8x8xf32>
    %cst_35 = arith.constant dense<0.000000e+00> : vector<8xf32>
    %104 = vector.multi_reduction <add>, %103, %cst_35 [1] : vector<8x8xf32> to vector<8xf32>
    %105 = vector.shape_cast %104 : vector<8xf32> to vector<8x1xf32>
    %106 = vector.broadcast %105 : vector<8x1xf32> to vector<8x8xf32>
    %107 = arith.divf %103, %106 : vector<8x8xf32>
    %108 = arith.truncf %107 : vector<8x8xf32> to vector<8x8xbf16>
    %cst_36 = arith.constant dense<0.000000e+00> : vector<8x8xf32>
    %109 = tpu.matmul %108, %94, %cst_36 {dimension_numbers = #tpu.dot_dimension_numbers<[1], [0], [0], [1], [0, 0, 1, 1], [], []>} : vector<8x8xbf16>, vector<8x8xbf16>, vector<8x8xf32> -> vector<8x8xf32>
    %110 = arith.truncf %109 : vector<8x8xf32> to vector<8x8xbf16>
    %c24 = arith.constant 24 : index
    %c0_37 = arith.constant 0 : index
    %111 = vector.load %arg5[%c24, %c0_37] : memref<32x32xbf16, #tpu.memory_space<vmem>>, vector<8x32xbf16>
    %cst_38 = arith.constant dense<0.000000e+00> : vector<8x32xf32>
    %112 = tpu.matmul %110, %111, %cst_38 {dimension_numbers = #tpu.dot_dimension_numbers<[1], [0], [0], [1], [0, 0, 1, 1], [], []>} : vector<8x8xbf16>, vector<8x32xbf16>, vector<8x32xf32> -> vector<8x32xf32>
    %113 = arith.addf %88, %112 : vector<8x32xf32>
    %c0_39 = arith.constant 0 : index
    %c0_40 = arith.constant 0 : index
    %114 = vector.load %arg6[%c0_39, %c0_40] : memref<1x32xf32, #tpu.memory_space<vmem>>, vector<1x32xf32>
    %115 = vector.broadcast %114 : vector<1x32xf32> to vector<8x32xf32>
    %116 = arith.addf %113, %115 : vector<8x32xf32>
    %117 = arith.addf %1, %116 : vector<8x32xf32>
    %c0_41 = arith.constant 0 : index
    %c0_42 = arith.constant 0 : index
    %118 = vector.load %arg7[%c0_41, %c0_42] : memref<1x32xf32, #tpu.memory_space<vmem>>, vector<1x32xf32>
    %c0_43 = arith.constant 0 : index
    %c0_44 = arith.constant 0 : index
    %119 = vector.load %arg8[%c0_43, %c0_44] : memref<1x32xf32, #tpu.memory_space<vmem>>, vector<1x32xf32>
    %cst_45 = arith.constant dense<0.000000e+00> : vector<8xf32>
    %120 = vector.multi_reduction <add>, %117, %cst_45 [1] : vector<8x32xf32> to vector<8xf32>
    %121 = vector.shape_cast %120 : vector<8xf32> to vector<8x1xf32>
    %cst_46 = arith.constant 3.200000e+01 : f32
    %122 = vector.broadcast %cst_46 : f32 to vector<8x1xf32>
    %123 = arith.divf %121, %122 : vector<8x1xf32>
    %124 = vector.broadcast %123 : vector<8x1xf32> to vector<8x32xf32>
    %125 = arith.subf %117, %124 : vector<8x32xf32>
    %126 = arith.mulf %125, %125 : vector<8x32xf32>
    %cst_47 = arith.constant dense<0.000000e+00> : vector<8xf32>
    %127 = vector.multi_reduction <add>, %126, %cst_47 [1] : vector<8x32xf32> to vector<8xf32>
    %128 = vector.shape_cast %127 : vector<8xf32> to vector<8x1xf32>
    %cst_48 = arith.constant 3.200000e+01 : f32
    %129 = vector.broadcast %cst_48 : f32 to vector<8x1xf32>
    %130 = arith.divf %128, %129 : vector<8x1xf32>
    %131 = vector.broadcast %123 : vector<8x1xf32> to vector<8x32xf32>
    %132 = arith.subf %117, %131 : vector<8x32xf32>
    %cst_49 = arith.constant 9.99999974E-6 : f32
    %133 = vector.broadcast %cst_49 : f32 to vector<8x1xf32>
    %134 = arith.addf %130, %133 : vector<8x1xf32>
    %135 = math.rsqrt %134 : vector<8x1xf32>
    %136 = vector.broadcast %135 : vector<8x1xf32> to vector<8x32xf32>
    %137 = arith.mulf %132, %136 : vector<8x32xf32>
    %138 = vector.broadcast %118 : vector<1x32xf32> to vector<8x32xf32>
    %139 = arith.mulf %137, %138 : vector<8x32xf32>
    %140 = vector.broadcast %119 : vector<1x32xf32> to vector<8x32xf32>
    %141 = arith.addf %139, %140 : vector<8x32xf32>
    %142 = arith.truncf %141 : vector<8x32xf32> to vector<8x32xbf16>
    %c0_50 = arith.constant 0 : index
    %c0_51 = arith.constant 0 : index
    %143 = vector.load %arg9[%c0_50, %c0_51] : memref<32x64xbf16, #tpu.memory_space<vmem>>, vector<32x64xbf16>
    %cst_52 = arith.constant dense<0.000000e+00> : vector<8x64xf32>
    %144 = tpu.matmul %142, %143, %cst_52 {dimension_numbers = #tpu.dot_dimension_numbers<[1], [0], [0], [1], [0, 0, 1, 1], [], []>} : vector<8x32xbf16>, vector<32x64xbf16>, vector<8x64xf32> -> vector<8x64xf32>
    %c0_53 = arith.constant 0 : index
    %c0_54 = arith.constant 0 : index
    %145 = vector.load %arg10[%c0_53, %c0_54] : memref<1x64xf32, #tpu.memory_space<vmem>>, vector<1x64xf32>
    %146 = vector.broadcast %145 : vector<1x64xf32> to vector<8x64xf32>
    %147 = arith.addf %144, %146 : vector<8x64xf32>
    %cst_55 = arith.constant 0.000000e+00 : f32
    %148 = vector.broadcast %cst_55 : f32 to vector<8x64xf32>
    %149 = arith.maximumf %147, %148 : vector<8x64xf32>
    %150 = arith.truncf %149 : vector<8x64xf32> to vector<8x64xbf16>
    %c0_56 = arith.constant 0 : index
    %c0_57 = arith.constant 0 : index
    %151 = vector.load %arg11[%c0_56, %c0_57] : memref<64x32xbf16, #tpu.memory_space<vmem>>, vector<64x32xbf16>
    %cst_58 = arith.constant dense<0.000000e+00> : vector<8x32xf32>
    %152 = tpu.matmul %150, %151, %cst_58 {dimension_numbers = #tpu.dot_dimension_numbers<[1], [0], [0], [1], [0, 0, 1, 1], [], []>} : vector<8x64xbf16>, vector<64x32xbf16>, vector<8x32xf32> -> vector<8x32xf32>
    %c0_59 = arith.constant 0 : index
    %c0_60 = arith.constant 0 : index
    %153 = vector.load %arg12[%c0_59, %c0_60] : memref<1x32xf32, #tpu.memory_space<vmem>>, vector<1x32xf32>
    %154 = vector.broadcast %153 : vector<1x32xf32> to vector<8x32xf32>
    %155 = arith.addf %152, %154 : vector<8x32xf32>
    %156 = arith.addf %141, %155 : vector<8x32xf32>
    %c0_61 = arith.constant 0 : index
    %c0_62 = arith.constant 0 : index
    %157 = vector.load %arg13[%c0_61, %c0_62] : memref<1x32xf32, #tpu.memory_space<vmem>>, vector<1x32xf32>
    %c0_63 = arith.constant 0 : index
    %c0_64 = arith.constant 0 : index
    %158 = vector.load %arg14[%c0_63, %c0_64] : memref<1x32xf32, #tpu.memory_space<vmem>>, vector<1x32xf32>
    %cst_65 = arith.constant dense<0.000000e+00> : vector<8xf32>
    %159 = vector.multi_reduction <add>, %156, %cst_65 [1] : vector<8x32xf32> to vector<8xf32>
    %160 = vector.shape_cast %159 : vector<8xf32> to vector<8x1xf32>
    %cst_66 = arith.constant 3.200000e+01 : f32
    %161 = vector.broadcast %cst_66 : f32 to vector<8x1xf32>
    %162 = arith.divf %160, %161 : vector<8x1xf32>
    %163 = vector.broadcast %162 : vector<8x1xf32> to vector<8x32xf32>
    %164 = arith.subf %156, %163 : vector<8x32xf32>
    %165 = arith.mulf %164, %164 : vector<8x32xf32>
    %cst_67 = arith.constant dense<0.000000e+00> : vector<8xf32>
    %166 = vector.multi_reduction <add>, %165, %cst_67 [1] : vector<8x32xf32> to vector<8xf32>
    %167 = vector.shape_cast %166 : vector<8xf32> to vector<8x1xf32>
    %cst_68 = arith.constant 3.200000e+01 : f32
    %168 = vector.broadcast %cst_68 : f32 to vector<8x1xf32>
    %169 = arith.divf %167, %168 : vector<8x1xf32>
    %170 = vector.broadcast %162 : vector<8x1xf32> to vector<8x32xf32>
    %171 = arith.subf %156, %170 : vector<8x32xf32>
    %cst_69 = arith.constant 9.99999974E-6 : f32
    %172 = vector.broadcast %cst_69 : f32 to vector<8x1xf32>
    %173 = arith.addf %169, %172 : vector<8x1xf32>
    %174 = math.rsqrt %173 : vector<8x1xf32>
    %175 = vector.broadcast %174 : vector<8x1xf32> to vector<8x32xf32>
    %176 = arith.mulf %171, %175 : vector<8x32xf32>
    %177 = vector.broadcast %157 : vector<1x32xf32> to vector<8x32xf32>
    %178 = arith.mulf %176, %177 : vector<8x32xf32>
    %179 = vector.broadcast %158 : vector<1x32xf32> to vector<8x32xf32>
    %180 = arith.addf %178, %179 : vector<8x32xf32>
    %c0_70 = arith.constant 0 : index
    %c0_71 = arith.constant 0 : index
    %c0_72 = arith.constant 0 : index
    %181 = vector.load %arg15[%c0_70, %c0_71, %c0_72] : memref<1x8x32xf32, #tpu.memory_space<vmem>>, vector<1x8x32xf32>
    %182 = vector.shape_cast %181 : vector<1x8x32xf32> to vector<8x32xf32>
    %183 = vector.shape_cast %180 : vector<8x32xf32> to vector<1x8x32xf32>
    tpu.vector_store %arg15[%c0_70, %c0_71, %c0_72], %183 {strides = array<i32>} : memref<1x8x32xf32, #tpu.memory_space<vmem>>, vector<1x8x32xf32>,
    return
  }
  func.func @transform_0(%arg0: i32) -> (i32, i32, i32) {
    %c0_i32 = arith.constant 0 : i32
    %c0_i32_0 = arith.constant 0 : i32
    %c0_i32_1 = arith.constant 0 : i32
    return %arg0, %c0_i32, %c0_i32_0 : i32, i32, i32
  }
  func.func @transform_1(%arg0: i32) -> (i32, i32, i32) {
    %c0_i32 = arith.constant 0 : i32
    %c0_i32_0 = arith.constant 0 : i32
    %c0_i32_1 = arith.constant 0 : i32
    return %arg0, %c0_i32, %c0_i32_0 : i32, i32, i32
  }
  func.func @transform_2(%arg0: i32) -> (i32, i32) {
    %c0_i32 = arith.constant 0 : i32
    %c0_i32_0 = arith.constant 0 : i32
    %c0_i32_1 = arith.constant 0 : i32
    return %c0_i32, %c0_i32_0 : i32, i32
  }
  func.func @transform_3(%arg0: i32) -> (i32, i32) {
    %c0_i32 = arith.constant 0 : i32
    %c0_i32_0 = arith.constant 0 : i32
    %c0_i32_1 = arith.constant 0 : i32
    return %c0_i32, %c0_i32_0 : i32, i32
  }
  func.func @transform_4(%arg0: i32) -> (i32, i32) {
    %c0_i32 = arith.constant 0 : i32
    %c0_i32_0 = arith.constant 0 : i32
    %c0_i32_1 = arith.constant 0 : i32
    return %c0_i32, %c0_i32_0 : i32, i32
  }
  func.func @transform_5(%arg0: i32) -> (i32, i32) {
    %c0_i32 = arith.constant 0 : i32
    %c0_i32_0 = arith.constant 0 : i32
    %c0_i32_1 = arith.constant 0 : i32
    return %c0_i32, %c0_i32_0 : i32, i32
  }
  func.func @transform_6(%arg0: i32) -> (i32, i32) {
    %c0_i32 = arith.constant 0 : i32
    %c0_i32_0 = arith.constant 0 : i32
    %c0_i32_1 = arith.constant 0 : i32
    return %c0_i32, %c0_i32_0 : i32, i32
  }
  func.func @transform_7(%arg0: i32) -> (i32, i32) {
    %c0_i32 = arith.constant 0 : i32
    %c0_i32_0 = arith.constant 0 : i32
    %c0_i32_1 = arith.constant 0 : i32
    return %c0_i32, %c0_i32_0 : i32, i32
  }
  func.func @transform_8(%arg0: i32) -> (i32, i32) {
    %c0_i32 = arith.constant 0 : i32
    %c0_i32_0 = arith.constant 0 : i32
    %c0_i32_1 = arith.constant 0 : i32
    return %c0_i32, %c0_i32_0 : i32, i32
  }
  func.func @transform_9(%arg0: i32) -> (i32, i32) {
    %c0_i32 = arith.constant 0 : i32
    %c0_i32_0 = arith.constant 0 : i32
    %c0_i32_1 = arith.constant 0 : i32
    return %c0_i32, %c0_i32_0 : i32, i32
  }
  func.func @transform_10(%arg0: i32) -> (i32, i32) {
    %c0_i32 = arith.constant 0 : i32
    %c0_i32_0 = arith.constant 0 : i32
    %c0_i32_1 = arith.constant 0 : i32
    return %c0_i32, %c0_i32_0 : i32, i32
  }
  func.func @transform_11(%arg0: i32) -> (i32, i32) {
    %c0_i32 = arith.constant 0 : i32
    %c0_i32_0 = arith.constant 0 : i32
    %c0_i32_1 = arith.constant 0 : i32
    return %c0_i32, %c0_i32_0 : i32, i32
  }
  func.func @transform_12(%arg0: i32) -> (i32, i32) {
    %c0_i32 = arith.constant 0 : i32
    %c0_i32_0 = arith.constant 0 : i32
    %c0_i32_1 = arith.constant 0 : i32
    return %c0_i32, %c0_i32_0 : i32, i32
  }
  func.func @transform_13(%arg0: i32) -> (i32, i32) {
    %c0_i32 = arith.constant 0 : i32
    %c0_i32_0 = arith.constant 0 : i32
    %c0_i32_1 = arith.constant 0 : i32
    return %c0_i32, %c0_i32_0 : i32, i32
  }
  func.func @transform_14(%arg0: i32) -> (i32, i32, i32) {
    %c0_i32 = arith.constant 0 : i32
    %c0_i32_0 = arith.constant 0 : i32
    %c0_i32_1 = arith.constant 0 : i32
    return %arg0, %c0_i32, %c0_i32_0 : i32, i32, i32
  }
}

module attributes {stable_mosaic.version = 11 : i64} {
  func.func @kernel(%arg0: i32, %arg1: memref<1x8x32xf32, #tpu.memory_space<vmem>>, %arg2: memref<1x8x32xf32, #tpu.memory_space<vmem>>, %arg3: memref<1x8x8xf32, #tpu.memory_space<vmem>>, %arg4: memref<1x8x8xf32, #tpu.memory_space<vmem>>, %arg5: memref<32x96xbf16, #tpu.memory_space<vmem>>, %arg6: memref<1x96xf32, #tpu.memory_space<vmem>>, %arg7: memref<32x32xbf16, #tpu.memory_space<vmem>>, %arg8: memref<1x32xf32, #tpu.memory_space<vmem>>, %arg9: memref<1x32xf32, #tpu.memory_space<vmem>>, %arg10: memref<1x32xf32, #tpu.memory_space<vmem>>, %arg11: memref<32x32xbf16, #tpu.memory_space<vmem>>, %arg12: memref<1x32xf32, #tpu.memory_space<vmem>>, %arg13: memref<32x64xbf16, #tpu.memory_space<vmem>>, %arg14: memref<1x64xf32, #tpu.memory_space<vmem>>, %arg15: memref<32x32xbf16, #tpu.memory_space<vmem>>, %arg16: memref<1x32xf32, #tpu.memory_space<vmem>>, %arg17: memref<1x32xf32, #tpu.memory_space<vmem>>, %arg18: memref<1x32xf32, #tpu.memory_space<vmem>>, %arg19: memref<32x64xbf16, #tpu.memory_space<vmem>>, %arg20: memref<1x64xf32, #tpu.memory_space<vmem>>, %arg21: memref<64x32xbf16, #tpu.memory_space<vmem>>, %arg22: memref<1x32xf32, #tpu.memory_space<vmem>>, %arg23: memref<1x32xf32, #tpu.memory_space<vmem>>, %arg24: memref<1x32xf32, #tpu.memory_space<vmem>>, %arg25: memref<1x8x32xf32, #tpu.memory_space<vmem>>) attributes {dimension_semantics = [#tpu.dimension_semantics<parallel>], iteration_bounds = array<i64: 2>, scalar_prefetch = 0 : i64, scratch_operands = 0 : i64, tpu.core_type = #tpu.core_type<tc>, window_params = [{transform_indices = @transform_0, window_bounds = array<i64: 1, 8, 32>}, {transform_indices = @transform_1, window_bounds = array<i64: 1, 8, 32>}, {transform_indices = @transform_2, window_bounds = array<i64: 1, 8, 8>}, {transform_indices = @transform_3, window_bounds = array<i64: 1, 8, 8>}, {pipeline_mode = #tpu.pipeline_mode<synchronous>, transform_indices = @transform_4, window_bounds = array<i64: 32, 96>}, {pipeline_mode = #tpu.pipeline_mode<synchronous>, transform_indices = @transform_5, window_bounds = array<i64: 1, 96>}, {pipeline_mode = #tpu.pipeline_mode<synchronous>, transform_indices = @transform_6, window_bounds = array<i64: 32, 32>}, {pipeline_mode = #tpu.pipeline_mode<synchronous>, transform_indices = @transform_7, window_bounds = array<i64: 1, 32>}, {pipeline_mode = #tpu.pipeline_mode<synchronous>, transform_indices = @transform_8, window_bounds = array<i64: 1, 32>}, {pipeline_mode = #tpu.pipeline_mode<synchronous>, transform_indices = @transform_9, window_bounds = array<i64: 1, 32>}, {pipeline_mode = #tpu.pipeline_mode<synchronous>, transform_indices = @transform_10, window_bounds = array<i64: 32, 32>}, {pipeline_mode = #tpu.pipeline_mode<synchronous>, transform_indices = @transform_11, window_bounds = array<i64: 1, 32>}, {pipeline_mode = #tpu.pipeline_mode<synchronous>, transform_indices = @transform_12, window_bounds = array<i64: 32, 64>}, {pipeline_mode = #tpu.pipeline_mode<synchronous>, transform_indices = @transform_13, window_bounds = array<i64: 1, 64>}, {pipeline_mode = #tpu.pipeline_mode<synchronous>, transform_indices = @transform_14, window_bounds = array<i64: 32, 32>}, {pipeline_mode = #tpu.pipeline_mode<synchronous>, transform_indices = @transform_15, window_bounds = array<i64: 1, 32>}, {pipeline_mode = #tpu.pipeline_mode<synchronous>, transform_indices = @transform_16, window_bounds = array<i64: 1, 32>}, {pipeline_mode = #tpu.pipeline_mode<synchronous>, transform_indices = @transform_17, window_bounds = array<i64: 1, 32>}, {pipeline_mode = #tpu.pipeline_mode<synchronous>, transform_indices = @transform_18, window_bounds = array<i64: 32, 64>}, {pipeline_mode = #tpu.pipeline_mode<synchronous>, transform_indices = @transform_19, window_bounds = array<i64: 1, 64>}, {pipeline_mode = #tpu.pipeline_mode<synchronous>, transform_indices = @transform_20, window_bounds = array<i64: 64, 32>}, {pipeline_mode = #tpu.pipeline_mode<synchronous>, transform_indices = @transform_21, window_bounds = array<i64: 1, 32>}, {pipeline_mode = #tpu.pipeline_mode<synchronous>, transform_indices = @transform_22, window_bounds = array<i64: 1, 32>}, {pipeline_mode = #tpu.pipeline_mode<synchronous>, transform_indices = @transform_23, window_bounds = array<i64: 1, 32>}, {transform_indices = @transform_24, window_bounds = array<i64: 1, 8, 32>}]} {
    %c0 = arith.constant 0 : index
    %c0_0 = arith.constant 0 : index
    %c0_1 = arith.constant 0 : index
    %0 = vector.load %arg1[%c0, %c0_0, %c0_1] : memref<1x8x32xf32, #tpu.memory_space<vmem>>, vector<1x8x32xf32>
    %1 = vector.shape_cast %0 : vector<1x8x32xf32> to vector<8x32xf32>
    %c0_2 = arith.constant 0 : index
    %c0_3 = arith.constant 0 : index
    %c0_4 = arith.constant 0 : index
    %2 = vector.load %arg2[%c0_2, %c0_3, %c0_4] : memref<1x8x32xf32, #tpu.memory_space<vmem>>, vector<1x8x32xf32>
    %3 = vector.shape_cast %2 : vector<1x8x32xf32> to vector<8x32xf32>
    %4 = arith.truncf %1 : vector<8x32xf32> to vector<8x32xbf16>
    %c0_5 = arith.constant 0 : index
    %c0_6 = arith.constant 0 : index
    %5 = vector.load %arg5[%c0_5, %c0_6] : memref<32x96xbf16, #tpu.memory_space<vmem>>, vector<32x96xbf16>
    %cst = arith.constant dense<0.000000e+00> : vector<8x96xf32>
    %6 = tpu.matmul %4, %5, %cst {dimension_numbers = #tpu.dot_dimension_numbers<[1], [0], [0], [1], [0, 0, 1, 1], [], []>} : vector<8x32xbf16>, vector<32x96xbf16>, vector<8x96xf32> -> vector<8x96xf32>
    %c0_7 = arith.constant 0 : index
    %c0_8 = arith.constant 0 : index
    %7 = vector.load %arg6[%c0_7, %c0_8] : memref<1x96xf32, #tpu.memory_space<vmem>>, vector<1x96xf32>
    %8 = vector.broadcast %7 : vector<1x96xf32> to vector<8x96xf32>
    %9 = arith.addf %6, %8 : vector<8x96xf32>
    %10 = vector.extract_strided_slice %9 {offsets = [0, 0], sizes = [8, 32], strides = [1, 1]} : vector<8x96xf32> to vector<8x32xf32>
    %11 = vector.extract_strided_slice %9 {offsets = [0, 32], sizes = [8, 32], strides = [1, 1]} : vector<8x96xf32> to vector<8x32xf32>
    %12 = vector.extract_strided_slice %9 {offsets = [0, 64], sizes = [8, 32], strides = [1, 1]} : vector<8x96xf32> to vector<8x32xf32>
    %c0_9 = arith.constant 0 : index
    %c0_10 = arith.constant 0 : index
    %c0_11 = arith.constant 0 : index
    %13 = vector.load %arg3[%c0_9, %c0_10, %c0_11] : memref<1x8x8xf32, #tpu.memory_space<vmem>>, vector<1x8x8xf32>
    %14 = vector.shape_cast %13 : vector<1x8x8xf32> to vector<8x8xf32>
    %cst_12 = arith.constant 0.000000e+00 : f32
    %15 = vector.broadcast %cst_12 : f32 to vector<8x32xf32>
    %16 = vector.extract_strided_slice %10 {offsets = [0, 0], sizes = [8, 8], strides = [1, 1]} : vector<8x32xf32> to vector<8x8xf32>
    %17 = arith.truncf %16 : vector<8x8xf32> to vector<8x8xbf16>
    %18 = vector.extract_strided_slice %11 {offsets = [0, 0], sizes = [8, 8], strides = [1, 1]} : vector<8x32xf32> to vector<8x8xf32>
    %19 = arith.truncf %18 : vector<8x8xf32> to vector<8x8xbf16>
    %20 = vector.extract_strided_slice %12 {offsets = [0, 0], sizes = [8, 8], strides = [1, 1]} : vector<8x32xf32> to vector<8x8xf32>
    %21 = arith.truncf %20 : vector<8x8xf32> to vector<8x8xbf16>
    %cst_13 = arith.constant dense<0.000000e+00> : vector<8x8xf32>
    %22 = tpu.matmul %17, %19, %cst_13 {dimension_numbers = #tpu.dot_dimension_numbers<[1], [1], [0], [0], [0, 0, 1, 0], [], []>} : vector<8x8xbf16>, vector<8x8xbf16>, vector<8x8xf32> -> vector<8x8xf32>
    %cst_14 = arith.constant 0.353553385 : f32
    %23 = vector.broadcast %cst_14 : f32 to vector<8x8xf32>
    %24 = arith.mulf %22, %23 : vector<8x8xf32>
    %25 = arith.addf %24, %14 : vector<8x8xf32>
    %cst_15 = arith.constant dense<0xFF800000> : vector<8xf32>
    %26 = vector.multi_reduction <maximumf>, %25, %cst_15 [1] : vector<8x8xf32> to vector<8xf32>
    %27 = vector.shape_cast %26 : vector<8xf32> to vector<8x1xf32>
    %28 = vector.broadcast %27 : vector<8x1xf32> to vector<8x8xf32>
    %29 = arith.subf %25, %28 : vector<8x8xf32>
    %30 = math.exp %29 : vector<8x8xf32>
    %cst_16 = arith.constant dense<0.000000e+00> : vector<8xf32>
    %31 = vector.multi_reduction <add>, %30, %cst_16 [1] : vector<8x8xf32> to vector<8xf32>
    %32 = vector.shape_cast %31 : vector<8xf32> to vector<8x1xf32>
    %33 = vector.broadcast %32 : vector<8x1xf32> to vector<8x8xf32>
    %34 = arith.divf %30, %33 : vector<8x8xf32>
    %35 = arith.truncf %34 : vector<8x8xf32> to vector<8x8xbf16>
    %cst_17 = arith.constant dense<0.000000e+00> : vector<8x8xf32>
    %36 = tpu.matmul %35, %21, %cst_17 {dimension_numbers = #tpu.dot_dimension_numbers<[1], [0], [0], [1], [0, 0, 1, 1], [], []>} : vector<8x8xbf16>, vector<8x8xbf16>, vector<8x8xf32> -> vector<8x8xf32>
    %37 = arith.truncf %36 : vector<8x8xf32> to vector<8x8xbf16>
    %c0_18 = arith.constant 0 : index
    %c0_19 = arith.constant 0 : index
    %38 = vector.load %arg7[%c0_18, %c0_19] : memref<32x32xbf16, #tpu.memory_space<vmem>>, vector<8x32xbf16>
    %cst_20 = arith.constant dense<0.000000e+00> : vector<8x32xf32>
    %39 = tpu.matmul %37, %38, %cst_20 {dimension_numbers = #tpu.dot_dimension_numbers<[1], [0], [0], [1], [0, 0, 1, 1], [], []>} : vector<8x8xbf16>, vector<8x32xbf16>, vector<8x32xf32> -> vector<8x32xf32>
    %40 = arith.addf %15, %39 : vector<8x32xf32>
    %41 = vector.extract_strided_slice %10 {offsets = [0, 8], sizes = [8, 8], strides = [1, 1]} : vector<8x32xf32> to vector<8x8xf32>
    %42 = arith.truncf %41 : vector<8x8xf32> to vector<8x8xbf16>
    %43 = vector.extract_strided_slice %11 {offsets = [0, 8], sizes = [8, 8], strides = [1, 1]} : vector<8x32xf32> to vector<8x8xf32>
    %44 = arith.truncf %43 : vector<8x8xf32> to vector<8x8xbf16>
    %45 = vector.extract_strided_slice %12 {offsets = [0, 8], sizes = [8, 8], strides = [1, 1]} : vector<8x32xf32> to vector<8x8xf32>
    %46 = arith.truncf %45 : vector<8x8xf32> to vector<8x8xbf16>
    %cst_21 = arith.constant dense<0.000000e+00> : vector<8x8xf32>
    %47 = tpu.matmul %42, %44, %cst_21 {dimension_numbers = #tpu.dot_dimension_numbers<[1], [1], [0], [0], [0, 0, 1, 0], [], []>} : vector<8x8xbf16>, vector<8x8xbf16>, vector<8x8xf32> -> vector<8x8xf32>
    %cst_22 = arith.constant 0.353553385 : f32
    %48 = vector.broadcast %cst_22 : f32 to vector<8x8xf32>
    %49 = arith.mulf %47, %48 : vector<8x8xf32>
    %50 = arith.addf %49, %14 : vector<8x8xf32>
    %cst_23 = arith.constant dense<0xFF800000> : vector<8xf32>
    %51 = vector.multi_reduction <maximumf>, %50, %cst_23 [1] : vector<8x8xf32> to vector<8xf32>
    %52 = vector.shape_cast %51 : vector<8xf32> to vector<8x1xf32>
    %53 = vector.broadcast %52 : vector<8x1xf32> to vector<8x8xf32>
    %54 = arith.subf %50, %53 : vector<8x8xf32>
    %55 = math.exp %54 : vector<8x8xf32>
    %cst_24 = arith.constant dense<0.000000e+00> : vector<8xf32>
    %56 = vector.multi_reduction <add>, %55, %cst_24 [1] : vector<8x8xf32> to vector<8xf32>
    %57 = vector.shape_cast %56 : vector<8xf32> to vector<8x1xf32>
    %58 = vector.broadcast %57 : vector<8x1xf32> to vector<8x8xf32>
    %59 = arith.divf %55, %58 : vector<8x8xf32>
    %60 = arith.truncf %59 : vector<8x8xf32> to vector<8x8xbf16>
    %cst_25 = arith.constant dense<0.000000e+00> : vector<8x8xf32>
    %61 = tpu.matmul %60, %46, %cst_25 {dimension_numbers = #tpu.dot_dimension_numbers<[1], [0], [0], [1], [0, 0, 1, 1], [], []>} : vector<8x8xbf16>, vector<8x8xbf16>, vector<8x8xf32> -> vector<8x8xf32>
    %62 = arith.truncf %61 : vector<8x8xf32> to vector<8x8xbf16>
    %c8 = arith.constant 8 : index
    %c0_26 = arith.constant 0 : index
    %63 = vector.load %arg7[%c8, %c0_26] : memref<32x32xbf16, #tpu.memory_space<vmem>>, vector<8x32xbf16>
    %cst_27 = arith.constant dense<0.000000e+00> : vector<8x32xf32>
    %64 = tpu.matmul %62, %63, %cst_27 {dimension_numbers = #tpu.dot_dimension_numbers<[1], [0], [0], [1], [0, 0, 1, 1], [], []>} : vector<8x8xbf16>, vector<8x32xbf16>, vector<8x32xf32> -> vector<8x32xf32>
    %65 = arith.addf %40, %64 : vector<8x32xf32>
    %66 = vector.extract_strided_slice %10 {offsets = [0, 16], sizes = [8, 8], strides = [1, 1]} : vector<8x32xf32> to vector<8x8xf32>
    %67 = arith.truncf %66 : vector<8x8xf32> to vector<8x8xbf16>
    %68 = vector.extract_strided_slice %11 {offsets = [0, 16], sizes = [8, 8], strides = [1, 1]} : vector<8x32xf32> to vector<8x8xf32>
    %69 = arith.truncf %68 : vector<8x8xf32> to vector<8x8xbf16>
    %70 = vector.extract_strided_slice %12 {offsets = [0, 16], sizes = [8, 8], strides = [1, 1]} : vector<8x32xf32> to vector<8x8xf32>
    %71 = arith.truncf %70 : vector<8x8xf32> to vector<8x8xbf16>
    %cst_28 = arith.constant dense<0.000000e+00> : vector<8x8xf32>
    %72 = tpu.matmul %67, %69, %cst_28 {dimension_numbers = #tpu.dot_dimension_numbers<[1], [1], [0], [0], [0, 0, 1, 0], [], []>} : vector<8x8xbf16>, vector<8x8xbf16>, vector<8x8xf32> -> vector<8x8xf32>
    %cst_29 = arith.constant 0.353553385 : f32
    %73 = vector.broadcast %cst_29 : f32 to vector<8x8xf32>
    %74 = arith.mulf %72, %73 : vector<8x8xf32>
    %75 = arith.addf %74, %14 : vector<8x8xf32>
    %cst_30 = arith.constant dense<0xFF800000> : vector<8xf32>
    %76 = vector.multi_reduction <maximumf>, %75, %cst_30 [1] : vector<8x8xf32> to vector<8xf32>
    %77 = vector.shape_cast %76 : vector<8xf32> to vector<8x1xf32>
    %78 = vector.broadcast %77 : vector<8x1xf32> to vector<8x8xf32>
    %79 = arith.subf %75, %78 : vector<8x8xf32>
    %80 = math.exp %79 : vector<8x8xf32>
    %cst_31 = arith.constant dense<0.000000e+00> : vector<8xf32>
    %81 = vector.multi_reduction <add>, %80, %cst_31 [1] : vector<8x8xf32> to vector<8xf32>
    %82 = vector.shape_cast %81 : vector<8xf32> to vector<8x1xf32>
    %83 = vector.broadcast %82 : vector<8x1xf32> to vector<8x8xf32>
    %84 = arith.divf %80, %83 : vector<8x8xf32>
    %85 = arith.truncf %84 : vector<8x8xf32> to vector<8x8xbf16>
    %cst_32 = arith.constant dense<0.000000e+00> : vector<8x8xf32>
    %86 = tpu.matmul %85, %71, %cst_32 {dimension_numbers = #tpu.dot_dimension_numbers<[1], [0], [0], [1], [0, 0, 1, 1], [], []>} : vector<8x8xbf16>, vector<8x8xbf16>, vector<8x8xf32> -> vector<8x8xf32>
    %87 = arith.truncf %86 : vector<8x8xf32> to vector<8x8xbf16>
    %c16 = arith.constant 16 : index
    %c0_33 = arith.constant 0 : index
    %88 = vector.load %arg7[%c16, %c0_33] : memref<32x32xbf16, #tpu.memory_space<vmem>>, vector<8x32xbf16>
    %cst_34 = arith.constant dense<0.000000e+00> : vector<8x32xf32>
    %89 = tpu.matmul %87, %88, %cst_34 {dimension_numbers = #tpu.dot_dimension_numbers<[1], [0], [0], [1], [0, 0, 1, 1], [], []>} : vector<8x8xbf16>, vector<8x32xbf16>, vector<8x32xf32> -> vector<8x32xf32>
    %90 = arith.addf %65, %89 : vector<8x32xf32>
    %91 = vector.extract_strided_slice %10 {offsets = [0, 24], sizes = [8, 8], strides = [1, 1]} : vector<8x32xf32> to vector<8x8xf32>
    %92 = arith.truncf %91 : vector<8x8xf32> to vector<8x8xbf16>
    %93 = vector.extract_strided_slice %11 {offsets = [0, 24], sizes = [8, 8], strides = [1, 1]} : vector<8x32xf32> to vector<8x8xf32>
    %94 = arith.truncf %93 : vector<8x8xf32> to vector<8x8xbf16>
    %95 = vector.extract_strided_slice %12 {offsets = [0, 24], sizes = [8, 8], strides = [1, 1]} : vector<8x32xf32> to vector<8x8xf32>
    %96 = arith.truncf %95 : vector<8x8xf32> to vector<8x8xbf16>
    %cst_35 = arith.constant dense<0.000000e+00> : vector<8x8xf32>
    %97 = tpu.matmul %92, %94, %cst_35 {dimension_numbers = #tpu.dot_dimension_numbers<[1], [1], [0], [0], [0, 0, 1, 0], [], []>} : vector<8x8xbf16>, vector<8x8xbf16>, vector<8x8xf32> -> vector<8x8xf32>
    %cst_36 = arith.constant 0.353553385 : f32
    %98 = vector.broadcast %cst_36 : f32 to vector<8x8xf32>
    %99 = arith.mulf %97, %98 : vector<8x8xf32>
    %100 = arith.addf %99, %14 : vector<8x8xf32>
    %cst_37 = arith.constant dense<0xFF800000> : vector<8xf32>
    %101 = vector.multi_reduction <maximumf>, %100, %cst_37 [1] : vector<8x8xf32> to vector<8xf32>
    %102 = vector.shape_cast %101 : vector<8xf32> to vector<8x1xf32>
    %103 = vector.broadcast %102 : vector<8x1xf32> to vector<8x8xf32>
    %104 = arith.subf %100, %103 : vector<8x8xf32>
    %105 = math.exp %104 : vector<8x8xf32>
    %cst_38 = arith.constant dense<0.000000e+00> : vector<8xf32>
    %106 = vector.multi_reduction <add>, %105, %cst_38 [1] : vector<8x8xf32> to vector<8xf32>
    %107 = vector.shape_cast %106 : vector<8xf32> to vector<8x1xf32>
    %108 = vector.broadcast %107 : vector<8x1xf32> to vector<8x8xf32>
    %109 = arith.divf %105, %108 : vector<8x8xf32>
    %110 = arith.truncf %109 : vector<8x8xf32> to vector<8x8xbf16>
    %cst_39 = arith.constant dense<0.000000e+00> : vector<8x8xf32>
    %111 = tpu.matmul %110, %96, %cst_39 {dimension_numbers = #tpu.dot_dimension_numbers<[1], [0], [0], [1], [0, 0, 1, 1], [], []>} : vector<8x8xbf16>, vector<8x8xbf16>, vector<8x8xf32> -> vector<8x8xf32>
    %112 = arith.truncf %111 : vector<8x8xf32> to vector<8x8xbf16>
    %c24 = arith.constant 24 : index
    %c0_40 = arith.constant 0 : index
    %113 = vector.load %arg7[%c24, %c0_40] : memref<32x32xbf16, #tpu.memory_space<vmem>>, vector<8x32xbf16>
    %cst_41 = arith.constant dense<0.000000e+00> : vector<8x32xf32>
    %114 = tpu.matmul %112, %113, %cst_41 {dimension_numbers = #tpu.dot_dimension_numbers<[1], [0], [0], [1], [0, 0, 1, 1], [], []>} : vector<8x8xbf16>, vector<8x32xbf16>, vector<8x32xf32> -> vector<8x32xf32>
    %115 = arith.addf %90, %114 : vector<8x32xf32>
    %c0_42 = arith.constant 0 : index
    %c0_43 = arith.constant 0 : index
    %116 = vector.load %arg8[%c0_42, %c0_43] : memref<1x32xf32, #tpu.memory_space<vmem>>, vector<1x32xf32>
    %117 = vector.broadcast %116 : vector<1x32xf32> to vector<8x32xf32>
    %118 = arith.addf %115, %117 : vector<8x32xf32>
    %119 = arith.addf %1, %118 : vector<8x32xf32>
    %c0_44 = arith.constant 0 : index
    %c0_45 = arith.constant 0 : index
    %120 = vector.load %arg9[%c0_44, %c0_45] : memref<1x32xf32, #tpu.memory_space<vmem>>, vector<1x32xf32>
    %c0_46 = arith.constant 0 : index
    %c0_47 = arith.constant 0 : index
    %121 = vector.load %arg10[%c0_46, %c0_47] : memref<1x32xf32, #tpu.memory_space<vmem>>, vector<1x32xf32>
    %cst_48 = arith.constant dense<0.000000e+00> : vector<8xf32>
    %122 = vector.multi_reduction <add>, %119, %cst_48 [1] : vector<8x32xf32> to vector<8xf32>
    %123 = vector.shape_cast %122 : vector<8xf32> to vector<8x1xf32>
    %cst_49 = arith.constant 3.200000e+01 : f32
    %124 = vector.broadcast %cst_49 : f32 to vector<8x1xf32>
    %125 = arith.divf %123, %124 : vector<8x1xf32>
    %126 = vector.broadcast %125 : vector<8x1xf32> to vector<8x32xf32>
    %127 = arith.subf %119, %126 : vector<8x32xf32>
    %128 = arith.mulf %127, %127 : vector<8x32xf32>
    %cst_50 = arith.constant dense<0.000000e+00> : vector<8xf32>
    %129 = vector.multi_reduction <add>, %128, %cst_50 [1] : vector<8x32xf32> to vector<8xf32>
    %130 = vector.shape_cast %129 : vector<8xf32> to vector<8x1xf32>
    %cst_51 = arith.constant 3.200000e+01 : f32
    %131 = vector.broadcast %cst_51 : f32 to vector<8x1xf32>
    %132 = arith.divf %130, %131 : vector<8x1xf32>
    %133 = vector.broadcast %125 : vector<8x1xf32> to vector<8x32xf32>
    %134 = arith.subf %119, %133 : vector<8x32xf32>
    %cst_52 = arith.constant 9.99999974E-6 : f32
    %135 = vector.broadcast %cst_52 : f32 to vector<8x1xf32>
    %136 = arith.addf %132, %135 : vector<8x1xf32>
    %137 = math.rsqrt %136 : vector<8x1xf32>
    %138 = vector.broadcast %137 : vector<8x1xf32> to vector<8x32xf32>
    %139 = arith.mulf %134, %138 : vector<8x32xf32>
    %140 = vector.broadcast %120 : vector<1x32xf32> to vector<8x32xf32>
    %141 = arith.mulf %139, %140 : vector<8x32xf32>
    %142 = vector.broadcast %121 : vector<1x32xf32> to vector<8x32xf32>
    %143 = arith.addf %141, %142 : vector<8x32xf32>
    %144 = arith.truncf %143 : vector<8x32xf32> to vector<8x32xbf16>
    %c0_53 = arith.constant 0 : index
    %c0_54 = arith.constant 0 : index
    %145 = vector.load %arg11[%c0_53, %c0_54] : memref<32x32xbf16, #tpu.memory_space<vmem>>, vector<32x32xbf16>
    %cst_55 = arith.constant dense<0.000000e+00> : vector<8x32xf32>
    %146 = tpu.matmul %144, %145, %cst_55 {dimension_numbers = #tpu.dot_dimension_numbers<[1], [0], [0], [1], [0, 0, 1, 1], [], []>} : vector<8x32xbf16>, vector<32x32xbf16>, vector<8x32xf32> -> vector<8x32xf32>
    %c0_56 = arith.constant 0 : index
    %c0_57 = arith.constant 0 : index
    %147 = vector.load %arg12[%c0_56, %c0_57] : memref<1x32xf32, #tpu.memory_space<vmem>>, vector<1x32xf32>
    %148 = vector.broadcast %147 : vector<1x32xf32> to vector<8x32xf32>
    %149 = arith.addf %146, %148 : vector<8x32xf32>
    %150 = arith.truncf %3 : vector<8x32xf32> to vector<8x32xbf16>
    %c0_58 = arith.constant 0 : index
    %c0_59 = arith.constant 0 : index
    %151 = vector.load %arg13[%c0_58, %c0_59] : memref<32x64xbf16, #tpu.memory_space<vmem>>, vector<32x64xbf16>
    %cst_60 = arith.constant dense<0.000000e+00> : vector<8x64xf32>
    %152 = tpu.matmul %150, %151, %cst_60 {dimension_numbers = #tpu.dot_dimension_numbers<[1], [0], [0], [1], [0, 0, 1, 1], [], []>} : vector<8x32xbf16>, vector<32x64xbf16>, vector<8x64xf32> -> vector<8x64xf32>
    %c0_61 = arith.constant 0 : index
    %c0_62 = arith.constant 0 : index
    %153 = vector.load %arg14[%c0_61, %c0_62] : memref<1x64xf32, #tpu.memory_space<vmem>>, vector<1x64xf32>
    %154 = vector.broadcast %153 : vector<1x64xf32> to vector<8x64xf32>
    %155 = arith.addf %152, %154 : vector<8x64xf32>
    %156 = vector.extract_strided_slice %155 {offsets = [0, 0], sizes = [8, 32], strides = [1, 1]} : vector<8x64xf32> to vector<8x32xf32>
    %157 = vector.extract_strided_slice %155 {offsets = [0, 32], sizes = [8, 32], strides = [1, 1]} : vector<8x64xf32> to vector<8x32xf32>
    %c0_63 = arith.constant 0 : index
    %c0_64 = arith.constant 0 : index
    %c0_65 = arith.constant 0 : index
    %158 = vector.load %arg4[%c0_63, %c0_64, %c0_65] : memref<1x8x8xf32, #tpu.memory_space<vmem>>, vector<1x8x8xf32>
    %159 = vector.shape_cast %158 : vector<1x8x8xf32> to vector<8x8xf32>
    %cst_66 = arith.constant 0.000000e+00 : f32
    %160 = vector.broadcast %cst_66 : f32 to vector<8x32xf32>
    %161 = vector.extract_strided_slice %149 {offsets = [0, 0], sizes = [8, 8], strides = [1, 1]} : vector<8x32xf32> to vector<8x8xf32>
    %162 = arith.truncf %161 : vector<8x8xf32> to vector<8x8xbf16>
    %163 = vector.extract_strided_slice %156 {offsets = [0, 0], sizes = [8, 8], strides = [1, 1]} : vector<8x32xf32> to vector<8x8xf32>
    %164 = arith.truncf %163 : vector<8x8xf32> to vector<8x8xbf16>
    %165 = vector.extract_strided_slice %157 {offsets = [0, 0], sizes = [8, 8], strides = [1, 1]} : vector<8x32xf32> to vector<8x8xf32>
    %166 = arith.truncf %165 : vector<8x8xf32> to vector<8x8xbf16>
    %cst_67 = arith.constant dense<0.000000e+00> : vector<8x8xf32>
    %167 = tpu.matmul %162, %164, %cst_67 {dimension_numbers = #tpu.dot_dimension_numbers<[1], [1], [0], [0], [0, 0, 1, 0], [], []>} : vector<8x8xbf16>, vector<8x8xbf16>, vector<8x8xf32> -> vector<8x8xf32>
    %cst_68 = arith.constant 0.353553385 : f32
    %168 = vector.broadcast %cst_68 : f32 to vector<8x8xf32>
    %169 = arith.mulf %167, %168 : vector<8x8xf32>
    %170 = arith.addf %169, %159 : vector<8x8xf32>
    %cst_69 = arith.constant dense<0xFF800000> : vector<8xf32>
    %171 = vector.multi_reduction <maximumf>, %170, %cst_69 [1] : vector<8x8xf32> to vector<8xf32>
    %172 = vector.shape_cast %171 : vector<8xf32> to vector<8x1xf32>
    %173 = vector.broadcast %172 : vector<8x1xf32> to vector<8x8xf32>
    %174 = arith.subf %170, %173 : vector<8x8xf32>
    %175 = math.exp %174 : vector<8x8xf32>
    %cst_70 = arith.constant dense<0.000000e+00> : vector<8xf32>
    %176 = vector.multi_reduction <add>, %175, %cst_70 [1] : vector<8x8xf32> to vector<8xf32>
    %177 = vector.shape_cast %176 : vector<8xf32> to vector<8x1xf32>
    %178 = vector.broadcast %177 : vector<8x1xf32> to vector<8x8xf32>
    %179 = arith.divf %175, %178 : vector<8x8xf32>
    %180 = arith.truncf %179 : vector<8x8xf32> to vector<8x8xbf16>
    %cst_71 = arith.constant dense<0.000000e+00> : vector<8x8xf32>
    %181 = tpu.matmul %180, %166, %cst_71 {dimension_numbers = #tpu.dot_dimension_numbers<[1], [0], [0], [1], [0, 0, 1, 1], [], []>} : vector<8x8xbf16>, vector<8x8xbf16>, vector<8x8xf32> -> vector<8x8xf32>
    %182 = arith.truncf %181 : vector<8x8xf32> to vector<8x8xbf16>
    %c0_72 = arith.constant 0 : index
    %c0_73 = arith.constant 0 : index
    %183 = vector.load %arg15[%c0_72, %c0_73] : memref<32x32xbf16, #tpu.memory_space<vmem>>, vector<8x32xbf16>
    %cst_74 = arith.constant dense<0.000000e+00> : vector<8x32xf32>
    %184 = tpu.matmul %182, %183, %cst_74 {dimension_numbers = #tpu.dot_dimension_numbers<[1], [0], [0], [1], [0, 0, 1, 1], [], []>} : vector<8x8xbf16>, vector<8x32xbf16>, vector<8x32xf32> -> vector<8x32xf32>
    %185 = arith.addf %160, %184 : vector<8x32xf32>
    %186 = vector.extract_strided_slice %149 {offsets = [0, 8], sizes = [8, 8], strides = [1, 1]} : vector<8x32xf32> to vector<8x8xf32>
    %187 = arith.truncf %186 : vector<8x8xf32> to vector<8x8xbf16>
    %188 = vector.extract_strided_slice %156 {offsets = [0, 8], sizes = [8, 8], strides = [1, 1]} : vector<8x32xf32> to vector<8x8xf32>
    %189 = arith.truncf %188 : vector<8x8xf32> to vector<8x8xbf16>
    %190 = vector.extract_strided_slice %157 {offsets = [0, 8], sizes = [8, 8], strides = [1, 1]} : vector<8x32xf32> to vector<8x8xf32>
    %191 = arith.truncf %190 : vector<8x8xf32> to vector<8x8xbf16>
    %cst_75 = arith.constant dense<0.000000e+00> : vector<8x8xf32>
    %192 = tpu.matmul %187, %189, %cst_75 {dimension_numbers = #tpu.dot_dimension_numbers<[1], [1], [0], [0], [0, 0, 1, 0], [], []>} : vector<8x8xbf16>, vector<8x8xbf16>, vector<8x8xf32> -> vector<8x8xf32>
    %cst_76 = arith.constant 0.353553385 : f32
    %193 = vector.broadcast %cst_76 : f32 to vector<8x8xf32>
    %194 = arith.mulf %192, %193 : vector<8x8xf32>
    %195 = arith.addf %194, %159 : vector<8x8xf32>
    %cst_77 = arith.constant dense<0xFF800000> : vector<8xf32>
    %196 = vector.multi_reduction <maximumf>, %195, %cst_77 [1] : vector<8x8xf32> to vector<8xf32>
    %197 = vector.shape_cast %196 : vector<8xf32> to vector<8x1xf32>
    %198 = vector.broadcast %197 : vector<8x1xf32> to vector<8x8xf32>
    %199 = arith.subf %195, %198 : vector<8x8xf32>
    %200 = math.exp %199 : vector<8x8xf32>
    %cst_78 = arith.constant dense<0.000000e+00> : vector<8xf32>
    %201 = vector.multi_reduction <add>, %200, %cst_78 [1] : vector<8x8xf32> to vector<8xf32>
    %202 = vector.shape_cast %201 : vector<8xf32> to vector<8x1xf32>
    %203 = vector.broadcast %202 : vector<8x1xf32> to vector<8x8xf32>
    %204 = arith.divf %200, %203 : vector<8x8xf32>
    %205 = arith.truncf %204 : vector<8x8xf32> to vector<8x8xbf16>
    %cst_79 = arith.constant dense<0.000000e+00> : vector<8x8xf32>
    %206 = tpu.matmul %205, %191, %cst_79 {dimension_numbers = #tpu.dot_dimension_numbers<[1], [0], [0], [1], [0, 0, 1, 1], [], []>} : vector<8x8xbf16>, vector<8x8xbf16>, vector<8x8xf32> -> vector<8x8xf32>
    %207 = arith.truncf %206 : vector<8x8xf32> to vector<8x8xbf16>
    %c8_80 = arith.constant 8 : index
    %c0_81 = arith.constant 0 : index
    %208 = vector.load %arg15[%c8_80, %c0_81] : memref<32x32xbf16, #tpu.memory_space<vmem>>, vector<8x32xbf16>
    %cst_82 = arith.constant dense<0.000000e+00> : vector<8x32xf32>
    %209 = tpu.matmul %207, %208, %cst_82 {dimension_numbers = #tpu.dot_dimension_numbers<[1], [0], [0], [1], [0, 0, 1, 1], [], []>} : vector<8x8xbf16>, vector<8x32xbf16>, vector<8x32xf32> -> vector<8x32xf32>
    %210 = arith.addf %185, %209 : vector<8x32xf32>
    %211 = vector.extract_strided_slice %149 {offsets = [0, 16], sizes = [8, 8], strides = [1, 1]} : vector<8x32xf32> to vector<8x8xf32>
    %212 = arith.truncf %211 : vector<8x8xf32> to vector<8x8xbf16>
    %213 = vector.extract_strided_slice %156 {offsets = [0, 16], sizes = [8, 8], strides = [1, 1]} : vector<8x32xf32> to vector<8x8xf32>
    %214 = arith.truncf %213 : vector<8x8xf32> to vector<8x8xbf16>
    %215 = vector.extract_strided_slice %157 {offsets = [0, 16], sizes = [8, 8], strides = [1, 1]} : vector<8x32xf32> to vector<8x8xf32>
    %216 = arith.truncf %215 : vector<8x8xf32> to vector<8x8xbf16>
    %cst_83 = arith.constant dense<0.000000e+00> : vector<8x8xf32>
    %217 = tpu.matmul %212, %214, %cst_83 {dimension_numbers = #tpu.dot_dimension_numbers<[1], [1], [0], [0], [0, 0, 1, 0], [], []>} : vector<8x8xbf16>, vector<8x8xbf16>, vector<8x8xf32> -> vector<8x8xf32>
    %cst_84 = arith.constant 0.353553385 : f32
    %218 = vector.broadcast %cst_84 : f32 to vector<8x8xf32>
    %219 = arith.mulf %217, %218 : vector<8x8xf32>
    %220 = arith.addf %219, %159 : vector<8x8xf32>
    %cst_85 = arith.constant dense<0xFF800000> : vector<8xf32>
    %221 = vector.multi_reduction <maximumf>, %220, %cst_85 [1] : vector<8x8xf32> to vector<8xf32>
    %222 = vector.shape_cast %221 : vector<8xf32> to vector<8x1xf32>
    %223 = vector.broadcast %222 : vector<8x1xf32> to vector<8x8xf32>
    %224 = arith.subf %220, %223 : vector<8x8xf32>
    %225 = math.exp %224 : vector<8x8xf32>
    %cst_86 = arith.constant dense<0.000000e+00> : vector<8xf32>
    %226 = vector.multi_reduction <add>, %225, %cst_86 [1] : vector<8x8xf32> to vector<8xf32>
    %227 = vector.shape_cast %226 : vector<8xf32> to vector<8x1xf32>
    %228 = vector.broadcast %227 : vector<8x1xf32> to vector<8x8xf32>
    %229 = arith.divf %225, %228 : vector<8x8xf32>
    %230 = arith.truncf %229 : vector<8x8xf32> to vector<8x8xbf16>
    %cst_87 = arith.constant dense<0.000000e+00> : vector<8x8xf32>
    %231 = tpu.matmul %230, %216, %cst_87 {dimension_numbers = #tpu.dot_dimension_numbers<[1], [0], [0], [1], [0, 0, 1, 1], [], []>} : vector<8x8xbf16>, vector<8x8xbf16>, vector<8x8xf32> -> vector<8x8xf32>
    %232 = arith.truncf %231 : vector<8x8xf32> to vector<8x8xbf16>
    %c16_88 = arith.constant 16 : index
    %c0_89 = arith.constant 0 : index
    %233 = vector.load %arg15[%c16_88, %c0_89] : memref<32x32xbf16, #tpu.memory_space<vmem>>, vector<8x32xbf16>
    %cst_90 = arith.constant dense<0.000000e+00> : vector<8x32xf32>
    %234 = tpu.matmul %232, %233, %cst_90 {dimension_numbers = #tpu.dot_dimension_numbers<[1], [0], [0], [1], [0, 0, 1, 1], [], []>} : vector<8x8xbf16>, vector<8x32xbf16>, vector<8x32xf32> -> vector<8x32xf32>
    %235 = arith.addf %210, %234 : vector<8x32xf32>
    %236 = vector.extract_strided_slice %149 {offsets = [0, 24], sizes = [8, 8], strides = [1, 1]} : vector<8x32xf32> to vector<8x8xf32>
    %237 = arith.truncf %236 : vector<8x8xf32> to vector<8x8xbf16>
    %238 = vector.extract_strided_slice %156 {offsets = [0, 24], sizes = [8, 8], strides = [1, 1]} : vector<8x32xf32> to vector<8x8xf32>
    %239 = arith.truncf %238 : vector<8x8xf32> to vector<8x8xbf16>
    %240 = vector.extract_strided_slice %157 {offsets = [0, 24], sizes = [8, 8], strides = [1, 1]} : vector<8x32xf32> to vector<8x8xf32>
    %241 = arith.truncf %240 : vector<8x8xf32> to vector<8x8xbf16>
    %cst_91 = arith.constant dense<0.000000e+00> : vector<8x8xf32>
    %242 = tpu.matmul %237, %239, %cst_91 {dimension_numbers = #tpu.dot_dimension_numbers<[1], [1], [0], [0], [0, 0, 1, 0], [], []>} : vector<8x8xbf16>, vector<8x8xbf16>, vector<8x8xf32> -> vector<8x8xf32>
    %cst_92 = arith.constant 0.353553385 : f32
    %243 = vector.broadcast %cst_92 : f32 to vector<8x8xf32>
    %244 = arith.mulf %242, %243 : vector<8x8xf32>
    %245 = arith.addf %244, %159 : vector<8x8xf32>
    %cst_93 = arith.constant dense<0xFF800000> : vector<8xf32>
    %246 = vector.multi_reduction <maximumf>, %245, %cst_93 [1] : vector<8x8xf32> to vector<8xf32>
    %247 = vector.shape_cast %246 : vector<8xf32> to vector<8x1xf32>
    %248 = vector.broadcast %247 : vector<8x1xf32> to vector<8x8xf32>
    %249 = arith.subf %245, %248 : vector<8x8xf32>
    %250 = math.exp %249 : vector<8x8xf32>
    %cst_94 = arith.constant dense<0.000000e+00> : vector<8xf32>
    %251 = vector.multi_reduction <add>, %250, %cst_94 [1] : vector<8x8xf32> to vector<8xf32>
    %252 = vector.shape_cast %251 : vector<8xf32> to vector<8x1xf32>
    %253 = vector.broadcast %252 : vector<8x1xf32> to vector<8x8xf32>
    %254 = arith.divf %250, %253 : vector<8x8xf32>
    %255 = arith.truncf %254 : vector<8x8xf32> to vector<8x8xbf16>
    %cst_95 = arith.constant dense<0.000000e+00> : vector<8x8xf32>
    %256 = tpu.matmul %255, %241, %cst_95 {dimension_numbers = #tpu.dot_dimension_numbers<[1], [0], [0], [1], [0, 0, 1, 1], [], []>} : vector<8x8xbf16>, vector<8x8xbf16>, vector<8x8xf32> -> vector<8x8xf32>
    %257 = arith.truncf %256 : vector<8x8xf32> to vector<8x8xbf16>
    %c24_96 = arith.constant 24 : index
    %c0_97 = arith.constant 0 : index
    %258 = vector.load %arg15[%c24_96, %c0_97] : memref<32x32xbf16, #tpu.memory_space<vmem>>, vector<8x32xbf16>
    %cst_98 = arith.constant dense<0.000000e+00> : vector<8x32xf32>
    %259 = tpu.matmul %257, %258, %cst_98 {dimension_numbers = #tpu.dot_dimension_numbers<[1], [0], [0], [1], [0, 0, 1, 1], [], []>} : vector<8x8xbf16>, vector<8x32xbf16>, vector<8x32xf32> -> vector<8x32xf32>
    %260 = arith.addf %235, %259 : vector<8x32xf32>
    %c0_99 = arith.constant 0 : index
    %c0_100 = arith.constant 0 : index
    %261 = vector.load %arg16[%c0_99, %c0_100] : memref<1x32xf32, #tpu.memory_space<vmem>>, vector<1x32xf32>
    %262 = vector.broadcast %261 : vector<1x32xf32> to vector<8x32xf32>
    %263 = arith.addf %260, %262 : vector<8x32xf32>
    %264 = arith.addf %143, %263 : vector<8x32xf32>
    %c0_101 = arith.constant 0 : index
    %c0_102 = arith.constant 0 : index
    %265 = vector.load %arg17[%c0_101, %c0_102] : memref<1x32xf32, #tpu.memory_space<vmem>>, vector<1x32xf32>
    %c0_103 = arith.constant 0 : index
    %c0_104 = arith.constant 0 : index
    %266 = vector.load %arg18[%c0_103, %c0_104] : memref<1x32xf32, #tpu.memory_space<vmem>>, vector<1x32xf32>
    %cst_105 = arith.constant dense<0.000000e+00> : vector<8xf32>
    %267 = vector.multi_reduction <add>, %264, %cst_105 [1] : vector<8x32xf32> to vector<8xf32>
    %268 = vector.shape_cast %267 : vector<8xf32> to vector<8x1xf32>
    %cst_106 = arith.constant 3.200000e+01 : f32
    %269 = vector.broadcast %cst_106 : f32 to vector<8x1xf32>
    %270 = arith.divf %268, %269 : vector<8x1xf32>
    %271 = vector.broadcast %270 : vector<8x1xf32> to vector<8x32xf32>
    %272 = arith.subf %264, %271 : vector<8x32xf32>
    %273 = arith.mulf %272, %272 : vector<8x32xf32>
    %cst_107 = arith.constant dense<0.000000e+00> : vector<8xf32>
    %274 = vector.multi_reduction <add>, %273, %cst_107 [1] : vector<8x32xf32> to vector<8xf32>
    %275 = vector.shape_cast %274 : vector<8xf32> to vector<8x1xf32>
    %cst_108 = arith.constant 3.200000e+01 : f32
    %276 = vector.broadcast %cst_108 : f32 to vector<8x1xf32>
    %277 = arith.divf %275, %276 : vector<8x1xf32>
    %278 = vector.broadcast %270 : vector<8x1xf32> to vector<8x32xf32>
    %279 = arith.subf %264, %278 : vector<8x32xf32>
    %cst_109 = arith.constant 9.99999974E-6 : f32
    %280 = vector.broadcast %cst_109 : f32 to vector<8x1xf32>
    %281 = arith.addf %277, %280 : vector<8x1xf32>
    %282 = math.rsqrt %281 : vector<8x1xf32>
    %283 = vector.broadcast %282 : vector<8x1xf32> to vector<8x32xf32>
    %284 = arith.mulf %279, %283 : vector<8x32xf32>
    %285 = vector.broadcast %265 : vector<1x32xf32> to vector<8x32xf32>
    %286 = arith.mulf %284, %285 : vector<8x32xf32>
    %287 = vector.broadcast %266 : vector<1x32xf32> to vector<8x32xf32>
    %288 = arith.addf %286, %287 : vector<8x32xf32>
    %289 = arith.truncf %288 : vector<8x32xf32> to vector<8x32xbf16>
    %c0_110 = arith.constant 0 : index
    %c0_111 = arith.constant 0 : index
    %290 = vector.load %arg19[%c0_110, %c0_111] : memref<32x64xbf16, #tpu.memory_space<vmem>>, vector<32x64xbf16>
    %cst_112 = arith.constant dense<0.000000e+00> : vector<8x64xf32>
    %291 = tpu.matmul %289, %290, %cst_112 {dimension_numbers = #tpu.dot_dimension_numbers<[1], [0], [0], [1], [0, 0, 1, 1], [], []>} : vector<8x32xbf16>, vector<32x64xbf16>, vector<8x64xf32> -> vector<8x64xf32>
    %c0_113 = arith.constant 0 : index
    %c0_114 = arith.constant 0 : index
    %292 = vector.load %arg20[%c0_113, %c0_114] : memref<1x64xf32, #tpu.memory_space<vmem>>, vector<1x64xf32>
    %293 = vector.broadcast %292 : vector<1x64xf32> to vector<8x64xf32>
    %294 = arith.addf %291, %293 : vector<8x64xf32>
    %cst_115 = arith.constant 0.000000e+00 : f32
    %295 = vector.broadcast %cst_115 : f32 to vector<8x64xf32>
    %296 = arith.maximumf %294, %295 : vector<8x64xf32>
    %297 = arith.truncf %296 : vector<8x64xf32> to vector<8x64xbf16>
    %c0_116 = arith.constant 0 : index
    %c0_117 = arith.constant 0 : index
    %298 = vector.load %arg21[%c0_116, %c0_117] : memref<64x32xbf16, #tpu.memory_space<vmem>>, vector<64x32xbf16>
    %cst_118 = arith.constant dense<0.000000e+00> : vector<8x32xf32>
    %299 = tpu.matmul %297, %298, %cst_118 {dimension_numbers = #tpu.dot_dimension_numbers<[1], [0], [0], [1], [0, 0, 1, 1], [], []>} : vector<8x64xbf16>, vector<64x32xbf16>, vector<8x32xf32> -> vector<8x32xf32>
    %c0_119 = arith.constant 0 : index
    %c0_120 = arith.constant 0 : index
    %300 = vector.load %arg22[%c0_119, %c0_120] : memref<1x32xf32, #tpu.memory_space<vmem>>, vector<1x32xf32>
    %301 = vector.broadcast %300 : vector<1x32xf32> to vector<8x32xf32>
    %302 = arith.addf %299, %301 : vector<8x32xf32>
    %303 = arith.addf %288, %302 : vector<8x32xf32>
    %c0_121 = arith.constant 0 : index
    %c0_122 = arith.constant 0 : index
    %304 = vector.load %arg23[%c0_121, %c0_122] : memref<1x32xf32, #tpu.memory_space<vmem>>, vector<1x32xf32>
    %c0_123 = arith.constant 0 : index
    %c0_124 = arith.constant 0 : index
    %305 = vector.load %arg24[%c0_123, %c0_124] : memref<1x32xf32, #tpu.memory_space<vmem>>, vector<1x32xf32>
    %cst_125 = arith.constant dense<0.000000e+00> : vector<8xf32>
    %306 = vector.multi_reduction <add>, %303, %cst_125 [1] : vector<8x32xf32> to vector<8xf32>
    %307 = vector.shape_cast %306 : vector<8xf32> to vector<8x1xf32>
    %cst_126 = arith.constant 3.200000e+01 : f32
    %308 = vector.broadcast %cst_126 : f32 to vector<8x1xf32>
    %309 = arith.divf %307, %308 : vector<8x1xf32>
    %310 = vector.broadcast %309 : vector<8x1xf32> to vector<8x32xf32>
    %311 = arith.subf %303, %310 : vector<8x32xf32>
    %312 = arith.mulf %311, %311 : vector<8x32xf32>
    %cst_127 = arith.constant dense<0.000000e+00> : vector<8xf32>
    %313 = vector.multi_reduction <add>, %312, %cst_127 [1] : vector<8x32xf32> to vector<8xf32>
    %314 = vector.shape_cast %313 : vector<8xf32> to vector<8x1xf32>
    %cst_128 = arith.constant 3.200000e+01 : f32
    %315 = vector.broadcast %cst_128 : f32 to vector<8x1xf32>
    %316 = arith.divf %314, %315 : vector<8x1xf32>
    %317 = vector.broadcast %309 : vector<8x1xf32> to vector<8x32xf32>
    %318 = arith.subf %303, %317 : vector<8x32xf32>
    %cst_129 = arith.constant 9.99999974E-6 : f32
    %319 = vector.broadcast %cst_129 : f32 to vector<8x1xf32>
    %320 = arith.addf %316, %319 : vector<8x1xf32>
    %321 = math.rsqrt %320 : vector<8x1xf32>
    %322 = vector.broadcast %321 : vector<8x1xf32> to vector<8x32xf32>
    %323 = arith.mulf %318, %322 : vector<8x32xf32>
    %324 = vector.broadcast %304 : vector<1x32xf32> to vector<8x32xf32>
    %325 = arith.mulf %323, %324 : vector<8x32xf32>
    %326 = vector.broadcast %305 : vector<1x32xf32> to vector<8x32xf32>
    %327 = arith.addf %325, %326 : vector<8x32xf32>
    %c0_130 = arith.constant 0 : index
    %c0_131 = arith.constant 0 : index
    %c0_132 = arith.constant 0 : index
    %328 = vector.load %arg25[%c0_130, %c0_131, %c0_132] : memref<1x8x32xf32, #tpu.memory_space<vmem>>, vector<1x8x32xf32>
    %329 = vector.shape_cast %328 : vector<1x8x32xf32> to vector<8x32xf32>
    %330 = vector.shape_cast %327 : vector<8x32xf32> to vector<1x8x32xf32>
    tpu.vector_store %arg25[%c0_130, %c0_131, %c0_132], %330 {strides = array<i32>} : memref<1x8x32xf32, #tpu.memory_space<vmem>>, vector<1x8x32xf32>,
    return
  }
  func.func @transform_0(%arg0: i32) -> (i32, i32, i32) {
    %c0_i32 = arith.constant 0 : i32
    %c0_i32_0 = arith.constant 0 : i32
    %c0_i32_1 = arith.constant 0 : i32
    return %arg0, %c0_i32, %c0_i32_0 : i32, i32, i32
  }
  func.func @transform_1(%arg0: i32) -> (i32, i32, i32) {
    %c0_i32 = arith.constant 0 : i32
    %c0_i32_0 = arith.constant 0 : i32
    %c0_i32_1 = arith.constant 0 : i32
    return %arg0, %c0_i32, %c0_i32_0 : i32, i32, i32
  }
  func.func @transform_2(%arg0: i32) -> (i32, i32, i32) {
    %c0_i32 = arith.constant 0 : i32
    %c0_i32_0 = arith.constant 0 : i32
    %c0_i32_1 = arith.constant 0 : i32
    return %arg0, %c0_i32, %c0_i32_0 : i32, i32, i32
  }
  func.func @transform_3(%arg0: i32) -> (i32, i32, i32) {
    %c0_i32 = arith.constant 0 : i32
    %c0_i32_0 = arith.constant 0 : i32
    %c0_i32_1 = arith.constant 0 : i32
    return %arg0, %c0_i32, %c0_i32_0 : i32, i32, i32
  }
  func.func @transform_4(%arg0: i32) -> (i32, i32) {
    %c0_i32 = arith.constant 0 : i32
    %c0_i32_0 = arith.constant 0 : i32
    %c0_i32_1 = arith.constant 0 : i32
    return %c0_i32, %c0_i32_0 : i32, i32
  }
  func.func @transform_5(%arg0: i32) -> (i32, i32) {
    %c0_i32 = arith.constant 0 : i32
    %c0_i32_0 = arith.constant 0 : i32
    %c0_i32_1 = arith.constant 0 : i32
    return %c0_i32, %c0_i32_0 : i32, i32
  }
  func.func @transform_6(%arg0: i32) -> (i32, i32) {
    %c0_i32 = arith.constant 0 : i32
    %c0_i32_0 = arith.constant 0 : i32
    %c0_i32_1 = arith.constant 0 : i32
    return %c0_i32, %c0_i32_0 : i32, i32
  }
  func.func @transform_7(%arg0: i32) -> (i32, i32) {
    %c0_i32 = arith.constant 0 : i32
    %c0_i32_0 = arith.constant 0 : i32
    %c0_i32_1 = arith.constant 0 : i32
    return %c0_i32, %c0_i32_0 : i32, i32
  }
  func.func @transform_8(%arg0: i32) -> (i32, i32) {
    %c0_i32 = arith.constant 0 : i32
    %c0_i32_0 = arith.constant 0 : i32
    %c0_i32_1 = arith.constant 0 : i32
    return %c0_i32, %c0_i32_0 : i32, i32
  }
  func.func @transform_9(%arg0: i32) -> (i32, i32) {
    %c0_i32 = arith.constant 0 : i32
    %c0_i32_0 = arith.constant 0 : i32
    %c0_i32_1 = arith.constant 0 : i32
    return %c0_i32, %c0_i32_0 : i32, i32
  }
  func.func @transform_10(%arg0: i32) -> (i32, i32) {
    %c0_i32 = arith.constant 0 : i32
    %c0_i32_0 = arith.constant 0 : i32
    %c0_i32_1 = arith.constant 0 : i32
    return %c0_i32, %c0_i32_0 : i32, i32
  }
  func.func @transform_11(%arg0: i32) -> (i32, i32) {
    %c0_i32 = arith.constant 0 : i32
    %c0_i32_0 = arith.constant 0 : i32
    %c0_i32_1 = arith.constant 0 : i32
    return %c0_i32, %c0_i32_0 : i32, i32
  }
  func.func @transform_12(%arg0: i32) -> (i32, i32) {
    %c0_i32 = arith.constant 0 : i32
    %c0_i32_0 = arith.constant 0 : i32
    %c0_i32_1 = arith.constant 0 : i32
    return %c0_i32, %c0_i32_0 : i32, i32
  }
  func.func @transform_13(%arg0: i32) -> (i32, i32) {
    %c0_i32 = arith.constant 0 : i32
    %c0_i32_0 = arith.constant 0 : i32
    %c0_i32_1 = arith.constant 0 : i32
    return %c0_i32, %c0_i32_0 : i32, i32
  }
  func.func @transform_14(%arg0: i32) -> (i32, i32) {
    %c0_i32 = arith.constant 0 : i32
    %c0_i32_0 = arith.constant 0 : i32
    %c0_i32_1 = arith.constant 0 : i32
    return %c0_i32, %c0_i32_0 : i32, i32
  }
  func.func @transform_15(%arg0: i32) -> (i32, i32) {
    %c0_i32 = arith.constant 0 : i32
    %c0_i32_0 = arith.constant 0 : i32
    %c0_i32_1 = arith.constant 0 : i32
    return %c0_i32, %c0_i32_0 : i32, i32
  }
  func.func @transform_16(%arg0: i32) -> (i32, i32) {
    %c0_i32 = arith.constant 0 : i32
    %c0_i32_0 = arith.constant 0 : i32
    %c0_i32_1 = arith.constant 0 : i32
    return %c0_i32, %c0_i32_0 : i32, i32
  }
  func.func @transform_17(%arg0: i32) -> (i32, i32) {
    %c0_i32 = arith.constant 0 : i32
    %c0_i32_0 = arith.constant 0 : i32
    %c0_i32_1 = arith.constant 0 : i32
    return %c0_i32, %c0_i32_0 : i32, i32
  }
  func.func @transform_18(%arg0: i32) -> (i32, i32) {
    %c0_i32 = arith.constant 0 : i32
    %c0_i32_0 = arith.constant 0 : i32
    %c0_i32_1 = arith.constant 0 : i32
    return %c0_i32, %c0_i32_0 : i32, i32
  }
  func.func @transform_19(%arg0: i32) -> (i32, i32) {
    %c0_i32 = arith.constant 0 : i32
    %c0_i32_0 = arith.constant 0 : i32
    %c0_i32_1 = arith.constant 0 : i32
    return %c0_i32, %c0_i32_0 : i32, i32
  }
  func.func @transform_20(%arg0: i32) -> (i32, i32) {
    %c0_i32 = arith.constant 0 : i32
    %c0_i32_0 = arith.constant 0 : i32
    %c0_i32_1 = arith.constant 0 : i32
    return %c0_i32, %c0_i32_0 : i32, i32
  }
  func.func @transform_21(%arg0: i32) -> (i32, i32) {
    %c0_i32 = arith.constant 0 : i32
    %c0_i32_0 = arith.constant 0 : i32
    %c0_i32_1 = arith.constant 0 : i32
    return %c0_i32, %c0_i32_0 : i32, i32
  }
  func.func @transform_22(%arg0: i32) -> (i32, i32) {
    %c0_i32 = arith.constant 0 : i32
    %c0_i32_0 = arith.constant 0 : i32
    %c0_i32_1 = arith.constant 0 : i32
    return %c0_i32, %c0_i32_0 : i32, i32
  }
  func.func @transform_23(%arg0: i32) -> (i32, i32) {
    %c0_i32 = arith.constant 0 : i32
    %c0_i32_0 = arith.constant 0 : i32
    %c0_i32_1 = arith.constant 0 : i32
    return %c0_i32, %c0_i32_0 : i32, i32
  }
  func.func @transform_24(%arg0: i32) -> (i32, i32, i32) {
    %c0_i32 = arith.constant 0 : i32
    %c0_i32_0 = arith.constant 0 : i32
    %c0_i32_1 = arith.constant 0 : i32
    return %arg0, %c0_i32, %c0_i32_0 : i32, i32, i32
  }
}

module attributes {stable_mosaic.version = 11 : i64} {
  func.func @kernel(%arg0: i32, %arg1: memref<8x32xf32, #tpu.memory_space<vmem>>, %arg2: memref<1x32xf32, #tpu.memory_space<vmem>>, %arg3: memref<1x32xf32, #tpu.memory_space<vmem>>, %arg4: memref<8x32xf32, #tpu.memory_space<vmem>>) attributes {dimension_semantics = [#tpu.dimension_semantics<parallel>], iteration_bounds = array<i64: 2>, scalar_prefetch = 0 : i64, scratch_operands = 0 : i64, tpu.core_type = #tpu.core_type<tc>, window_params = [{transform_indices = @transform_0, window_bounds = array<i64: 8, 32>}, {pipeline_mode = #tpu.pipeline_mode<synchronous>, transform_indices = @transform_1, window_bounds = array<i64: 1, 32>}, {pipeline_mode = #tpu.pipeline_mode<synchronous>, transform_indices = @transform_2, window_bounds = array<i64: 1, 32>}, {transform_indices = @transform_3, window_bounds = array<i64: 8, 32>}]} {
    %c0 = arith.constant 0 : index
    %c0_0 = arith.constant 0 : index
    %0 = vector.load %arg1[%c0, %c0_0] : memref<8x32xf32, #tpu.memory_space<vmem>>, vector<8x32xf32>
    %c0_1 = arith.constant 0 : index
    %c0_2 = arith.constant 0 : index
    %1 = vector.load %arg2[%c0_1, %c0_2] : memref<1x32xf32, #tpu.memory_space<vmem>>, vector<1x32xf32>
    %c0_3 = arith.constant 0 : index
    %c0_4 = arith.constant 0 : index
    %2 = vector.load %arg3[%c0_3, %c0_4] : memref<1x32xf32, #tpu.memory_space<vmem>>, vector<1x32xf32>
    %cst = arith.constant dense<0.000000e+00> : vector<8xf32>
    %3 = vector.multi_reduction <add>, %0, %cst [1] : vector<8x32xf32> to vector<8xf32>
    %4 = vector.shape_cast %3 : vector<8xf32> to vector<8x1xf32>
    %cst_5 = arith.constant 3.200000e+01 : f32
    %5 = vector.broadcast %cst_5 : f32 to vector<8x1xf32>
    %6 = arith.divf %4, %5 : vector<8x1xf32>
    %7 = vector.broadcast %6 : vector<8x1xf32> to vector<8x32xf32>
    %8 = arith.subf %0, %7 : vector<8x32xf32>
    %9 = arith.mulf %8, %8 : vector<8x32xf32>
    %cst_6 = arith.constant dense<0.000000e+00> : vector<8xf32>
    %10 = vector.multi_reduction <add>, %9, %cst_6 [1] : vector<8x32xf32> to vector<8xf32>
    %11 = vector.shape_cast %10 : vector<8xf32> to vector<8x1xf32>
    %cst_7 = arith.constant 3.200000e+01 : f32
    %12 = vector.broadcast %cst_7 : f32 to vector<8x1xf32>
    %13 = arith.divf %11, %12 : vector<8x1xf32>
    %14 = vector.broadcast %6 : vector<8x1xf32> to vector<8x32xf32>
    %15 = arith.subf %0, %14 : vector<8x32xf32>
    %cst_8 = arith.constant 9.99999974E-6 : f32
    %16 = vector.broadcast %cst_8 : f32 to vector<8x1xf32>
    %17 = arith.addf %13, %16 : vector<8x1xf32>
    %18 = math.rsqrt %17 : vector<8x1xf32>
    %19 = vector.broadcast %18 : vector<8x1xf32> to vector<8x32xf32>
    %20 = arith.mulf %15, %19 : vector<8x32xf32>
    %21 = vector.broadcast %1 : vector<1x32xf32> to vector<8x32xf32>
    %22 = arith.mulf %20, %21 : vector<8x32xf32>
    %23 = vector.broadcast %2 : vector<1x32xf32> to vector<8x32xf32>
    %24 = arith.addf %22, %23 : vector<8x32xf32>
    %c0_9 = arith.constant 0 : index
    %c0_10 = arith.constant 0 : index
    %25 = vector.load %arg4[%c0_9, %c0_10] : memref<8x32xf32, #tpu.memory_space<vmem>>, vector<8x32xf32>
    tpu.vector_store %arg4[%c0_9, %c0_10], %24 {strides = array<i32>} : memref<8x32xf32, #tpu.memory_space<vmem>>, vector<8x32xf32>,
    return
  }
  func.func @transform_0(%arg0: i32) -> (i32, i32) {
    %c0_i32 = arith.constant 0 : i32
    %c0_i32_0 = arith.constant 0 : i32
    return %arg0, %c0_i32 : i32, i32
  }
  func.func @transform_1(%arg0: i32) -> (i32, i32) {
    %c0_i32 = arith.constant 0 : i32
    %c0_i32_0 = arith.constant 0 : i32
    %c0_i32_1 = arith.constant 0 : i32
    return %c0_i32, %c0_i32_0 : i32, i32
  }
  func.func @transform_2(%arg0: i32) -> (i32, i32) {
    %c0_i32 = arith.constant 0 : i32
    %c0_i32_0 = arith.constant 0 : i32
    %c0_i32_1 = arith.constant 0 : i32
    return %c0_i32, %c0_i32_0 : i32, i32
  }
  func.func @transform_3(%arg0: i32) -> (i32, i32) {
    %c0_i32 = arith.constant 0 : i32
    %c0_i32_0 = arith.constant 0 : i32
    return %arg0, %c0_i32 : i32, i32
  }
}

</mosaic_0001>

<bundles_post_ra>
// kernel: seq2seq_transformer_forward.13
= control target key start
LH: loop header
LB: loop body
LE: loop exit
PB: predicated region body
PF: predicated region fallthrough
CT: control target
= control target key end

     0   :  { %s356_s12 = smov 0   ;;  %s382_s0 = inlined_call_operand.vmem [shape: f32[16,32], index: 0, kind: input, shape index: {}]   ;;  %s383_s1 = inlined_call_operand.vmem [shape: bf16[32,128], index: 1, kind: input, shape index: {}]   ;;  %s384_s2 = inlined_call_operand.vmem [shape: f32[1,128], index: 2, kind: input, shape index: {}]   ;;  %s385_s3 = inlined_call_operand.vmem [shape: f32[16,128], index: 3, kind: output, shape index: {}]  }
   0x1 LB: > { %s290_s13 = sadd.s32 4294967295, %s332_s12   ;;  %p294_p0 = scmp.ge.s32.totalorder %s332_s12, 1  ;;  %s332_s12 = sphi %s356_s12, %s13_s12  }
   0x2   : > { %p136_p1 = scmp.lt.s32.totalorder %s332_s12, 3 }
   0x4   : > { %p137_p2 = pnand %p294_p0, %p136_p1 }
   0x5   : > { %v324_v0 = vld [vmem:[%s383_s1] sm:$0xff] (!%p137_p2)   ;;  %v334_v1 = vmov (!%p137_p2), 0.0   ;;  %v325_v2 = vld [vmem:[%s383_s1 + $0x8] sm:$0xff] (!%p137_p2)   ;;  %vm335_vm0 = vmmov (!%p137_p2), 0   ;;  %p158_p3 = scmp.lt.s32.totalorder (!%p137_p2), %s290_s13, 1  ;;  %vm192_vm1 = vcmask (!%p137_p2), 261120  }
   0x6   : > { %140 = sbr.rel (%p137_p2) target bundleno = 234 (0xea), region = 32  ;;  %306 = vmatprep.subr.bf16.mxu0 (!%p137_p2), %v334_v1  ;;  %310 = vmatprep.mubr.msk.bf16.mxu0 (!%p137_p2), %vm335_vm0, %v334_v1  ;;  %v297_v5 = vld [vmem:[%s384_s2] ss:$0 sm:$0xff] (!%p137_p2) }
   0x7   : > { %307 = vmatpush3.bf16.msra.mxu0 (!%p137_p2), %v324_v0 }
   0x8   : > { %308 = vmatprep.subr.bf16.mxu0 (!%p137_p2), %v334_v1 }
   0xb   : > { %309 = vmatpush3.bf16.msra.mxu0 (!%p137_p2), %v325_v2 }
   0xd   : > { %s387_s13 = smov (!%p158_p3, %s290_s13), 1 }
   0xe   : > { %s295_s18 = sshll.u32 %s387_s13, 3 }
   0xf   : > { %s161_s21 = scalar_lea.vmem %s382_s0, %s295_s18  ;;  %s165_s26 = scalar_lea.vmem %s385_s3, %s295_s18 }
  0x10   : > { %v167_v3 = vld [vmem:[%s161_s21] sm:$0xff] }
  0x11   : > { %v168_v4 = vpack.c.bf16 %v167_v3, %v167_v3 }
  0x13   : > { %311 = vmatmul.mubr.msk.bf16.vlgmr.msra.gmra.mrb[0].mxu0 %vm192_vm1, %v168_v4 }
  0xe6   : > { %v230_v6 = vpop.f32.mrb[0].mxu0 }
  0xe7   : > { %v231_v7 = vadd.f32 %v297_v5, %v230_v6  ;;  %v312_v8 = vpop.f32.mrb[1].mxu0 }
  0xe8   : > { %v233_v9 = vpop.f32.mrb[2].mxu0 }
  0xe9   : > { %236 = vst [vmem:[%s165_s26] sm:$0xff] %v231_v7  ;;  %v313_v10 = vpop.f32.mrb[3].mxu0 }
  0xea PF: > { %s13_s12 = sadd.s32 1, %s332_s12  }
  0xeb   : > { %p10_p4 = scmp.ge.s32.totalorder %s13_s12, 4  }
  0xed   :  { %12 = sbr.rel (!%p10_p4) target bundleno = 1 (0x1), region = 62 }

// kernel: seq2seq_transformer_forward.9
= control target key start
LH: loop header
LB: loop body
LE: loop exit
PB: predicated region body
PF: predicated region fallthrough
CT: control target
= control target key end

     0   :  { %s301_s12 = smov 0   ;;  %s327_s0 = inlined_call_operand.vmem [shape: f32[16,32], index: 0, kind: input, shape index: {}]   ;;  %s328_s1 = inlined_call_operand.vmem [shape: f32[1,32], index: 1, kind: input, shape index: {}]   ;;  %s329_s2 = inlined_call_operand.vmem [shape: f32[1,32], index: 2, kind: input, shape index: {}]   ;;  %s330_s3 = inlined_call_operand.vmem [shape: f32[16,32], index: 3, kind: output, shape index: {}]  }
   0x1 LB: > { %s252_s13 = sadd.s32 4294967295, %s279_s12   ;;  %p256_p0 = scmp.ge.s32.totalorder %s279_s12, 1  ;;  %s279_s12 = sphi %s301_s12, %s13_s12  }
   0x2   : > { %p136_p1 = scmp.lt.s32.totalorder %s279_s12, 3 }
   0x4   : > { %p137_p2 = pnand %p256_p0, %p136_p1 }
   0x5   : > { %p158_p3 = scmp.lt.s32.totalorder (!%p137_p2), %s252_s13, 1  ;;  %vm169_vm0 = vcmask (!%p137_p2), 261120   ;;  %v259_v11 = vld [vmem:[%s328_s1] ss:$0 sm:$0xff] (!%p137_p2) }
   0x6   : > { %140 = sbr.rel (%p137_p2) target bundleno = 331 (0x14b), region = 32  ;;  %v260_v13 = vld [vmem:[%s329_s2] ss:$0 sm:$0xff] (!%p137_p2) }
   0xd   : > { %s332_s13 = smov (!%p158_p3, %s252_s13), 1 }
   0xe   : > { %s257_s14 = sshll.u32 %s332_s13, 3 }
   0xf   : > { %s161_s17 = scalar_lea.vmem %s327_s0, %s257_s14  ;;  %s165_s24 = scalar_lea.vmem %s330_s3, %s257_s14 }
  0x10   : > { %v166_v0 = vld [vmem:[%s161_s17] sm:$0xff] }
  0x11   : > { %v170_v1 = vsel %vm169_vm0, %v166_v0, 0.0 }
  0x12   : > { %171 = vadd.xlane.f32.xlu0 %v170_v1 }
  0x9f   : > { %v172_v2 = vpop.xlane.xlu0 %171 }
  0xa0   : > { %v174_v3 = vmul.f32 0.03125, %v172_v2 }
  0xa2   : > { %v175_v4 = vsub.f32 %v166_v0, %v174_v3 }
  0xa4   : > { %v176_v5 = vmul.f32 %v175_v4, %v175_v4 }
  0xa6   : > { %v177_v6 = vsel %vm169_vm0, %v176_v5, 0.0 }
  0xa7   : > { %178 = vadd.xlane.f32.xlu0 %v177_v6 }
 0x134   : > { %v179_v7 = vpop.xlane.xlu0 %178 }
 0x135   : > { %v180_v8 = vmul.f32 0.03125, %v179_v7 }
 0x137   : > { %v181_v9 = vadd.f32 1e-05, %v180_v8 }
 0x139   : > { %271 = vrsqrt.f32 %v181_v9 }
 0x143   : > { %v272_v10 = vpop.eup %271 }
 0x144   : > { %v183_v12 = vmul.f32 %v272_v10, %v175_v4 }
 0x146   : > { %v190_v14 = vmul.f32 %v259_v11, %v183_v12 }
 0x148   : > { %v197_v15 = vadd.f32 %v260_v13, %v190_v14 }
 0x14a   : > { %198 = vst.msk [vmem:[%s165_s24] sm:$0xff] %vm169_vm0, %v197_v15 }
 0x14b PF: > { %s13_s12 = sadd.s32 1, %s279_s12  }
 0x14c   : > { %p10_p4 = scmp.ge.s32.totalorder %s13_s12, 4  }
 0x14e   :  { %12 = sbr.rel (!%p10_p4) target bundleno = 1 (0x1), region = 62 }

// kernel: seq2seq_transformer_forward.7
= control target key start
LH: loop header
LB: loop body
LE: loop exit
PB: predicated region body
PF: predicated region fallthrough
CT: control target
= control target key end

     0   :  { %s1803_s29 = smov 0   ;;  %s2005_s0 = inlined_call_operand.vmem [shape: f32[2,8,32], index: 0, kind: input, shape index: {}]   ;;  %s2006_s1 = inlined_call_operand.vmem [shape: f32[2,8,8], index: 1, kind: input, shape index: {}]   ;;  %s2007_s2 = inlined_call_operand.vmem [shape: bf16[32,96], index: 2, kind: input, shape index: {}]   ;;  %s2008_s3 = inlined_call_operand.vmem [shape: f32[1,96], index: 3, kind: input, shape index: {}]   ;;  %s2009_s4 = inlined_call_operand.vmem [shape: bf16[32,32], index: 4, kind: input, shape index: {}]   ;;  %s2010_s5 = inlined_call_operand.vmem [shape: f32[1,32], index: 5, kind: input, shape index: {}]   ;;  %s2011_s6 = inlined_call_operand.vmem [shape: f32[1,32], index: 6, kind: input, shape index: {}, may-alias: {6,12}]   ;;  %s2012_s7 = inlined_call_operand.vmem [shape: f32[1,32], index: 7, kind: input, shape index: {}, may-alias: {7,13}]   ;;  %s2013_s8 = inlined_call_operand.vmem [shape: bf16[32,64], index: 8, kind: input, shape index: {}]   ;;  %s2014_s9 = inlined_call_operand.vmem [shape: f32[1,64], index: 9, kind: input, shape index: {}]   ;;  %s2015_s10 = inlined_call_operand.vmem [shape: bf16[64,32], index: 10, kind: input, shape index: {}]   ;;  %s2016_s11 = inlined_call_operand.vmem [shape: f32[1,32], index: 11, kind: input, shape index: {}]   ;;  %s2017_s12 = inlined_call_operand.vmem [shape: f32[1,32], index: 12, kind: input, shape index: {}, may-alias: {6,12}]   ;;  %s2018_s13 = inlined_call_operand.vmem [shape: f32[1,32], index: 13, kind: input, shape index: {}, may-alias: {7,13}]   ;;  %s2019_s14 = inlined_call_operand.vmem [shape: f32[2,8,32], index: 14, kind: output, shape index: {}]  }
   0x1 LB: > { %s1482_s30 = sadd.s32 4294967295, %s1713_s29   ;;  %p1486_p0 = scmp.ge.s32.totalorder %s1713_s29, 1  ;;  %s1713_s29 = sphi %s1803_s29, %s24_s29  }
   0x2   : > { %p420_p1 = scmp.lt.s32.totalorder %s1713_s29, 3 }
   0x4   : > { %p421_p2 = pnand %p1486_p0, %p420_p1 }
   0x5   : > { %v1679_v0 = vld [vmem:[%s2007_s2] sm:$0xff] (!%p421_p2)   ;;  %v1715_v1 = vmov (!%p421_p2), 0.0   ;;  %v1680_v2 = vld [vmem:[%s2007_s2 + $0x8] sm:$0xff] (!%p421_p2)   ;;  %vm1716_vm0 = vmmov (!%p421_p2), 0   ;;  %p468_p3 = scmp.lt.s32.totalorder (!%p421_p2), %s1482_s30, 1  ;;  %vm506_vm1 = vcmask (!%p421_p2), 261120  }
   0x6   : > { %424 = sbr.rel (%p421_p2) target bundleno = 3687 (0xe67), region = 76  ;;  %1558 = vmatprep.subr.bf16.mxu1 (!%p421_p2), %v1715_v1  ;;  %1572 = vmatprep.subr.bf16.mxu0 (!%p421_p2), %v1715_v1  ;;  %v1490_v5 = vld [vmem:[%s2008_s3] ss:$0 sm:$0xff] (!%p421_p2)  ;;  %s1717_s25 = smov (!%p421_p2), 120   ;;  %vm555_vm2 = vcmask (!%p421_p2), 64512   ;;  %vm621_vm3 = vcmask (!%p421_p2), 1043456  }
   0x7   : > { %1559 = vmatpush3.bf16.msra.mxu1 (!%p421_p2), %v1679_v0  ;;  %1562 = vmatprep.mubr.msk.bf16.mxu1 (!%p421_p2), %vm1716_vm0, %v1715_v1  ;;  %s1718_s26 = smov (!%p421_p2), 96   ;;  %s1719_s27 = smov (!%p421_p2), 88   ;;  %v666_v54 = vld [vmem:[%s2009_s4] sm:$0xf] (!%p421_p2)  ;;  %v780_v56 = vld [vmem:[%s2009_s4 + $0x4] sm:$0xf] (!%p421_p2) }
   0x8   : > { %1560 = vmatprep.subr.bf16.mxu1 (!%p421_p2), %v1715_v1  ;;  %1574 = vmatprep.mubr.msk.bf16.mxu0 (!%p421_p2), %vm1716_vm0, %v1715_v1  ;;  %s1720_s16 = smov (!%p421_p2), 64   ;;  %s1721_s17 = smov (!%p421_p2), 56   ;;  %v831_v55 = vsel (!%p421_p2), %vm621_vm3, %v666_v54, 0  ;;  %v785_v57 = vsel (!%p421_p2), %vm621_vm3, %v780_v56, 0  ;;  %vm1342_vm4 = vcmask (!%p421_p2), 523264  }
   0x9   : > { %s1722_s18 = smov (!%p421_p2), 112   ;;  %s1723_s20 = smov (!%p421_p2), 80  }
   0xb   : > { %1561 = vmatpush3.bf16.msra.mxu1 (!%p421_p2), %v1680_v2 }
   0xc   : > { %1566 = vmatprep.subr.bf16.mxu1 (!%p421_p2), %v1715_v1 }
   0xd   : > { %s2021_s30 = smov (!%p468_p3, %s1482_s30), 1 }
   0xe   : > { %s1824_s19 = sshll.u32 %s2021_s30, 3 }
   0xf   : > { %s471_s22 = scalar_lea.vmem %s2005_s0, %s1824_s19  ;;  %s475_s15 = scalar_lea.vmem %s2006_s1, %s1824_s19 }
  0x10   : > { %v1831_v3 = vld [vmem:[%s471_s22] sm:$0xff] }
  0x11   : > { %v482_v4 = vpack.c.bf16 %v1831_v3, %v1831_v3  ;;  %v1861_v18 = vld [vmem:[%s475_s15] sm:$0xff]  ;;  %s1727_s15 = smov 40  }
  0x13   : > { %1563 = vmatmul.mubr.msk.bf16.vlgmr.msra.gmra.mrb[0].mxu1 %vm506_vm1, %v482_v4 }
  0x14   : > { %1568 = vmatprep.mubr.msk.bf16.mxu1 %vm1716_vm0, %v1715_v1 }
  0xe6   : > { %v544_v6 = vpop.f32.mrb[0].mxu1 }
  0xe7   : > { %v545_v7 = vadd.f32 %v1490_v5, %v544_v6  ;;  %v1564_v8 = vpop.f32.mrb[1].mxu1 }
  0xe8   : > { %v547_v9 = vpop.f32.mrb[2].mxu1 }
  0xe9   : > { %v1841_v10 = vpack.c.bf16 %v545_v7, %v545_v7  ;;  %v1565_v11 = vpop.f32.mrb[3].mxu1 }
  0xeb   : > { %667 = vrot.lane.b32.xlu1 %v1841_v10, %s1717_s25  ;;  %553 = vrot.lane.b32.xlu0 %v1841_v10, %s1718_s26  ;;  %s1724_s25 = smov 72   ;;  %s1725_s26 = smov 104  }
  0xef   : > { %669 = vrot.lane.b32.xlu0 %v1841_v10, %s1719_s27  ;;  %s1726_s27 = smov 48  }
 0x15d   : > { %v554_v12 = vpop.permute.xlu0 %553  ;;  %v668_v16 = vpop.permute.xlu1 %667 }
 0x15e   : > { %v560_v13 = vsel %vm555_vm2, %v554_v12, 0 }
 0x15f   : > { %1567 = vmatpush3.bf16.xpose.msra.mxu1 %v560_v13 }
 0x160   : > { %1578 = vmatprep.subr.bf16.mxu1 %v1715_v1 }
 0x161   : > { %v670_v14 = vpop.permute.xlu0 %669 }
 0x162   : > { %v675_v15 = vsel %vm555_vm2, %v670_v14, 0 }
 0x166   : > { %1569 = vmatmul.mubr.msk.bf16.vlgmr.msra.gmra.mrb[4].mxu1 %vm555_vm2, %v1841_v10 }
 0x167   : > { %1579 = vmatpush3.bf16.xpose.msra.mxu1 %v675_v15  ;;  %1580 = vmatprep.mubr.msk.bf16.mxu1 %vm1716_vm0, %v1715_v1 }
 0x168   : > { %1590 = vmatprep.subr.bf16.mxu1 %v1715_v1 }
 0x16e   : > { %1581 = vmatmul.mubr.msk.bf16.vlgmr.msra.gmra.mrb[8].mxu1 %vm555_vm2, %v668_v16 }
 0x16f   : > { %1592 = vmatprep.mubr.msk.bf16.mxu1 %vm1716_vm0, %v1715_v1  ;;  %1591 = vmatpush3.bf16.msra.mxu1 %v785_v57 }
 0x170   : > { %1602 = vmatprep.subr.bf16.mxu1 %v1715_v1 }
 0x239   : > { %v596_v17 = vpop.f32.mrb[4].mxu1 }
 0x23a   : > { %v602_v19 = vmul.f32 0.35355338, %v596_v17  ;;  %v1570_v20 = vpop.f32.mrb[5].mxu1 }
 0x23b   : > { %v599_v21 = vpop.f32.mrb[6].mxu1 }
 0x23c   : > { %v1571_v22 = vpop.f32.mrb[7].mxu1  ;;  %v603_v23 = vadd.f32 %v602_v19, %v1861_v18 }
 0x23e   : > { %v604_v24 = vsel %vm555_vm2, %v603_v23, -inf }
 0x23f   : > { %605 = vmax.xlane.f32.xlu1 %v604_v24 }
 0x241   : > { %v711_v25 = vpop.f32.mrb[8].mxu1 }
 0x242   : > { %v717_v26 = vmul.f32 0.35355338, %v711_v25  ;;  %v1582_v27 = vpop.f32.mrb[9].mxu1 }
 0x243   : > { %v714_v28 = vpop.f32.mrb[10].mxu1 }
 0x244   : > { %v1583_v29 = vpop.f32.mrb[11].mxu1  ;;  %v718_v30 = vadd.f32 %v717_v26, %v1861_v18 }
 0x246   : > { %v719_v31 = vsel %vm555_vm2, %v718_v30, -inf }
 0x247   : > { %720 = vmax.xlane.f32.xlu0 %v719_v31 }
 0x2cc   : > { %v606_v32 = vpop.xlane.xlu1 %605 }
 0x2cd   : > { %v607_v33 = vsub.f32 %v603_v23, %v606_v32 }
 0x2cf   : > { %v608_v34 = vmul.f32 1.442695, %v607_v33 }
 0x2d1   : > { %1687 = vpow2.f32 %v608_v34 }
 0x2d4   : > { %v721_v35 = vpop.xlane.xlu0 %720 }
 0x2d5   : > { %v722_v36 = vsub.f32 %v718_v30, %v721_v35 }
 0x2d7   : > { %v723_v37 = vmul.f32 1.442695, %v722_v36 }
 0x2d9   : > { %1689 = vpow2.f32 %v723_v37 }
 0x2db   : > { %v1688_v38 = vpop.eup %1687 }
 0x2dc   : > { %v610_v39 = vsel %vm555_vm2, %v1688_v38, 0.0 }
 0x2dd   : > { %611 = vadd.xlane.f32.xlu0 %v610_v39 }
 0x2e3   : > { %v1690_v40 = vpop.eup %1689 }
 0x2e4   : > { %v725_v41 = vsel %vm555_vm2, %v1690_v40, 0.0 }
 0x2e5   : > { %726 = vadd.xlane.f32.xlu1 %v725_v41  ;;  %v986_v41 = vld [vmem:[%s2009_s4 + $0x8] sm:$0xf] }
 0x2f3   : > { %616 = vrot.lane.b32.xlu0 %v1841_v10, %s1720_s16 }
 0x2f6   : > { %731 = vrot.lane.b32.xlu1 %v1841_v10, %s1721_s17 }
 0x2f7   : > { %873 = vrot.lane.b32.xlu0 %v1841_v10, %s1722_s18  ;;  %s479_s18 = scalar_lea.vmem %s2019_s14, %s1824_s19 }
 0x2fa   : > { %875 = vrot.lane.b32.xlu1 %v1841_v10, %s1723_s20 }
 0x36a   : > { %v612_v42 = vpop.xlane.xlu0 %611 }
 0x36b   : > { %1691 = vrcp.f32 %v612_v42  ;;  %v991_v42 = vsel %vm621_vm3, %v986_v41, 0 }
 0x36e   : > { %v617_v43 = vpop.permute.xlu0 %616 }
 0x36f   : > { %v623_v44 = vsel %vm621_vm3, %v617_v43, 0 }
 0x370   : > { %1573 = vmatpush3.bf16.msra.mxu0 %v623_v44 }
 0x371   : > { %1584 = vmatprep.subr.bf16.mxu0 %v1715_v1 }
 0x372   : > { %v727_v45 = vpop.xlane.xlu1 %726  ;;  %v874_v8 = vpop.permute.xlu0 %873 }
 0x373   : > { %1693 = vrcp.f32 %v727_v45 }
 0x375   : > { %v1692_v46 = vpop.eup %1691 }
 0x376   : > { %v614_v47 = vmul.f32 %v1692_v46, %v1688_v38  ;;  %v732_v48 = vpop.permute.xlu1 %731 }
 0x377   : > { %v737_v50 = vsel %vm621_vm3, %v732_v48, 0 }
 0x378   : > { %v615_v49 = vpack.c.bf16 %v614_v47, %v614_v47 }
 0x37a   : > { %1575 = vmatmul.mubr.msk.bf16.vlgmr.msra.gmra.mrb[0].mxu0 %vm555_vm2, %v615_v49  ;;  %v876_v63 = vpop.permute.xlu1 %875 }
 0x37b   : > { %1585 = vmatpush3.bf16.msra.mxu0 %v737_v50  ;;  %1586 = vmatprep.mubr.msk.bf16.mxu0 %vm1716_vm0, %v1715_v1  ;;  %v881_v6 = vsel %vm555_vm2, %v876_v63, 0 }
 0x37c   : > { %1596 = vmatprep.subr.bf16.mxu0 %v1715_v1 }
 0x37d   : > { %v1694_v51 = vpop.eup %1693 }
 0x37e   : > { %v729_v52 = vmul.f32 %v1694_v51, %v1690_v40 }
 0x380   : > { %v730_v53 = vpack.c.bf16 %v729_v52, %v729_v52 }
 0x382   : > { %1587 = vmatmul.mubr.msk.bf16.vlgmr.msra.gmra.mrb[4].mxu0 %vm555_vm2, %v730_v53 }
 0x383   : > { %1598 = vmatprep.mubr.msk.bf16.mxu0 %vm1716_vm0, %v1715_v1  ;;  %1597 = vmatpush3.bf16.msra.mxu0 %v831_v55 }
 0x384   : > { %1608 = vmatprep.subr.bf16.mxu0 %v1715_v1 }
 0x44d   : > { %v659_v58 = vpop.f32.mrb[0].mxu0 }
 0x44e   : > { %v665_v59 = vpack.c.bf16 %v659_v58, %v659_v58  ;;  %v1576_v60 = vpop.f32.mrb[1].mxu0 }
 0x44f   : > { %v662_v61 = vpop.f32.mrb[2].mxu0 }
 0x450   : > { %v1577_v62 = vpop.f32.mrb[3].mxu0  ;;  %1599 = vmatmul.mubr.msk.bf16.vlgmr.msra.gmra.mrb[8].mxu0 %vm555_vm2, %v665_v59 }
 0x451   : > { %1610 = vmatprep.mubr.msk.bf16.mxu0 %vm1716_vm0, %v1715_v1 }
 0x455   : > { %v773_v0 = vpop.f32.mrb[4].mxu0 }
 0x456   : > { %v779_v2 = vpack.c.bf16 %v773_v0, %v773_v0  ;;  %v1588_v4 = vpop.f32.mrb[5].mxu0 }
 0x457   : > { %v776_v5 = vpop.f32.mrb[6].mxu0 }
 0x458   : > { %v1589_v7 = vpop.f32.mrb[7].mxu0  ;;  %1593 = vmatmul.mubr.msk.bf16.vlgmr.msra.gmra.mrb[12].mxu1 %vm555_vm2, %v779_v2 }
 0x459   : > { %1603 = vmatpush3.bf16.xpose.msra.mxu1 %v881_v6  ;;  %1604 = vmatprep.mubr.msk.bf16.mxu1 %vm1716_vm0, %v1715_v1 }
 0x45a   : > { %1614 = vmatprep.subr.bf16.mxu1 %v1715_v1 }
 0x460   : > { %1605 = vmatmul.mubr.msk.bf16.vlgmr.msra.gmra.mrb[16].mxu1 %vm555_vm2, %v874_v8 }
 0x461   : > { %1616 = vmatprep.mubr.msk.bf16.mxu1 %vm1716_vm0, %v1715_v1  ;;  %1615 = vmatpush3.bf16.msra.mxu1 %v991_v42 }
 0x462   : > { %1626 = vmatprep.subr.bf16.mxu1 %v1715_v1 }
 0x523   : > { %v867_v9 = vpop.f32.mrb[8].mxu0 }
 0x524   : > { %v1600_v11 = vpop.f32.mrb[9].mxu0 }
 0x525   : > { %v870_v12 = vpop.f32.mrb[10].mxu0 }
 0x526   : > { %v1601_v13 = vpop.f32.mrb[11].mxu0 }
 0x52b   : > { %v821_v14 = vpop.f32.mrb[12].mxu1 }
 0x52c   : > { %v1904_v15 = vadd.f32 %v867_v9, %v821_v14  ;;  %v1594_v16 = vpop.f32.mrb[13].mxu1 }
 0x52d   : > { %v824_v17 = vpop.f32.mrb[14].mxu1  ;;  %v1506_v16 = vld [vmem:[%s2010_s5] ss:$0 sm:$0xff] }
 0x52e   : > { %v1595_v19 = vpop.f32.mrb[15].mxu1 }
 0x533   : > { %v917_v20 = vpop.f32.mrb[16].mxu1 }
 0x534   : > { %v923_v21 = vmul.f32 0.35355338, %v917_v20  ;;  %v1606_v22 = vpop.f32.mrb[17].mxu1 }
 0x535   : > { %v920_v23 = vpop.f32.mrb[18].mxu1 }
 0x536   : > { %v1607_v24 = vpop.f32.mrb[19].mxu1  ;;  %v924_v25 = vadd.f32 %v923_v21, %v1861_v18 }
 0x538   : > { %v925_v26 = vsel %vm555_vm2, %v924_v25, -inf }
 0x539   : > { %926 = vmax.xlane.f32.xlu1 %v925_v26 }
 0x54a   : > { %1036 = vrot.lane.b32.xlu1 %v1841_v10, %s1724_s25 }
 0x54e   : > { %1034 = vrot.lane.b32.xlu1 %v1841_v10, %s1725_s26 }
 0x5c6   : > { %v927_v27 = vpop.xlane.xlu1 %926 }
 0x5c7   : > { %v928_v28 = vsub.f32 %v924_v25, %v927_v27 }
 0x5c9   : > { %v929_v29 = vmul.f32 1.442695, %v928_v28 }
 0x5ca   : > { %v1037_v37 = vpop.permute.xlu1 %1036 }
 0x5cb   : > { %1695 = vpow2.f32 %v929_v29  ;;  %v1042_v39 = vsel %vm555_vm2, %v1037_v37, 0  ;;  %v1507_v37 = vld [vmem:[%s2011_s6] ss:$0 sm:$0xff] }
 0x5ce   : > { %v1035_v40 = vpop.permute.xlu1 %1034 }
 0x5d5   : > { %v1696_v30 = vpop.eup %1695 }
 0x5d6   : > { %v931_v31 = vsel %vm555_vm2, %v1696_v30, 0.0 }
 0x5d7   : > { %932 = vadd.xlane.f32.xlu0 %v931_v31  ;;  %v1682_v31 = vld [vmem:[%s2013_s8 + $0x8] sm:$0xff]  }
 0x5ed   : > { %937 = vrot.lane.b32.xlu0 %v1841_v10, %s1726_s27 }
 0x664   : > { %v933_v32 = vpop.xlane.xlu0 %932 }
 0x665   : > { %1697 = vrcp.f32 %v933_v32  ;;  %v1684_v32 = vld [vmem:[%s2015_s10 + $0x8] sm:$0xff]  }
 0x668   : > { %v938_v33 = vpop.permute.xlu0 %937 }
 0x669   : > { %v943_v34 = vsel %vm621_vm3, %v938_v33, 0 }
 0x66a   : > { %1609 = vmatpush3.bf16.msra.mxu0 %v943_v34 }
 0x66b   : > { %1620 = vmatprep.subr.bf16.mxu0 %v1715_v1 }
 0x66f   : > { %v1698_v35 = vpop.eup %1697 }
 0x670   : > { %v935_v36 = vmul.f32 %v1698_v35, %v1696_v30  ;;  %v1681_v30 = vld [vmem:[%s2013_s8] sm:$0xff]  }
 0x672   : > { %v936_v38 = vpack.c.bf16 %v935_v36, %v935_v36 }
 0x674   : > { %1611 = vmatmul.mubr.msk.bf16.vlgmr.msra.gmra.mrb[12].mxu0 %vm555_vm2, %v936_v38 }
 0x675   : > { %1621 = vmatpush3.bf16.xpose.msra.mxu0 %v1042_v39  ;;  %1622 = vmatprep.mubr.msk.bf16.mxu0 %vm1716_vm0, %v1715_v1  ;;  %v1508_v39 = vld [vmem:[%s2012_s7] ss:$0 sm:$0xff] }
 0x676   : > { %1632 = vmatprep.subr.bf16.mxu0 %v1715_v1 }
 0x67c   : > { %1623 = vmatmul.mubr.msk.bf16.vlgmr.msra.gmra.mrb[16].mxu0 %vm555_vm2, %v1035_v40 }
 0x67d   : > { %1634 = vmatprep.mubr.msk.bf16.mxu0 %vm1716_vm0, %v1715_v1 }
 0x747   : > { %v979_v43 = vpop.f32.mrb[12].mxu0 }
 0x748   : > { %v985_v44 = vpack.c.bf16 %v979_v43, %v979_v43  ;;  %v1612_v45 = vpop.f32.mrb[13].mxu0  ;;  %v1685_v43 = vld [vmem:[%s2015_s10 + $0x10] sm:$0xff]  }
 0x749   : > { %v982_v46 = vpop.f32.mrb[14].mxu0  ;;  %v1509_v45 = vld [vmem:[%s2014_s9] ss:$0 sm:$0xff] }
 0x74a   : > { %v1613_v47 = vpop.f32.mrb[15].mxu0  ;;  %1617 = vmatmul.mubr.msk.bf16.vlgmr.msra.gmra.mrb[20].mxu1 %vm555_vm2, %v985_v44  ;;  %v1686_v44 = vld [vmem:[%s2015_s10 + $0x18] sm:$0xff]  }
 0x74b   : > { %1628 = vmatprep.mubr.msk.bf16.mxu1 %vm1716_vm0, %v1715_v1 }
 0x74f   : > { %v1078_v48 = vpop.f32.mrb[16].mxu0 }
 0x750   : > { %v1084_v49 = vmul.f32 0.35355338, %v1078_v48  ;;  %v1624_v50 = vpop.f32.mrb[17].mxu0 }
 0x751   : > { %v1081_v51 = vpop.f32.mrb[18].mxu0 }
 0x752   : > { %v1625_v52 = vpop.f32.mrb[19].mxu0  ;;  %v1085_v53 = vadd.f32 %v1084_v49, %v1861_v18  ;;  %v1147_v18 = vld [vmem:[%s2009_s4 + $0xc] sm:$0xf] }
 0x754   : > { %v1086_v54 = vsel %vm555_vm2, %v1085_v53, -inf }
 0x755   : > { %1087 = vmax.xlane.f32.xlu0 %v1086_v54 }
 0x76b   : > { %1098 = vrot.lane.b32.xlu0 %v1841_v10, %s1727_s15  ;;  %v1152_v10 = vsel %vm621_vm3, %v1147_v18, 0 }
 0x76c   : > { %1633 = vmatpush3.bf16.msra.mxu0 %v1152_v10 }
 0x76d   : > { %1646 = vmatprep.subr.bf16.mxu0 %v1715_v1 }
 0x7e2   : > { %v1088_v55 = vpop.xlane.xlu0 %1087 }
 0x7e3   : > { %v1089_v56 = vsub.f32 %v1085_v53, %v1088_v55 }
 0x7e5   : > { %v1090_v57 = vmul.f32 1.442695, %v1089_v56 }
 0x7e6   : > { %v1099_v58 = vpop.permute.xlu0 %1098 }
 0x7e7   : > { %1699 = vpow2.f32 %v1090_v57  ;;  %v1104_v59 = vsel %vm621_vm3, %v1099_v58, 0 }
 0x7e8   : > { %1627 = vmatpush3.bf16.msra.mxu1 %v1104_v59 }
 0x7e9   : > { %1638 = vmatprep.subr.bf16.mxu1 %v1715_v1 }
 0x7f1   : > { %v1700_v60 = vpop.eup %1699 }
 0x7f2   : > { %v1092_v61 = vsel %vm555_vm2, %v1700_v60, 0.0 }
 0x7f3   : > { %1093 = vadd.xlane.f32.xlu1 %v1092_v61 }
 0x81d   : > { %v1027_v62 = vpop.f32.mrb[20].mxu1 }
 0x81e   : > { %v1033_v63 = vadd.f32 %v1027_v62, %v1904_v15  ;;  %v1618_v0 = vpop.f32.mrb[21].mxu1 }
 0x81f   : > { %v1030_v2 = vpop.f32.mrb[22].mxu1 }
 0x820   : > { %v1619_v4 = vpop.f32.mrb[23].mxu1 }
 0x880   : > { %v1094_v5 = vpop.xlane.xlu1 %1093 }
 0x881   : > { %1701 = vrcp.f32 %v1094_v5  ;;  %v1519_v5 = vld [vmem:[%s2017_s12] ss:$0 sm:$0xff] }
 0x88b   : > { %v1702_v6 = vpop.eup %1701 }
 0x88c   : > { %v1096_v7 = vmul.f32 %v1702_v6, %v1700_v60 }
 0x88e   : > { %v1097_v8 = vpack.c.bf16 %v1096_v7, %v1096_v7  ;;  %v1520_v7 = vld [vmem:[%s2018_s13] ss:$0 sm:$0xff] }
 0x890   : > { %1629 = vmatmul.mubr.msk.bf16.vlgmr.msra.gmra.mrb[24].mxu1 %vm555_vm2, %v1097_v8 }
 0x891   : > { %1642 = vmatprep.mubr.msk.bf16.mxu1 %vm1716_vm0, %v1715_v1  ;;  %1639 = vmatpush3.bf16.msra.mxu1 %v1681_v30 }
 0x892   : > { %1640 = vmatprep.subr.bf16.mxu1 %v1715_v1 }
 0x895   : > { %1641 = vmatpush3.bf16.msra.mxu1 %v1682_v31 }
 0x963   : > { %v1140_v9 = vpop.f32.mrb[24].mxu1 }
 0x964   : > { %v1146_v11 = vpack.c.bf16 %v1140_v9, %v1140_v9  ;;  %v1630_v12 = vpop.f32.mrb[25].mxu1 }
 0x965   : > { %v1143_v13 = vpop.f32.mrb[26].mxu1 }
 0x966   : > { %v1631_v14 = vpop.f32.mrb[27].mxu1  ;;  %1635 = vmatmul.mubr.msk.bf16.vlgmr.msra.gmra.mrb[20].mxu0 %vm555_vm2, %v1146_v11 }
 0x967   : > { %1654 = vmatprep.mubr.msk.bf16.mxu0 %vm1716_vm0, %v1715_v1 }
 0xa39   : > { %v1188_v15 = vpop.f32.mrb[20].mxu0 }
 0xa3a   : > { %v1194_v17 = vadd.f32 %v1188_v15, %v1033_v63  ;;  %v1636_v19 = vpop.f32.mrb[21].mxu0 }
 0xa3b   : > { %v1191_v20 = vpop.f32.mrb[22].mxu0 }
 0xa3c   : > { %v1202_v21 = vadd.f32 %v1506_v16, %v1194_v17  ;;  %v1637_v22 = vpop.f32.mrb[23].mxu0 }
 0xa3e   : > { %v1203_v23 = vadd.f32 %v1202_v21, %v1831_v3  ;;  %v1683_v3 = vld [vmem:[%s2015_s10] sm:$0xff]  }
 0xa3f   : > { %1647 = vmatpush3.bf16.msra.mxu0 %v1683_v3 }
 0xa40   : > { %v1206_v24 = vsel %vm506_vm1, %v1203_v23, 0.0  ;;  %1648 = vmatprep.subr.bf16.mxu0 %v1715_v1 }
 0xa41   : > { %1207 = vadd.xlane.f32.xlu1 %v1206_v24 }
 0xa43   : > { %1649 = vmatpush3.bf16.msra.mxu0 %v1684_v32 }
 0xa44   : > { %1650 = vmatprep.subr.bf16.mxu0 %v1715_v1 }
 0xa47   : > { %1651 = vmatpush3.bf16.msra.mxu0 %v1685_v43 }
 0xa48   : > { %1652 = vmatprep.subr.bf16.mxu0 %v1715_v1  ;;  %v1513_v1 = vld [vmem:[%s2016_s11] ss:$0 sm:$0xff] }
 0xa4b   : > { %1653 = vmatpush3.bf16.msra.mxu0 %v1686_v44 }
 0xace   : > { %v1208_v25 = vpop.xlane.xlu1 %1207 }
 0xacf   : > { %v1210_v26 = vmul.f32 0.03125, %v1208_v25 }
 0xad1   : > { %v1211_v27 = vsub.f32 %v1203_v23, %v1210_v26 }
 0xad3   : > { %v1212_v28 = vmul.f32 %v1211_v27, %v1211_v27 }
 0xad5   : > { %v1213_v29 = vsel %vm506_vm1, %v1212_v28, 0.0 }
 0xad6   : > { %1214 = vadd.xlane.f32.xlu1 %v1213_v29 }
 0xb63   : > { %v1215_v33 = vpop.xlane.xlu1 %1214 }
 0xb64   : > { %v1216_v34 = vmul.f32 0.03125, %v1215_v33 }
 0xb66   : > { %v1217_v35 = vadd.f32 1e-05, %v1216_v34 }
 0xb68   : > { %1703 = vrsqrt.f32 %v1217_v35 }
 0xb72   : > { %v1704_v36 = vpop.eup %1703 }
 0xb73   : > { %v1219_v38 = vmul.f32 %v1704_v36, %v1211_v27 }
 0xb75   : > { %v1226_v40 = vmul.f32 %v1507_v37, %v1219_v38 }
 0xb77   : > { %v1233_v41 = vadd.f32 %v1508_v39, %v1226_v40 }
 0xb79   : > { %v1234_v42 = vpack.c.bf16 %v1233_v41, %v1233_v41 }
 0xb7b   : > { %1643 = vmatmul.mubr.msk.bf16.vlgmr.msra.gmra.mrb[28].mxu1 %vm506_vm1, %v1234_v42 }
 0xc4e   : > { %v1295_v46 = vpop.f32.mrb[28].mxu1 }
 0xc4f   : > { %v1296_v47 = vadd.f32 %v1509_v45, %v1295_v46  ;;  %v1644_v48 = vpop.f32.mrb[29].mxu1 }
 0xc50   : > { %v1298_v49 = vpop.f32.mrb[30].mxu1 }
 0xc51   : > { %v1301_v50 = vmax.f32 %v1296_v47, 0.0  ;;  %v1645_v51 = vpop.f32.mrb[31].mxu1 }
 0xc53   : > { %v1302_v52 = vpack.c.bf16 %v1301_v50, %v1301_v50 }
 0xc55   : > { %1655 = vmatmul.mubr.msk.bf16.vlgmr.msra.gmra.mrb[24].mxu0 %vm1342_vm4, %v1302_v52 }
 0xd28   : > { %v1380_v53 = vpop.f32.mrb[24].mxu0 }
 0xd29   : > { %v1381_v54 = vadd.f32 %v1513_v1, %v1380_v53  ;;  %v1656_v55 = vpop.f32.mrb[25].mxu0 }
 0xd2a   : > { %v1383_v56 = vpop.f32.mrb[26].mxu0 }
 0xd2b   : > { %v1657_v57 = vpop.f32.mrb[27].mxu0  ;;  %v1386_v58 = vadd.f32 %v1381_v54, %v1233_v41 }
 0xd2d   : > { %v1389_v59 = vsel %vm506_vm1, %v1386_v58, 0.0 }
 0xd2e   : > { %1390 = vadd.xlane.f32.xlu1 %v1389_v59 }
 0xdbb   : > { %v1391_v60 = vpop.xlane.xlu1 %1390 }
 0xdbc   : > { %v1392_v61 = vmul.f32 0.03125, %v1391_v60 }
 0xdbe   : > { %v1393_v18 = vsub.f32 %v1386_v58, %v1392_v61 }
 0xdc0   : > { %v1394_v10 = vmul.f32 %v1393_v18, %v1393_v18 }
 0xdc2   : > { %v1395_v62 = vsel %vm506_vm1, %v1394_v10, 0.0 }
 0xdc3   : > { %1396 = vadd.xlane.f32.xlu1 %v1395_v62 }
 0xe50   : > { %v1397_v63 = vpop.xlane.xlu1 %1396 }
 0xe51   : > { %v1398_v0 = vmul.f32 0.03125, %v1397_v63 }
 0xe53   : > { %v1399_v2 = vadd.f32 1e-05, %v1398_v0 }
 0xe55   : > { %1705 = vrsqrt.f32 %v1399_v2 }
 0xe5f   : > { %v1706_v4 = vpop.eup %1705 }
 0xe60   : > { %v1401_v6 = vmul.f32 %v1706_v4, %v1393_v18 }
 0xe62   : > { %v1408_v8 = vmul.f32 %v1519_v5, %v1401_v6 }
 0xe64   : > { %v1415_v9 = vadd.f32 %v1520_v7, %v1408_v8 }
 0xe66   : > { %1416 = vst.msk [vmem:[%s479_s18] sm:$0xff] %vm506_vm1, %v1415_v9 }
 0xe67 PF: > { %s24_s29 = sadd.s32 1, %s1713_s29  }
 0xe68   : > { %p21_p4 = scmp.ge.s32.totalorder %s24_s29, 4  }
 0xe6a   :  { %23 = sbr.rel (!%p21_p4) target bundleno = 1 (0x1), region = 109 }

// kernel: seq2seq_transformer_forward.10
= control target key start
LH: loop header
LB: loop body
LE: loop exit
PB: predicated region body
PF: predicated region fallthrough
CT: control target
= control target key end

     0   :  { %s3538_s0 = inlined_call_operand.vmem [shape: f32[2,8,32], index: 0, kind: input, shape index: {}]   ;;  %s3539_s1 = inlined_call_operand.vmem [shape: f32[2,8,32], index: 1, kind: input, shape index: {}]   ;;  %s3540_s2 = inlined_call_operand.vmem [shape: f32[2,8,8], index: 2, kind: input, shape index: {}]   ;;  %s3541_s3 = inlined_call_operand.vmem [shape: f32[2,8,8], index: 3, kind: input, shape index: {}]   ;;  %s3542_s4 = inlined_call_operand.vmem [shape: bf16[32,96], index: 4, kind: input, shape index: {}]   ;;  %s3543_s5 = inlined_call_operand.vmem [shape: f32[1,96], index: 5, kind: input, shape index: {}]   ;;  %s3544_s6 = inlined_call_operand.vmem [shape: bf16[32,32], index: 6, kind: input, shape index: {}]   ;;  %s3545_s7 = inlined_call_operand.vmem [shape: f32[1,32], index: 7, kind: input, shape index: {}]   ;;  %s3546_s8 = inlined_call_operand.vmem [shape: f32[1,32], index: 8, kind: input, shape index: {}, may-alias: {8,16,22}]   ;;  %s3547_s9 = inlined_call_operand.vmem [shape: f32[1,32], index: 9, kind: input, shape index: {}, may-alias: {9,17,23}]   ;;  %s3548_s10 = inlined_call_operand.vmem [shape: bf16[32,32], index: 10, kind: input, shape index: {}]   ;;  %s3549_s11 = inlined_call_operand.vmem [shape: f32[1,32], index: 11, kind: input, shape index: {}]   ;;  %s3550_s12 = inlined_call_operand.vmem [shape: bf16[32,64], index: 12, kind: input, shape index: {}]   ;;  %s3551_s13 = inlined_call_operand.vmem [shape: f32[1,64], index: 13, kind: input, shape index: {}]   ;;  %s3552_s14 = inlined_call_operand.vmem [shape: bf16[32,32], index: 14, kind: input, shape index: {}]   ;;  %s3553_s15 = inlined_call_operand.vmem [shape: f32[1,32], index: 15, kind: input, shape index: {}]   ;;  %s3554_s16 = inlined_call_operand.vmem [shape: f32[1,32], index: 16, kind: input, shape index: {}, may-alias: {8,16,22}]   ;;  %s3555_s17 = inlined_call_operand.vmem [shape: f32[1,32], index: 17, kind: input, shape index: {}, may-alias: {9,17,23}]   ;;  %s3556_s18 = inlined_call_operand.vmem [shape: bf16[32,64], index: 18, kind: input, shape index: {}]   ;;  %s3557_s19 = inlined_call_operand.vmem [shape: f32[1,64], index: 19, kind: input, shape index: {}]   ;;  %s3558_s20 = inlined_call_operand.vmem [shape: bf16[64,32], index: 20, kind: input, shape index: {}]   ;;  %s3559_s21 = inlined_call_operand.vmem [shape: f32[1,32], index: 21, kind: input, shape index: {}]   ;;  %s3560_s22 = inlined_call_operand.vmem [shape: f32[1,32], index: 22, kind: input, shape index: {}, may-alias: {8,16,22}]   ;;  %s3561_s23 = inlined_call_operand.vmem [shape: f32[1,32], index: 23, kind: input, shape index: {}, may-alias: {9,17,23}]   ;;  %s3562_s24 = inlined_call_operand.vmem [shape: f32[2,8,32], index: 24, kind: output, shape index: {}]  }
   0x1   :  { %3570 = sst [smem:[#allocation2_spill]] %s3538_s0 }
   0x2   :  { %3571 = sst [smem:[#allocation3_spill]] %s3539_s1 }
   0x3   :  { %3572 = sst [smem:[#allocation4_spill]] %s3540_s2 }
   0x4   :  { %3573 = sst [smem:[#allocation5_spill]] %s3541_s3 }
   0x5   :  { %3574 = sst [smem:[#allocation6_spill]] %s3542_s4 }
   0x6   :  { %3575 = sst [smem:[#allocation7_spill]] %s3543_s5  ;;  %s3162_s5 = smov 0  }
   0x7   :  { %3576 = sst [smem:[#allocation8_spill]] %s3544_s6 }
   0x8   :  { %3577 = sst [smem:[#allocation9_spill]] %s3545_s7 }
   0x9   :  { %3578 = sst [smem:[#allocation10_spill]] %s3546_s8 }
   0xa LB: > { %s2626_s26 = sadd.s32 4294967295, %s3022_s5   ;;  %p2630_p0 = scmp.ge.s32.totalorder %s3022_s5, 1  ;;  %s3022_s5 = sphi %s3162_s5, %s34_s5  }
   0xb   : > { %p688_p1 = scmp.lt.s32.totalorder %s3022_s5, 3 }
   0xd   : > { %p689_p2 = pnand %p2630_p0, %p688_p1 }
   0xe   : > { %s3579_s6 = sld [smem:[#allocation6_spill]] (!%p689_p2)  ;;  %v3024_v1 = vmov (!%p689_p2), 0.0   ;;  %vm3025_vm0 = vmmov (!%p689_p2), 0   ;;  %p764_p3 = scmp.lt.s32.totalorder (!%p689_p2), %s2626_s26, 1  ;;  %vm811_vm1 = vcmask (!%p689_p2), 261120   ;;  %vm860_vm2 = vcmask (!%p689_p2), 64512  }
   0xf   : > { %692 = sbr.rel (%p689_p2) target bundleno = 6601 (0x19c9), region = 116  ;;  %2757 = vmatprep.subr.bf16.mxu1 (!%p689_p2), %v3024_v1  ;;  %2771 = vmatprep.subr.bf16.mxu0 (!%p689_p2), %v3024_v1  ;;  %s3580_s3 = sld [smem:[#allocation2_spill]] (!%p689_p2)  ;;  %vm926_vm3 = vcmask (!%p689_p2), 1043456   ;;  %vm2462_vm4 = vcmask (!%p689_p2), 523264  }
  0x10   : > { %2761 = vmatprep.mubr.msk.bf16.mxu1 (!%p689_p2), %vm3025_vm0, %v3024_v1  ;;  %2773 = vmatprep.mubr.msk.bf16.mxu0 (!%p689_p2), %vm3025_vm0, %v3024_v1  ;;  %s3581_s1 = sld [smem:[#allocation7_spill]] (!%p689_p2)  ;;  %s3569_s27 = smov (!%p689_p2), 96  }
  0x11   : > { %s3028_s28 = smov (!%p689_p2), 88   ;;  %s3582_s7 = sld [smem:[#allocation4_spill]] (!%p689_p2) }
  0x12   : > { %s3031_s8 = smov (!%p689_p2), 112   ;;  %s3566_s4 = smov (!%p689_p2), 80  }
  0x13   : > { %s3583_s29 = sld [smem:[#allocation8_spill]] (!%p689_p2) }
  0x14   : > { %v2966_v0 = vld [vmem:[%s3579_s6] sm:$0xff] (!%p689_p2)   ;;  %v2967_v2 = vld [vmem:[%s3579_s6 + $0x8] sm:$0xff] (!%p689_p2)  }
  0x15   : > { %2758 = vmatpush3.bf16.msra.mxu1 (!%p689_p2), %v2966_v0 }
  0x16   : > { %2759 = vmatprep.subr.bf16.mxu1 %v3024_v1  ;;  %s3593_s26 = smov (!%p764_p3, %s2626_s26), 1  ;;  %v2636_v5 = vld [vmem:[%s3581_s1] ss:$0 sm:$0xff]  ;;  %s3035_s1 = smov 48  }
  0x17   : > { %s3183_s0 = sshll.u32 %s3593_s26, 3  ;;  %s3026_s26 = smov 120  }
  0x18   : > { %s767_s25 = scalar_lea.vmem %s3580_s3, %s3183_s0  ;;  %s775_s30 = scalar_lea.vmem %s3582_s7, %s3183_s0 }
  0x19   : > { %2760 = vmatpush3.bf16.msra.mxu1 %v2967_v2  ;;  %v3190_v3 = vld [vmem:[%s767_s25] sm:$0xff]  ;;  %s3029_s3 = smov 64   ;;  %s3030_s25 = smov 56  }
  0x1a   : > { %2765 = vmatprep.subr.bf16.mxu1 %v3024_v1  ;;  %v787_v4 = vpack.c.bf16 %v3190_v3, %v3190_v3  ;;  %v3223_v18 = vld [vmem:[%s775_s30] sm:$0xff]  ;;  %s3036_s30 = smov 40  }
  0x1b   : > { %v971_v54 = vld [vmem:[%s3583_s29] sm:$0xf]  ;;  %v1085_v56 = vld [vmem:[%s3583_s29 + $0x4] sm:$0xf] }
  0x1c   : > { %2762 = vmatmul.mubr.msk.bf16.vlgmr.msra.gmra.mrb[0].mxu1 %vm811_vm1, %v787_v4  ;;  %v1136_v55 = vsel %vm926_vm3, %v971_v54, 0  ;;  %v1090_v57 = vsel %vm926_vm3, %v1085_v56, 0 }
  0x1d   : > { %2767 = vmatprep.mubr.msk.bf16.mxu1 %vm3025_vm0, %v3024_v1 }
  0xef   : > { %v849_v6 = vpop.f32.mrb[0].mxu1 }
  0xf0   : > { %v850_v7 = vadd.f32 %v2636_v5, %v849_v6  ;;  %v2763_v8 = vpop.f32.mrb[1].mxu1 }
  0xf1   : > { %v852_v9 = vpop.f32.mrb[2].mxu1 }
  0xf2   : > { %v3200_v10 = vpack.c.bf16 %v850_v7, %v850_v7  ;;  %v2764_v11 = vpop.f32.mrb[3].mxu1 }
  0xf4   : > { %972 = vrot.lane.b32.xlu1 %v3200_v10, %s3026_s26  ;;  %858 = vrot.lane.b32.xlu0 %v3200_v10, %s3569_s27 }
  0xf8   : > { %974 = vrot.lane.b32.xlu0 %v3200_v10, %s3028_s28 }
 0x166   : > { %v859_v12 = vpop.permute.xlu0 %858  ;;  %v973_v16 = vpop.permute.xlu1 %972 }
 0x167   : > { %v865_v13 = vsel %vm860_vm2, %v859_v12, 0 }
 0x168   : > { %2766 = vmatpush3.bf16.xpose.msra.mxu1 %v865_v13 }
 0x169   : > { %2777 = vmatprep.subr.bf16.mxu1 %v3024_v1 }
 0x16a   : > { %v975_v14 = vpop.permute.xlu0 %974 }
 0x16b   : > { %v980_v15 = vsel %vm860_vm2, %v975_v14, 0 }
 0x16f   : > { %2768 = vmatmul.mubr.msk.bf16.vlgmr.msra.gmra.mrb[4].mxu1 %vm860_vm2, %v3200_v10 }
 0x170   : > { %2778 = vmatpush3.bf16.xpose.msra.mxu1 %v980_v15  ;;  %2779 = vmatprep.mubr.msk.bf16.mxu1 %vm3025_vm0, %v3024_v1 }
 0x171   : > { %2789 = vmatprep.subr.bf16.mxu1 %v3024_v1 }
 0x177   : > { %2780 = vmatmul.mubr.msk.bf16.vlgmr.msra.gmra.mrb[8].mxu1 %vm860_vm2, %v973_v16 }
 0x178   : > { %2791 = vmatprep.mubr.msk.bf16.mxu1 %vm3025_vm0, %v3024_v1  ;;  %2790 = vmatpush3.bf16.msra.mxu1 %v1090_v57 }
 0x179   : > { %2801 = vmatprep.subr.bf16.mxu1 %v3024_v1 }
 0x242   : > { %v901_v17 = vpop.f32.mrb[4].mxu1 }
 0x243   : > { %v907_v19 = vmul.f32 0.35355338, %v901_v17  ;;  %v2769_v20 = vpop.f32.mrb[5].mxu1 }
 0x244   : > { %v904_v21 = vpop.f32.mrb[6].mxu1 }
 0x245   : > { %v2770_v22 = vpop.f32.mrb[7].mxu1  ;;  %v908_v23 = vadd.f32 %v907_v19, %v3223_v18 }
 0x247   : > { %v909_v24 = vsel %vm860_vm2, %v908_v23, -inf }
 0x248   : > { %910 = vmax.xlane.f32.xlu1 %v909_v24 }
 0x24a   : > { %v1016_v25 = vpop.f32.mrb[8].mxu1 }
 0x24b   : > { %v1022_v26 = vmul.f32 0.35355338, %v1016_v25  ;;  %v2781_v27 = vpop.f32.mrb[9].mxu1 }
 0x24c   : > { %v1019_v28 = vpop.f32.mrb[10].mxu1 }
 0x24d   : > { %v2782_v29 = vpop.f32.mrb[11].mxu1  ;;  %v1023_v30 = vadd.f32 %v1022_v26, %v3223_v18 }
 0x24f   : > { %v1024_v31 = vsel %vm860_vm2, %v1023_v30, -inf }
 0x250   : > { %1025 = vmax.xlane.f32.xlu0 %v1024_v31 }
 0x2d5   : > { %v911_v32 = vpop.xlane.xlu1 %910 }
 0x2d6   : > { %v912_v33 = vsub.f32 %v908_v23, %v911_v32 }
 0x2d8   : > { %v913_v34 = vmul.f32 1.442695, %v912_v33 }
 0x2da   : > { %2978 = vpow2.f32 %v913_v34 }
 0x2dd   : > { %v1026_v35 = vpop.xlane.xlu0 %1025 }
 0x2de   : > { %v1027_v36 = vsub.f32 %v1023_v30, %v1026_v35 }
 0x2e0   : > { %v1028_v37 = vmul.f32 1.442695, %v1027_v36 }
 0x2e2   : > { %2980 = vpow2.f32 %v1028_v37 }
 0x2e4   : > { %v2979_v38 = vpop.eup %2978 }
 0x2e5   : > { %v915_v39 = vsel %vm860_vm2, %v2979_v38, 0.0 }
 0x2e6   : > { %916 = vadd.xlane.f32.xlu0 %v915_v39 }
 0x2ec   : > { %v2981_v40 = vpop.eup %2980 }
 0x2ed   : > { %v1030_v41 = vsel %vm860_vm2, %v2981_v40, 0.0 }
 0x2ee   : > { %1031 = vadd.xlane.f32.xlu1 %v1030_v41  ;;  %v1291_v41 = vld [vmem:[%s3583_s29 + $0x8] sm:$0xf] }
 0x2fc   : > { %921 = vrot.lane.b32.xlu0 %v3200_v10, %s3029_s3  ;;  %s3565_s3 = smov 72  }
 0x2ff   : > { %1036 = vrot.lane.b32.xlu1 %v3200_v10, %s3030_s25  ;;  %s3567_s25 = smov 104  }
 0x300   : > { %1178 = vrot.lane.b32.xlu0 %v3200_v10, %s3031_s8 }
 0x303   : > { %1180 = vrot.lane.b32.xlu1 %v3200_v10, %s3566_s4  ;;  %s783_s4 = scalar_lea.vmem %s3562_s24, %s3183_s0 }
 0x373   : > { %v917_v42 = vpop.xlane.xlu0 %916 }
 0x374   : > { %2982 = vrcp.f32 %v917_v42  ;;  %v1296_v42 = vsel %vm926_vm3, %v1291_v41, 0  ;;  %v2654_v41 = vld [vmem:[%s3547_s9] ss:$0 sm:$0xff] }
 0x377   : > { %v922_v43 = vpop.permute.xlu0 %921 }
 0x378   : > { %v928_v44 = vsel %vm926_vm3, %v922_v43, 0 }
 0x379   : > { %2772 = vmatpush3.bf16.msra.mxu0 %v928_v44 }
 0x37a   : > { %2783 = vmatprep.subr.bf16.mxu0 %v3024_v1 }
 0x37b   : > { %v1032_v45 = vpop.xlane.xlu1 %1031  ;;  %v1179_v8 = vpop.permute.xlu0 %1178 }
 0x37c   : > { %2984 = vrcp.f32 %v1032_v45 }
 0x37e   : > { %v2983_v46 = vpop.eup %2982 }
 0x37f   : > { %v919_v47 = vmul.f32 %v2983_v46, %v2979_v38  ;;  %v1037_v48 = vpop.permute.xlu1 %1036 }
 0x380   : > { %v1042_v50 = vsel %vm926_vm3, %v1037_v48, 0 }
 0x381   : > { %v920_v49 = vpack.c.bf16 %v919_v47, %v919_v47 }
 0x383   : > { %2774 = vmatmul.mubr.msk.bf16.vlgmr.msra.gmra.mrb[0].mxu0 %vm860_vm2, %v920_v49  ;;  %v1181_v63 = vpop.permute.xlu1 %1180 }
 0x384   : > { %2784 = vmatpush3.bf16.msra.mxu0 %v1042_v50  ;;  %2785 = vmatprep.mubr.msk.bf16.mxu0 %vm3025_vm0, %v3024_v1  ;;  %v1186_v6 = vsel %vm860_vm2, %v1181_v63, 0 }
 0x385   : > { %2795 = vmatprep.subr.bf16.mxu0 %v3024_v1 }
 0x386   : > { %v2985_v51 = vpop.eup %2984 }
 0x387   : > { %v1034_v52 = vmul.f32 %v2985_v51, %v2981_v40 }
 0x389   : > { %v1035_v53 = vpack.c.bf16 %v1034_v52, %v1034_v52 }
 0x38b   : > { %2786 = vmatmul.mubr.msk.bf16.vlgmr.msra.gmra.mrb[4].mxu0 %vm860_vm2, %v1035_v53 }
 0x38c   : > { %2797 = vmatprep.mubr.msk.bf16.mxu0 %vm3025_vm0, %v3024_v1  ;;  %2796 = vmatpush3.bf16.msra.mxu0 %v1136_v55 }
 0x38d   : > { %2807 = vmatprep.subr.bf16.mxu0 %v3024_v1 }
 0x456   : > { %v964_v58 = vpop.f32.mrb[0].mxu0 }
 0x457   : > { %v970_v59 = vpack.c.bf16 %v964_v58, %v964_v58  ;;  %v2775_v60 = vpop.f32.mrb[1].mxu0 }
 0x458   : > { %v967_v61 = vpop.f32.mrb[2].mxu0 }
 0x459   : > { %v2776_v62 = vpop.f32.mrb[3].mxu0  ;;  %2798 = vmatmul.mubr.msk.bf16.vlgmr.msra.gmra.mrb[8].mxu0 %vm860_vm2, %v970_v59 }
 0x45a   : > { %2809 = vmatprep.mubr.msk.bf16.mxu0 %vm3025_vm0, %v3024_v1 }
 0x45e   : > { %v1078_v0 = vpop.f32.mrb[4].mxu0 }
 0x45f   : > { %v1084_v2 = vpack.c.bf16 %v1078_v0, %v1078_v0  ;;  %v2787_v4 = vpop.f32.mrb[5].mxu0 }
 0x460   : > { %v1081_v5 = vpop.f32.mrb[6].mxu0 }
 0x461   : > { %v2788_v7 = vpop.f32.mrb[7].mxu0  ;;  %2792 = vmatmul.mubr.msk.bf16.vlgmr.msra.gmra.mrb[12].mxu1 %vm860_vm2, %v1084_v2 }
 0x462   : > { %2802 = vmatpush3.bf16.xpose.msra.mxu1 %v1186_v6  ;;  %2803 = vmatprep.mubr.msk.bf16.mxu1 %vm3025_vm0, %v3024_v1  ;;  %v1452_v7 = vld [vmem:[%s3583_s29 + $0xc] sm:$0xf] }
 0x463   : > { %2813 = vmatprep.subr.bf16.mxu1 %v3024_v1 }
 0x469   : > { %2804 = vmatmul.mubr.msk.bf16.vlgmr.msra.gmra.mrb[16].mxu1 %vm860_vm2, %v1179_v8  ;;  %v1457_v8 = vsel %vm926_vm3, %v1452_v7, 0 }
 0x46a   : > { %2815 = vmatprep.mubr.msk.bf16.mxu1 %vm3025_vm0, %v3024_v1  ;;  %2814 = vmatpush3.bf16.msra.mxu1 %v1296_v42 }
 0x46b   : > { %2825 = vmatprep.subr.bf16.mxu1 %v3024_v1 }
 0x52c   : > { %v1172_v9 = vpop.f32.mrb[8].mxu0 }
 0x52d   : > { %v2799_v11 = vpop.f32.mrb[9].mxu0 }
 0x52e   : > { %v1175_v12 = vpop.f32.mrb[10].mxu0 }
 0x52f   : > { %v2800_v13 = vpop.f32.mrb[11].mxu0 }
 0x534   : > { %v1126_v14 = vpop.f32.mrb[12].mxu1 }
 0x535   : > { %v3268_v15 = vadd.f32 %v1172_v9, %v1126_v14  ;;  %v2793_v16 = vpop.f32.mrb[13].mxu1 }
 0x536   : > { %v1129_v17 = vpop.f32.mrb[14].mxu1 }
 0x537   : > { %v2794_v19 = vpop.f32.mrb[15].mxu1 }
 0x53c   : > { %v1222_v20 = vpop.f32.mrb[16].mxu1 }
 0x53d   : > { %v1228_v21 = vmul.f32 0.35355338, %v1222_v20  ;;  %v2805_v22 = vpop.f32.mrb[17].mxu1 }
 0x53e   : > { %v1225_v23 = vpop.f32.mrb[18].mxu1 }
 0x53f   : > { %v2806_v24 = vpop.f32.mrb[19].mxu1  ;;  %v1229_v25 = vadd.f32 %v1228_v21, %v3223_v18 }
 0x541   : > { %v1230_v26 = vsel %vm860_vm2, %v1229_v25, -inf }
 0x542   : > { %1231 = vmax.xlane.f32.xlu1 %v1230_v26 }
 0x553   : > { %1341 = vrot.lane.b32.xlu1 %v3200_v10, %s3565_s3  ;;  %s3586_s3 = sld [smem:[#allocation10_spill]] }
 0x557   : > { %1339 = vrot.lane.b32.xlu1 %v3200_v10, %s3567_s25  ;;  %s3585_s25 = sld [smem:[#allocation3_spill]] }
 0x55d   : > { %s771_s27 = scalar_lea.vmem %s3585_s25, %s3183_s0  ;;  %s3587_s25 = sld [smem:[#allocation5_spill]] }
 0x563   : > { %s779_s2 = scalar_lea.vmem %s3587_s25, %s3183_s0  ;;  %s3591_s25 = smov 72  }
 0x5cf   : > { %v1232_v27 = vpop.xlane.xlu1 %1231 }
 0x5d0   : > { %v1233_v28 = vsub.f32 %v1229_v25, %v1232_v27 }
 0x5d2   : > { %v1234_v29 = vmul.f32 1.442695, %v1233_v28 }
 0x5d3   : > { %v1342_v37 = vpop.permute.xlu1 %1341 }
 0x5d4   : > { %2986 = vpow2.f32 %v1234_v29  ;;  %v1347_v39 = vsel %vm860_vm2, %v1342_v37, 0 }
 0x5d7   : > { %v1340_v40 = vpop.permute.xlu1 %1339 }
 0x5de   : > { %v2987_v30 = vpop.eup %2986 }
 0x5df   : > { %v1236_v31 = vsel %vm860_vm2, %v2987_v30, 0.0 }
 0x5e0   : > { %1237 = vadd.xlane.f32.xlu0 %v1236_v31  ;;  %v786_v31 = vld [vmem:[%s771_s27] sm:$0xff]  ;;  %s3590_s27 = smov 80  }
 0x5f6   : > { %1242 = vrot.lane.b32.xlu0 %v3200_v10, %s3035_s1  ;;  %s3584_s1 = sld [smem:[#allocation9_spill]] }
 0x5fc   : > { %v2652_v16 = vld [vmem:[%s3584_s1] ss:$0 sm:$0xff]  ;;  %s3589_s1 = smov 104  }
 0x66d   : > { %v1238_v32 = vpop.xlane.xlu0 %1237 }
 0x66e   : > { %2988 = vrcp.f32 %v1238_v32  ;;  %v1606_v32 = vpack.c.bf16 %v786_v31, %v786_v31 }
 0x671   : > { %v1243_v33 = vpop.permute.xlu0 %1242 }
 0x672   : > { %v1248_v34 = vsel %vm926_vm3, %v1243_v33, 0  ;;  %v2970_v33 = vld [vmem:[%s3548_s10] sm:$0xff]  }
 0x673   : > { %2808 = vmatpush3.bf16.msra.mxu0 %v1248_v34  ;;  %v2971_v34 = vld [vmem:[%s3548_s10 + $0x8] sm:$0xff]  }
 0x674   : > { %2819 = vmatprep.subr.bf16.mxu0 %v3024_v1 }
 0x678   : > { %v2989_v35 = vpop.eup %2988 }
 0x679   : > { %v1240_v36 = vmul.f32 %v2989_v35, %v2987_v30  ;;  %v2968_v30 = vld [vmem:[%s3550_s12] sm:$0xff]  }
 0x67b   : > { %v1241_v38 = vpack.c.bf16 %v1240_v36, %v1240_v36 }
 0x67d   : > { %2810 = vmatmul.mubr.msk.bf16.vlgmr.msra.gmra.mrb[12].mxu0 %vm860_vm2, %v1241_v38 }
 0x67e   : > { %2820 = vmatpush3.bf16.xpose.msra.mxu0 %v1347_v39  ;;  %2821 = vmatprep.mubr.msk.bf16.mxu0 %vm3025_vm0, %v3024_v1  ;;  %v2653_v39 = vld [vmem:[%s3586_s3] ss:$0 sm:$0xff] }
 0x67f   : > { %2831 = vmatprep.subr.bf16.mxu0 %v3024_v1 }
 0x685   : > { %2822 = vmatmul.mubr.msk.bf16.vlgmr.msra.gmra.mrb[16].mxu0 %vm860_vm2, %v1340_v40 }
 0x686   : > { %2833 = vmatprep.mubr.msk.bf16.mxu0 %vm3025_vm0, %v3024_v1  ;;  %2832 = vmatpush3.bf16.msra.mxu0 %v1457_v8 }
 0x687   : > { %2845 = vmatprep.subr.bf16.mxu0 %v3024_v1 }
 0x750   : > { %v1284_v43 = vpop.f32.mrb[12].mxu0 }
 0x751   : > { %v1290_v44 = vpack.c.bf16 %v1284_v43, %v1284_v43  ;;  %v2811_v45 = vpop.f32.mrb[13].mxu0 }
 0x752   : > { %v1287_v46 = vpop.f32.mrb[14].mxu0  ;;  %v2659_v45 = vld [vmem:[%s3551_s13] ss:$0 sm:$0xff] }
 0x753   : > { %v2812_v47 = vpop.f32.mrb[15].mxu0  ;;  %2816 = vmatmul.mubr.msk.bf16.vlgmr.msra.gmra.mrb[20].mxu1 %vm860_vm2, %v1290_v44 }
 0x754   : > { %2827 = vmatprep.mubr.msk.bf16.mxu1 %vm3025_vm0, %v3024_v1 }
 0x758   : > { %v1383_v48 = vpop.f32.mrb[16].mxu0 }
 0x759   : > { %v1389_v49 = vmul.f32 0.35355338, %v1383_v48  ;;  %v2823_v50 = vpop.f32.mrb[17].mxu0 }
 0x75a   : > { %v1386_v51 = vpop.f32.mrb[18].mxu0 }
 0x75b   : > { %v2824_v52 = vpop.f32.mrb[19].mxu0  ;;  %v1390_v53 = vadd.f32 %v1389_v49, %v3223_v18 }
 0x75d   : > { %v1391_v54 = vsel %vm860_vm2, %v1390_v53, -inf }
 0x75e   : > { %1392 = vmax.xlane.f32.xlu0 %v1391_v54 }
 0x774   : > { %1403 = vrot.lane.b32.xlu0 %v3200_v10, %s3036_s30 }
 0x7eb   : > { %v1393_v55 = vpop.xlane.xlu0 %1392 }
 0x7ec   : > { %v1394_v56 = vsub.f32 %v1390_v53, %v1393_v55  ;;  %v2655_v53 = vld [vmem:[%s3549_s11] ss:$0 sm:$0xff] }
 0x7ee   : > { %v1395_v57 = vmul.f32 1.442695, %v1394_v56 }
 0x7ef   : > { %v1404_v58 = vpop.permute.xlu0 %1403 }
 0x7f0   : > { %2990 = vpow2.f32 %v1395_v57  ;;  %v1409_v59 = vsel %vm926_vm3, %v1404_v58, 0 }
 0x7f1   : > { %2826 = vmatpush3.bf16.msra.mxu1 %v1409_v59 }
 0x7f2   : > { %2837 = vmatprep.subr.bf16.mxu1 %v3024_v1 }
 0x7fa   : > { %v2991_v60 = vpop.eup %2990 }
 0x7fb   : > { %v1397_v61 = vsel %vm860_vm2, %v2991_v60, 0.0 }
 0x7fc   : > { %1398 = vadd.xlane.f32.xlu1 %v1397_v61 }
 0x826   : > { %v1332_v18 = vpop.f32.mrb[20].mxu1 }
 0x827   : > { %v1338_v62 = vadd.f32 %v1332_v18, %v3268_v15  ;;  %v2817_v63 = vpop.f32.mrb[21].mxu1 }
 0x828   : > { %v1335_v0 = vpop.f32.mrb[22].mxu1  ;;  %v3386_v63 = vld [vmem:[%s779_s2] sm:$0xff] }
 0x829   : > { %v2818_v10 = vpop.f32.mrb[23].mxu1 }
 0x889   : > { %v1399_v2 = vpop.xlane.xlu1 %1398 }
 0x88a   : > { %2992 = vrcp.f32 %v1399_v2 }
 0x894   : > { %v2993_v4 = vpop.eup %2992 }
 0x895   : > { %v1401_v5 = vmul.f32 %v2993_v4, %v2991_v60 }
 0x897   : > { %v1402_v6 = vpack.c.bf16 %v1401_v5, %v1401_v5 }
 0x899   : > { %2828 = vmatmul.mubr.msk.bf16.vlgmr.msra.gmra.mrb[24].mxu1 %vm860_vm2, %v1402_v6 }
 0x89a   : > { %2841 = vmatprep.mubr.msk.bf16.mxu1 %vm3025_vm0, %v3024_v1  ;;  %2838 = vmatpush3.bf16.msra.mxu1 %v2970_v33 }
 0x89b   : > { %2839 = vmatprep.subr.bf16.mxu1 %v3024_v1 }
 0x89e   : > { %2840 = vmatpush3.bf16.msra.mxu1 %v2971_v34 }
 0x89f   : > { %2853 = vmatprep.subr.bf16.mxu1 %v3024_v1 }
 0x96c   : > { %v1445_v9 = vpop.f32.mrb[24].mxu1 }
 0x96d   : > { %v1451_v11 = vpack.c.bf16 %v1445_v9, %v1445_v9  ;;  %v2829_v12 = vpop.f32.mrb[25].mxu1 }
 0x96e   : > { %v1448_v13 = vpop.f32.mrb[26].mxu1 }
 0x96f   : > { %v2830_v14 = vpop.f32.mrb[27].mxu1  ;;  %2834 = vmatmul.mubr.msk.bf16.vlgmr.msra.gmra.mrb[20].mxu0 %vm860_vm2, %v1451_v11 }
 0x970   : > { %2849 = vmatprep.mubr.msk.bf16.mxu0 %vm3025_vm0, %v3024_v1  ;;  %2846 = vmatpush3.bf16.msra.mxu0 %v2968_v30 }
 0x971   : > { %2847 = vmatprep.subr.bf16.mxu0 %v3024_v1 }
 0xa42   : > { %v1493_v15 = vpop.f32.mrb[20].mxu0 }
 0xa43   : > { %v1499_v17 = vadd.f32 %v1493_v15, %v1338_v62  ;;  %v2835_v19 = vpop.f32.mrb[21].mxu0 }
 0xa44   : > { %v1496_v20 = vpop.f32.mrb[22].mxu0 }
 0xa45   : > { %v1507_v21 = vadd.f32 %v2652_v16, %v1499_v17  ;;  %v2836_v22 = vpop.f32.mrb[23].mxu0 }
 0xa47   : > { %v1508_v23 = vadd.f32 %v1507_v21, %v3190_v3  ;;  %v2969_v3 = vld [vmem:[%s3550_s12 + $0x8] sm:$0xff]  }
 0xa48   : > { %2848 = vmatpush3.bf16.msra.mxu0 %v2969_v3 }
 0xa49   : > { %v1511_v24 = vsel %vm811_vm1, %v1508_v23, 0.0  ;;  %2859 = vmatprep.subr.bf16.mxu0 %v3024_v1 }
 0xa4a   : > { %1512 = vadd.xlane.f32.xlu1 %v1511_v24 }
 0xa4b   : > { %2850 = vmatmul.mubr.msk.bf16.vlgmr.msra.gmra.mrb[24].mxu0 %vm811_vm1, %v1606_v32 }
 0xa4c   : > { %2861 = vmatprep.mubr.msk.bf16.mxu0 %vm3025_vm0, %v3024_v1 }
 0xad7   : > { %v1513_v25 = vpop.xlane.xlu1 %1512 }
 0xad8   : > { %v1515_v26 = vmul.f32 0.03125, %v1513_v25 }
 0xada   : > { %v1516_v27 = vsub.f32 %v1508_v23, %v1515_v26 }
 0xadc   : > { %v1517_v28 = vmul.f32 %v1516_v27, %v1516_v27 }
 0xade   : > { %v1518_v29 = vsel %vm811_vm1, %v1517_v28, 0.0 }
 0xadf   : > { %1519 = vadd.xlane.f32.xlu1 %v1518_v29 }
 0xb1e   : > { %v1667_v46 = vpop.f32.mrb[24].mxu0 }
 0xb1f   : > { %v1668_v47 = vadd.f32 %v2659_v45, %v1667_v46  ;;  %v2851_v48 = vpop.f32.mrb[25].mxu0 }
 0xb20   : > { %v1670_v49 = vpop.f32.mrb[26].mxu0 }
 0xb21   : > { %v3359_v50 = vpack.c.bf16 %v1668_v47, %v1668_v47  ;;  %v2852_v51 = vpop.f32.mrb[27].mxu0 }
 0xb23   : > { %1790 = vrot.lane.b32.xlu1 %v3359_v50, %s3026_s26  ;;  %v1680_v52 = vsel %vm860_vm2, %v3359_v50, 0 }
 0xb6c   : > { %v1520_v35 = vpop.xlane.xlu1 %1519 }
 0xb6d   : > { %v1521_v36 = vmul.f32 0.03125, %v1520_v35 }
 0xb6f   : > { %v1522_v37 = vadd.f32 1e-05, %v1521_v36 }
 0xb71   : > { %2994 = vrsqrt.f32 %v1522_v37  ;;  %v1786_v37 = vld [vmem:[%s3552_s14] sm:$0xf] }
 0xb7b   : > { %v2995_v38 = vpop.eup %2994 }
 0xb7c   : > { %v1524_v40 = vmul.f32 %v2995_v38, %v1516_v27  ;;  %v1952_v38 = vsel %vm926_vm3, %v1786_v37, 0 }
 0xb7e   : > { %v1531_v42 = vmul.f32 %v2653_v39, %v1524_v40  ;;  %v1901_v39 = vld [vmem:[%s3552_s14 + $0x4] sm:$0xf] }
 0xb7f   : > { %v1906_v40 = vsel %vm926_vm3, %v1901_v39, 0 }
 0xb80   : > { %v3349_v43 = vadd.f32 %v2654_v41, %v1531_v42 }
 0xb82   : > { %v1539_v44 = vpack.c.bf16 %v3349_v43, %v3349_v43 }
 0xb84   : > { %2842 = vmatmul.mubr.msk.bf16.vlgmr.msra.gmra.mrb[28].mxu1 %vm811_vm1, %v1539_v44 }
 0xb85   : > { %2855 = vmatprep.mubr.msk.bf16.mxu1 %vm3025_vm0, %v3024_v1  ;;  %2854 = vmatpush3.bf16.xpose.msra.mxu1 %v1680_v52 }
 0xb86   : > { %2865 = vmatprep.subr.bf16.mxu1 %v3024_v1 }
 0xb95   : > { %v1791_v55 = vpop.permute.xlu1 %1790 }
 0xb96   : > { %v1796_v61 = vsel %vm860_vm2, %v1791_v55, 0 }
 0xc57   : > { %v1600_v54 = vpop.f32.mrb[28].mxu1 }
 0xc58   : > { %v1601_v56 = vadd.f32 %v2655_v53, %v1600_v54  ;;  %v2843_v57 = vpop.f32.mrb[29].mxu1 }
 0xc59   : > { %v1603_v58 = vpop.f32.mrb[30].mxu1 }
 0xc5a   : > { %v3369_v59 = vpack.c.bf16 %v1601_v56, %v1601_v56  ;;  %v2844_v60 = vpop.f32.mrb[31].mxu1 }
 0xc5c   : > { %1788 = vrot.lane.b32.xlu0 %v3369_v59, %s3026_s26  ;;  %2856 = vmatmul.mubr.msk.bf16.vlgmr.msra.gmra.mrb[32].mxu1 %vm860_vm2, %v3369_v59  ;;  %s3588_s26 = smov 96  }
 0xc5d   : > { %2866 = vmatpush3.bf16.xpose.msra.mxu1 %v1796_v61  ;;  %2867 = vmatprep.mubr.msk.bf16.mxu1 %vm3025_vm0, %v3024_v1 }
 0xc5e   : > { %2877 = vmatprep.subr.bf16.mxu1 %v3024_v1 }
 0xcce   : > { %v1789_v18 = vpop.permute.xlu0 %1788 }
 0xccf   : > { %2868 = vmatmul.mubr.msk.bf16.vlgmr.msra.gmra.mrb[36].mxu1 %vm860_vm2, %v1789_v18 }
 0xcd0   : > { %2879 = vmatprep.mubr.msk.bf16.mxu1 %vm3025_vm0, %v3024_v1  ;;  %2878 = vmatpush3.bf16.msra.mxu1 %v1906_v40 }
 0xcd1   : > { %2889 = vmatprep.subr.bf16.mxu1 %v3024_v1 }
 0xd2f   : > { %v1716_v62 = vpop.f32.mrb[32].mxu1 }
 0xd30   : > { %v1722_v0 = vmul.f32 0.35355338, %v1716_v62  ;;  %v2857_v10 = vpop.f32.mrb[33].mxu1 }
 0xd31   : > { %v1719_v2 = vpop.f32.mrb[34].mxu1 }
 0xd32   : > { %v2858_v4 = vpop.f32.mrb[35].mxu1  ;;  %v1723_v5 = vadd.f32 %v1722_v0, %v3386_v63 }
 0xd34   : > { %v1724_v6 = vsel %vm860_vm2, %v1723_v5, -inf }
 0xd35   : > { %1725 = vmax.xlane.f32.xlu0 %v1724_v6 }
 0xda2   : > { %v1832_v7 = vpop.f32.mrb[36].mxu1 }
 0xda3   : > { %v1838_v8 = vmul.f32 0.35355338, %v1832_v7  ;;  %v2869_v9 = vpop.f32.mrb[37].mxu1 }
 0xda4   : > { %v1835_v11 = vpop.f32.mrb[38].mxu1 }
 0xda5   : > { %v2870_v12 = vpop.f32.mrb[39].mxu1  ;;  %v1839_v13 = vadd.f32 %v1838_v8, %v3386_v63 }
 0xda7   : > { %v1840_v14 = vsel %vm860_vm2, %v1839_v13, -inf }
 0xda8   : > { %1841 = vmax.xlane.f32.xlu1 %v1840_v14 }
 0xdb9   : > { %1852 = vrot.lane.b32.xlu1 %v3359_v50, %s3028_s28 }
 0xdbd   : > { %1996 = vrot.lane.b32.xlu1 %v3359_v50, %s3031_s8 }
 0xdc2   : > { %v1726_v15 = vpop.xlane.xlu0 %1725 }
 0xdc3   : > { %v1727_v16 = vsub.f32 %v1723_v5, %v1726_v15 }
 0xdc5   : > { %v1728_v17 = vmul.f32 1.442695, %v1727_v16 }
 0xdc7   : > { %2996 = vpow2.f32 %v1728_v17 }
 0xdd1   : > { %v2997_v19 = vpop.eup %2996 }
 0xdd2   : > { %v1730_v20 = vsel %vm860_vm2, %v2997_v19, 0.0 }
 0xdd3   : > { %1731 = vadd.xlane.f32.xlu0 %v1730_v20 }
 0xe35   : > { %v1842_v21 = vpop.xlane.xlu1 %1841 }
 0xe36   : > { %v1843_v22 = vsub.f32 %v1839_v13, %v1842_v21 }
 0xe38   : > { %v1844_v23 = vmul.f32 1.442695, %v1843_v22 }
 0xe39   : > { %v1853_v31 = vpop.permute.xlu1 %1852 }
 0xe3a   : > { %2998 = vpow2.f32 %v1844_v23  ;;  %v1858_v33 = vsel %vm926_vm3, %v1853_v31, 0 }
 0xe3d   : > { %v1997_v47 = vpop.permute.xlu1 %1996 }
 0xe3e   : > { %v2002_v53 = vsel %vm860_vm2, %v1997_v47, 0 }
 0xe44   : > { %v2999_v24 = vpop.eup %2998 }
 0xe45   : > { %v1846_v25 = vsel %vm860_vm2, %v2999_v24, 0.0 }
 0xe46   : > { %1847 = vadd.xlane.f32.xlu0 %v1846_v25  ;;  %v2107_v25 = vld [vmem:[%s3552_s14 + $0x8] sm:$0xf] }
 0xe5c   : > { %1737 = vrot.lane.b32.xlu0 %v3359_v50, %s3588_s26 }
 0xe60   : > { %1994 = vrot.lane.b32.xlu0 %v3369_v59, %s3031_s8  ;;  %v1732_v26 = vpop.xlane.xlu0 %1731 }
 0xe61   : > { %3000 = vrcp.f32 %v1732_v26  ;;  %v2112_v26 = vsel %vm926_vm3, %v2107_v25, 0 }
 0xe6b   : > { %v3001_v27 = vpop.eup %3000 }
 0xe6c   : > { %v1734_v29 = vmul.f32 %v3001_v27, %v2997_v19 }
 0xe6e   : > { %v1735_v32 = vpack.c.bf16 %v1734_v29, %v1734_v29 }
 0xed3   : > { %v1848_v28 = vpop.xlane.xlu0 %1847 }
 0xed4   : > { %3002 = vrcp.f32 %v1848_v28 }
 0xed7   : > { %v1738_v30 = vpop.permute.xlu0 %1737 }
 0xed8   : > { %v1743_v3 = vsel %vm926_vm3, %v1738_v30, 0 }
 0xed9   : > { %2860 = vmatpush3.bf16.msra.mxu0 %v1743_v3 }
 0xeda   : > { %2871 = vmatprep.subr.bf16.mxu0 %v3024_v1 }
 0xedb   : > { %v1995_v55 = vpop.permute.xlu0 %1994 }
 0xedc   : > { %2862 = vmatmul.mubr.msk.bf16.vlgmr.msra.gmra.mrb[28].mxu0 %vm860_vm2, %v1735_v32 }
 0xedd   : > { %2872 = vmatpush3.bf16.msra.mxu0 %v1858_v33  ;;  %2873 = vmatprep.mubr.msk.bf16.mxu0 %vm3025_vm0, %v3024_v1 }
 0xede   : > { %v3003_v34 = vpop.eup %3002  ;;  %2883 = vmatprep.subr.bf16.mxu0 %v3024_v1 }
 0xedf   : > { %v1850_v35 = vmul.f32 %v3003_v34, %v2999_v24 }
 0xee1   : > { %v1851_v36 = vpack.c.bf16 %v1850_v35, %v1850_v35 }
 0xee4   : > { %2874 = vmatmul.mubr.msk.bf16.vlgmr.msra.gmra.mrb[32].mxu0 %vm860_vm2, %v1851_v36 }
 0xee5   : > { %2885 = vmatprep.mubr.msk.bf16.mxu0 %vm3025_vm0, %v3024_v1  ;;  %2884 = vmatpush3.bf16.msra.mxu0 %v1952_v38 }
 0xee6   : > { %2895 = vmatprep.subr.bf16.mxu0 %v3024_v1 }
 0xfaf   : > { %v1779_v41 = vpop.f32.mrb[28].mxu0 }
 0xfb0   : > { %v1785_v42 = vpack.c.bf16 %v1779_v41, %v1779_v41  ;;  %v2863_v44 = vpop.f32.mrb[29].mxu0 }
 0xfb1   : > { %v1782_v45 = vpop.f32.mrb[30].mxu0 }
 0xfb2   : > { %v2864_v46 = vpop.f32.mrb[31].mxu0  ;;  %2886 = vmatmul.mubr.msk.bf16.vlgmr.msra.gmra.mrb[36].mxu0 %vm860_vm2, %v1785_v42 }
 0xfb3   : > { %2897 = vmatprep.mubr.msk.bf16.mxu0 %vm3025_vm0, %v3024_v1 }
 0xfb7   : > { %v1894_v48 = vpop.f32.mrb[32].mxu0 }
 0xfb8   : > { %v1900_v49 = vpack.c.bf16 %v1894_v48, %v1894_v48  ;;  %v2875_v51 = vpop.f32.mrb[33].mxu0 }
 0xfb9   : > { %v1897_v52 = vpop.f32.mrb[34].mxu0 }
 0xfba   : > { %v2876_v54 = vpop.f32.mrb[35].mxu0  ;;  %2880 = vmatmul.mubr.msk.bf16.vlgmr.msra.gmra.mrb[40].mxu1 %vm860_vm2, %v1900_v49 }
 0xfbb   : > { %2890 = vmatpush3.bf16.xpose.msra.mxu1 %v2002_v53  ;;  %2891 = vmatprep.mubr.msk.bf16.mxu1 %vm3025_vm0, %v3024_v1  ;;  %v2268_v54 = vld [vmem:[%s3552_s14 + $0xc] sm:$0xf] }
 0xfbc   : > { %2901 = vmatprep.subr.bf16.mxu1 %v3024_v1 }
 0xfc2   : > { %2892 = vmatmul.mubr.msk.bf16.vlgmr.msra.gmra.mrb[44].mxu1 %vm860_vm2, %v1995_v55  ;;  %v2273_v55 = vsel %vm926_vm3, %v2268_v54, 0  ;;  %v2689_v54 = vld [vmem:[%s3561_s23] ss:$0 sm:$0xff] }
 0xfc3   : > { %2903 = vmatprep.mubr.msk.bf16.mxu1 %vm3025_vm0, %v3024_v1  ;;  %2902 = vmatpush3.bf16.msra.mxu1 %v2112_v26 }
 0xfc4   : > { %2913 = vmatprep.subr.bf16.mxu1 %v3024_v1 }
0x1085   : > { %v1988_v56 = vpop.f32.mrb[36].mxu0 }
0x1086   : > { %v2887_v57 = vpop.f32.mrb[37].mxu0 }
0x1087   : > { %v1991_v58 = vpop.f32.mrb[38].mxu0 }
0x1088   : > { %v2888_v60 = vpop.f32.mrb[39].mxu0 }
0x108d   : > { %v1942_v61 = vpop.f32.mrb[40].mxu1 }
0x108e   : > { %v3433_v18 = vadd.f32 %v1988_v56, %v1942_v61  ;;  %v2881_v62 = vpop.f32.mrb[41].mxu1 }
0x108f   : > { %v1945_v0 = vpop.f32.mrb[42].mxu1  ;;  %v2675_v62 = vld [vmem:[%s3553_s15] ss:$0 sm:$0xff] }
0x1090   : > { %v2882_v10 = vpop.f32.mrb[43].mxu1 }
0x1095   : > { %v2038_v2 = vpop.f32.mrb[44].mxu1 }
0x1096   : > { %v2044_v4 = vmul.f32 0.35355338, %v2038_v2  ;;  %v2893_v5 = vpop.f32.mrb[45].mxu1 }
0x1097   : > { %v2041_v6 = vpop.f32.mrb[46].mxu1 }
0x1098   : > { %v2894_v7 = vpop.f32.mrb[47].mxu1  ;;  %v2045_v8 = vadd.f32 %v2044_v4, %v3386_v63 }
0x109a   : > { %v2046_v9 = vsel %vm860_vm2, %v2045_v8, -inf }
0x109b   : > { %2047 = vmax.xlane.f32.xlu1 %v2046_v9 }
0x10ac   : > { %2157 = vrot.lane.b32.xlu1 %v3359_v50, %s3589_s1 }
0x10b0   : > { %2155 = vrot.lane.b32.xlu1 %v3369_v59, %s3589_s1 }
0x1128   : > { %v2048_v11 = vpop.xlane.xlu1 %2047 }
0x1129   : > { %v2049_v12 = vsub.f32 %v2045_v8, %v2048_v11 }
0x112b   : > { %v2050_v13 = vmul.f32 1.442695, %v2049_v12 }
0x112c   : > { %v2158_v21 = vpop.permute.xlu1 %2157 }
0x112d   : > { %3004 = vpow2.f32 %v2050_v13  ;;  %v2163_v23 = vsel %vm860_vm2, %v2158_v21, 0  ;;  %v2676_v21 = vld [vmem:[%s3554_s16] ss:$0 sm:$0xff] }
0x1130   : > { %v2156_v24 = vpop.permute.xlu1 %2155 }
0x1137   : > { %v3005_v14 = vpop.eup %3004 }
0x1138   : > { %v2052_v15 = vsel %vm860_vm2, %v3005_v14, 0.0 }
0x1139   : > { %2053 = vadd.xlane.f32.xlu0 %v2052_v15  ;;  %v2973_v15 = vld [vmem:[%s3556_s18 + $0x8] sm:$0xff]  }
0x114f   : > { %2058 = vrot.lane.b32.xlu0 %v3359_v50, %s3590_s27 }
0x11c6   : > { %v2054_v16 = vpop.xlane.xlu0 %2053 }
0x11c7   : > { %3006 = vrcp.f32 %v2054_v16  ;;  %v2975_v16 = vld [vmem:[%s3558_s20 + $0x8] sm:$0xff]  }
0x11ca   : > { %v2059_v17 = vpop.permute.xlu0 %2058 }
0x11cb   : > { %v2064_v19 = vsel %vm926_vm3, %v2059_v17, 0 }
0x11cc   : > { %2896 = vmatpush3.bf16.msra.mxu0 %v2064_v19 }
0x11cd   : > { %2907 = vmatprep.subr.bf16.mxu0 %v3024_v1 }
0x11d1   : > { %v3007_v59 = vpop.eup %3006 }
0x11d2   : > { %v2056_v20 = vmul.f32 %v3007_v59, %v3005_v14  ;;  %v2972_v14 = vld [vmem:[%s3556_s18] sm:$0xff]  }
0x11d4   : > { %v2057_v22 = vpack.c.bf16 %v2056_v20, %v2056_v20 }
0x11d6   : > { %2898 = vmatmul.mubr.msk.bf16.vlgmr.msra.gmra.mrb[40].mxu0 %vm860_vm2, %v2057_v22 }
0x11d7   : > { %2908 = vmatpush3.bf16.xpose.msra.mxu0 %v2163_v23  ;;  %2909 = vmatprep.mubr.msk.bf16.mxu0 %vm3025_vm0, %v3024_v1  ;;  %v2677_v23 = vld [vmem:[%s3555_s17] ss:$0 sm:$0xff] }
0x11d8   : > { %2919 = vmatprep.subr.bf16.mxu0 %v3024_v1 }
0x11de   : > { %2910 = vmatmul.mubr.msk.bf16.vlgmr.msra.gmra.mrb[44].mxu0 %vm860_vm2, %v2156_v24 }
0x11df   : > { %2921 = vmatprep.mubr.msk.bf16.mxu0 %vm3025_vm0, %v3024_v1  ;;  %2920 = vmatpush3.bf16.msra.mxu0 %v2273_v55 }
0x11e0   : > { %2933 = vmatprep.subr.bf16.mxu0 %v3024_v1 }
0x12a9   : > { %v2100_v27 = vpop.f32.mrb[40].mxu0 }
0x12aa   : > { %v2106_v28 = vpack.c.bf16 %v2100_v27, %v2100_v27  ;;  %v2899_v29 = vpop.f32.mrb[41].mxu0  ;;  %v2976_v27 = vld [vmem:[%s3558_s20 + $0x10] sm:$0xff]  }
0x12ab   : > { %v2103_v30 = vpop.f32.mrb[42].mxu0  ;;  %v2678_v29 = vld [vmem:[%s3557_s19] ss:$0 sm:$0xff] }
0x12ac   : > { %v2900_v3 = vpop.f32.mrb[43].mxu0  ;;  %2904 = vmatmul.mubr.msk.bf16.vlgmr.msra.gmra.mrb[48].mxu1 %vm860_vm2, %v2106_v28  ;;  %v2977_v28 = vld [vmem:[%s3558_s20 + $0x18] sm:$0xff]  }
0x12ad   : > { %2915 = vmatprep.mubr.msk.bf16.mxu1 %vm3025_vm0, %v3024_v1 }
0x12b1   : > { %v2199_v31 = vpop.f32.mrb[44].mxu0 }
0x12b2   : > { %v2205_v32 = vmul.f32 0.35355338, %v2199_v31  ;;  %v2911_v33 = vpop.f32.mrb[45].mxu0 }
0x12b3   : > { %v2202_v34 = vpop.f32.mrb[46].mxu0 }
0x12b4   : > { %v2912_v35 = vpop.f32.mrb[47].mxu0  ;;  %v2206_v36 = vadd.f32 %v2205_v32, %v3386_v63 }
0x12b6   : > { %v2207_v37 = vsel %vm860_vm2, %v2206_v36, -inf }
0x12b7   : > { %2208 = vmax.xlane.f32.xlu0 %v2207_v37 }
0x12cd   : > { %2219 = vrot.lane.b32.xlu0 %v3359_v50, %s3591_s25 }
0x1344   : > { %v2209_v38 = vpop.xlane.xlu0 %2208 }
0x1345   : > { %v2210_v39 = vsub.f32 %v2206_v36, %v2209_v38 }
0x1347   : > { %v2211_v40 = vmul.f32 1.442695, %v2210_v39 }
0x1348   : > { %v2220_v41 = vpop.permute.xlu0 %2219 }
0x1349   : > { %3008 = vpow2.f32 %v2211_v40  ;;  %v2225_v42 = vsel %vm926_vm3, %v2220_v41, 0 }
0x134a   : > { %2914 = vmatpush3.bf16.msra.mxu1 %v2225_v42 }
0x134b   : > { %2925 = vmatprep.subr.bf16.mxu1 %v3024_v1 }
0x1353   : > { %v3009_v44 = vpop.eup %3008 }
0x1354   : > { %v2213_v45 = vsel %vm860_vm2, %v3009_v44, 0.0 }
0x1355   : > { %2214 = vadd.xlane.f32.xlu1 %v2213_v45 }
0x137f   : > { %v2148_v63 = vpop.f32.mrb[48].mxu1 }
0x1380   : > { %v2154_v46 = vadd.f32 %v2148_v63, %v3433_v18  ;;  %v2905_v47 = vpop.f32.mrb[49].mxu1 }
0x1381   : > { %v2151_v48 = vpop.f32.mrb[50].mxu1 }
0x1382   : > { %v2906_v50 = vpop.f32.mrb[51].mxu1 }
0x13e2   : > { %v2215_v49 = vpop.xlane.xlu1 %2214 }
0x13e3   : > { %3010 = vrcp.f32 %v2215_v49 }
0x13ed   : > { %v3011_v51 = vpop.eup %3010 }
0x13ee   : > { %v2217_v52 = vmul.f32 %v3011_v51, %v3009_v44 }
0x13f0   : > { %v2218_v53 = vpack.c.bf16 %v2217_v52, %v2217_v52  ;;  %v2688_v52 = vld [vmem:[%s3560_s22] ss:$0 sm:$0xff] }
0x13f2   : > { %2916 = vmatmul.mubr.msk.bf16.vlgmr.msra.gmra.mrb[52].mxu1 %vm860_vm2, %v2218_v53 }
0x13f3   : > { %2929 = vmatprep.mubr.msk.bf16.mxu1 %vm3025_vm0, %v3024_v1  ;;  %2926 = vmatpush3.bf16.msra.mxu1 %v2972_v14 }
0x13f4   : > { %2927 = vmatprep.subr.bf16.mxu1 %v3024_v1 }
0x13f7   : > { %2928 = vmatpush3.bf16.msra.mxu1 %v2973_v15 }
0x14c5   : > { %v2261_v56 = vpop.f32.mrb[52].mxu1 }
0x14c6   : > { %v2267_v57 = vpack.c.bf16 %v2261_v56, %v2261_v56  ;;  %v2917_v58 = vpop.f32.mrb[53].mxu1 }
0x14c7   : > { %v2264_v60 = vpop.f32.mrb[54].mxu1 }
0x14c8   : > { %v2918_v61 = vpop.f32.mrb[55].mxu1  ;;  %2922 = vmatmul.mubr.msk.bf16.vlgmr.msra.gmra.mrb[48].mxu0 %vm860_vm2, %v2267_v57 }
0x14c9   : > { %2941 = vmatprep.mubr.msk.bf16.mxu0 %vm3025_vm0, %v3024_v1 }
0x159b   : > { %v2309_v18 = vpop.f32.mrb[48].mxu0 }
0x159c   : > { %v2315_v0 = vadd.f32 %v2309_v18, %v2154_v46  ;;  %v2923_v10 = vpop.f32.mrb[49].mxu0 }
0x159d   : > { %v2312_v2 = vpop.f32.mrb[50].mxu0 }
0x159e   : > { %v2323_v4 = vadd.f32 %v2675_v62, %v2315_v0  ;;  %v2924_v5 = vpop.f32.mrb[51].mxu0 }
0x15a0   : > { %v2324_v6 = vadd.f32 %v2323_v4, %v3349_v43  ;;  %v2974_v43 = vld [vmem:[%s3558_s20] sm:$0xff]  }
0x15a1   : > { %2934 = vmatpush3.bf16.msra.mxu0 %v2974_v43 }
0x15a2   : > { %v2327_v7 = vsel %vm811_vm1, %v2324_v6, 0.0  ;;  %2935 = vmatprep.subr.bf16.mxu0 %v3024_v1 }
0x15a3   : > { %2328 = vadd.xlane.f32.xlu1 %v2327_v7 }
0x15a5   : > { %2936 = vmatpush3.bf16.msra.mxu0 %v2975_v16 }
0x15a6   : > { %2937 = vmatprep.subr.bf16.mxu0 %v3024_v1 }
0x15a9   : > { %2938 = vmatpush3.bf16.msra.mxu0 %v2976_v27 }
0x15aa   : > { %2939 = vmatprep.subr.bf16.mxu0 %v3024_v1  ;;  %v2682_v1 = vld [vmem:[%s3559_s21] ss:$0 sm:$0xff] }
0x15ad   : > { %2940 = vmatpush3.bf16.msra.mxu0 %v2977_v28 }
0x1630   : > { %v2329_v8 = vpop.xlane.xlu1 %2328 }
0x1631   : > { %v2330_v9 = vmul.f32 0.03125, %v2329_v8 }
0x1633   : > { %v2331_v11 = vsub.f32 %v2324_v6, %v2330_v9 }
0x1635   : > { %v2332_v12 = vmul.f32 %v2331_v11, %v2331_v11 }
0x1637   : > { %v2333_v13 = vsel %vm811_vm1, %v2332_v12, 0.0 }
0x1638   : > { %2334 = vadd.xlane.f32.xlu1 %v2333_v13 }
0x16c5   : > { %v2335_v17 = vpop.xlane.xlu1 %2334 }
0x16c6   : > { %v2336_v19 = vmul.f32 0.03125, %v2335_v17 }
0x16c8   : > { %v2337_v59 = vadd.f32 1e-05, %v2336_v19 }
0x16ca   : > { %3012 = vrsqrt.f32 %v2337_v59 }
0x16d4   : > { %v3013_v20 = vpop.eup %3012 }
0x16d5   : > { %v2339_v22 = vmul.f32 %v3013_v20, %v2331_v11 }
0x16d7   : > { %v2346_v24 = vmul.f32 %v2676_v21, %v2339_v22 }
0x16d9   : > { %v2353_v25 = vadd.f32 %v2677_v23, %v2346_v24 }
0x16db   : > { %v2354_v26 = vpack.c.bf16 %v2353_v25, %v2353_v25 }
0x16dd   : > { %2930 = vmatmul.mubr.msk.bf16.vlgmr.msra.gmra.mrb[56].mxu1 %vm811_vm1, %v2354_v26 }
0x17b0   : > { %v2415_v30 = vpop.f32.mrb[56].mxu1 }
0x17b1   : > { %v2416_v3 = vadd.f32 %v2678_v29, %v2415_v30  ;;  %v2931_v31 = vpop.f32.mrb[57].mxu1 }
0x17b2   : > { %v2418_v32 = vpop.f32.mrb[58].mxu1 }
0x17b3   : > { %v2421_v33 = vmax.f32 %v2416_v3, 0.0  ;;  %v2932_v34 = vpop.f32.mrb[59].mxu1 }
0x17b5   : > { %v2422_v35 = vpack.c.bf16 %v2421_v33, %v2421_v33 }
0x17b7   : > { %2942 = vmatmul.mubr.msk.bf16.vlgmr.msra.gmra.mrb[52].mxu0 %vm2462_vm4, %v2422_v35 }
0x188a   : > { %v2500_v36 = vpop.f32.mrb[52].mxu0 }
0x188b   : > { %v2501_v37 = vadd.f32 %v2682_v1, %v2500_v36  ;;  %v2943_v38 = vpop.f32.mrb[53].mxu0 }
0x188c   : > { %v2503_v39 = vpop.f32.mrb[54].mxu0 }
0x188d   : > { %v2944_v40 = vpop.f32.mrb[55].mxu0  ;;  %v2506_v41 = vadd.f32 %v2501_v37, %v2353_v25 }
0x188f   : > { %v2509_v42 = vsel %vm811_vm1, %v2506_v41, 0.0 }
0x1890   : > { %2510 = vadd.xlane.f32.xlu1 %v2509_v42 }
0x191d   : > { %v2511_v44 = vpop.xlane.xlu1 %2510 }
0x191e   : > { %v2512_v45 = vmul.f32 0.03125, %v2511_v44 }
0x1920   : > { %v2513_v63 = vsub.f32 %v2506_v41, %v2512_v45 }
0x1922   : > { %v2514_v46 = vmul.f32 %v2513_v63, %v2513_v63 }
0x1924   : > { %v2515_v47 = vsel %vm811_vm1, %v2514_v46, 0.0 }
0x1925   : > { %2516 = vadd.xlane.f32.xlu1 %v2515_v47 }
0x19b2   : > { %v2517_v48 = vpop.xlane.xlu1 %2516 }
0x19b3   : > { %v2518_v50 = vmul.f32 0.03125, %v2517_v48 }
0x19b5   : > { %v2519_v49 = vadd.f32 1e-05, %v2518_v50 }
0x19b7   : > { %3014 = vrsqrt.f32 %v2519_v49 }
0x19c1   : > { %v3015_v51 = vpop.eup %3014 }
0x19c2   : > { %v2521_v53 = vmul.f32 %v3015_v51, %v2513_v63 }
0x19c4   : > { %v2528_v55 = vmul.f32 %v2688_v52, %v2521_v53 }
0x19c6   : > { %v2535_v56 = vadd.f32 %v2689_v54, %v2528_v55 }
0x19c8   : > { %2536 = vst.msk [vmem:[%s783_s4] sm:$0xff] %vm811_vm1, %v2535_v56 }
0x19c9 PF: > { %s34_s5 = sadd.s32 1, %s3022_s5  }
0x19ca   : > { %p31_p4 = scmp.ge.s32.totalorder %s34_s5, 4  }
0x19cc   :  { %33 = sbr.rel (!%p31_p4) target bundleno = 10 (0xa), region = 155 }

</bundles_post_ra>
